<compile_context>
chip_gen: v7x
topology: tpu7x:2x2x1
jax: 0.10.0
libtpu: 0.0.40
codegen_flags: <defaults>
</compile_context>

<pallas_src>
import jax
import jax.numpy as jnp
from jax.experimental import pallas as pl
from jax.experimental.pallas import tpu as pltpu


def _round_up(n, m):
    return ((n + m - 1) // m) * m


def _lstm_fc_kernel(x_ref,        # (T, TB, Dp)   bf16, time-major
                    w_ih0_ref,    # (Dp, 4Hp)     bf16
                    w_hh0_ref,    # (Hp, 4Hp)     bf16
                    b0_ref,       # (1, 4Hp)      f32
                    w_ih1_ref,    # (Hp, 4Hp)     bf16
                    w_hh1_ref,    # (Hp, 4Hp)     bf16
                    b1_ref,       # (1, 4Hp)      f32
                    w_fc_ref,     # (Hp, Op)      bf16
                    b_fc_ref,     # (1, Op)       f32
                    out_ref,      # (TB, Op)      f32
                    xg_ref):      # scratch (T, TB, 4Hp) bf16
    T, TB, Dp = x_ref.shape
    Hp = w_hh0_ref.shape[0]
    G = 4 * Hp

    # ---- Layer-0 input projection, hoisted off the recurrent path ---------
    # One (T*TB, Dp) @ (Dp, 4Hp) matmul, bias added once, staged as bf16 so
    # per-step re-reads during the recurrence are half-width.
    x_all = x_ref[...].reshape(T * TB, Dp)
    xg = jnp.dot(x_all, w_ih0_ref[...],
                 preferred_element_type=jnp.float32) + b0_ref[...]
    xg_ref[...] = xg.astype(jnp.bfloat16).reshape(T, TB, G)

    # Weight views hoisted out of the unrolled loop.
    w_hh0 = w_hh0_ref[...]
    w_ih1 = w_ih1_ref[...]
    w_hh1 = w_hh1_ref[...]

    h0 = jnp.zeros((TB, Hp), jnp.float32)
    c0 = jnp.zeros((TB, Hp), jnp.float32)
    h1 = jnp.zeros((TB, Hp), jnp.float32)
    c1 = jnp.zeros((TB, Hp), jnp.float32)

    def activate(gates, c):
        # Gate blocks are 128-lane aligned -> whole-vreg slices, no XLU shuffles.
        i = jax.nn.sigmoid(gates[:, 0 * Hp:1 * Hp])
        f = jax.nn.sigmoid(gates[:, 1 * Hp:2 * Hp])
        g = jnp.tanh(gates[:, 2 * Hp:3 * Hp])
        o = jax.nn.sigmoid(gates[:, 3 * Hp:4 * Hp])
        c_new = f * c + i * g
        h_new = o * jnp.tanh(c_new)
        return h_new, c_new

    # Small static T -> fully unrolled time loop.
    # TODO(synk): if production T grows beyond ~16-32, switch to
    # lax.fori_loop(..., unroll=k) with pl.ds indexing into xg_ref and re-check
    # the xg scratch against the VMEM budget (v7x: 64 MiB phys / 32 MiB scoped).
    for t in range(T):
        # Layer 0: precomputed input gates (bf16, upcast on add) + recurrent term.
        # Single add-of-dot expression so Mosaic can accumulate onto the MRB (v7x).
        g0 = xg_ref[t] + jnp.dot(h0.astype(jnp.bfloat16), w_hh0,
                                 preferred_element_type=jnp.float32)
        h0, c0 = activate(g0, c0)

        # Layer 1: two dots accumulated in f32 (no per-step lane concat);
        # (1, 4Hp) bias broadcasts over sublanes for free.
        g1 = (jnp.dot(h0.astype(jnp.bfloat16), w_ih1,
                      preferred_element_type=jnp.float32)
              + jnp.dot(h1.astype(jnp.bfloat16), w_hh1,
                        preferred_element_type=jnp.float32)
              + b1_ref[...])
        h1, c1 = activate(g1, c1)

    # fc(lstm_out[:, -1, :]) == fc(h1 at final timestep); (TB, Op) lane-dense store.
    out_ref[...] = (jnp.dot(h1.astype(jnp.bfloat16), w_fc_ref[...],
                            preferred_element_type=jnp.float32)
                    + b_fc_ref[...]).astype(out_ref.dtype)


def demand_prediction_forward(x, params):
    """x: (B, T, input_size) float32. Returns (B, output_size) float32."""
    B, T, D = x.shape
    Dp = params["w_ih0"].shape[0]
    Hp = params["w_hh0"].shape[0]
    Op = params["w_fc"].shape[1]
    O = params["output_size"]
    assert D == params["input_size"]

    # Batch block: multiple of 16 sublane-pairs (bf16 x), capped at 256 for the
    # v6e/v7x 256-wide MXU. On v5e prefer 128; on v7x keep Bp/TB >= 2 at
    # production batch so both TensorCores get a "parallel" block.
    TB = min(256, _round_up(B, 16))
    Bp = _round_up(B, TB)

    # Transpose the *unpadded* tensor to time-major, cast to bf16, then pad
    # batch/feature once (no inflated f32 intermediate, half the input DMA).
    x_tm = jnp.transpose(x.astype(jnp.bfloat16), (1, 0, 2))      # (T, B, D)
    x_tm = jnp.pad(x_tm, ((0, 0), (0, Bp - B), (0, Dp - D)))     # (T, Bp, Dp)

    rep = lambda b: (0, 0)                      # weights replicated per batch block
    out_padded = pl.pallas_call(
        _lstm_fc_kernel,
        out_shape=jax.ShapeDtypeStruct((Bp, Op), jnp.float32),
        grid=(Bp // TB,),
        in_specs=[
            pl.BlockSpec((T, TB, Dp), lambda b: (0, b, 0)),   # x (batch-blocked, bf16)
            pl.BlockSpec((Dp, 4 * Hp), rep),                  # W_ih0
            pl.BlockSpec((Hp, 4 * Hp), rep),                  # W_hh0
            pl.BlockSpec((1, 4 * Hp), rep),                   # b0
            pl.BlockSpec((Hp, 4 * Hp), rep),                  # W_ih1
            pl.BlockSpec((Hp, 4 * Hp), rep),                  # W_hh1
            pl.BlockSpec((1, 4 * Hp), rep),                   # b1
            pl.BlockSpec((Hp, Op), rep),                      # W_fc
            pl.BlockSpec((1, Op), rep),                       # b_fc
        ],
        out_specs=pl.BlockSpec((TB, Op), lambda b: (b, 0)),
        scratch_shapes=[pltpu.VMEM((T, TB, 4 * Hp), jnp.bfloat16)],
        compiler_params=pltpu.CompilerParams(
            dimension_semantics=("parallel",)),
    )(x_tm,
      params["w_ih0"], params["w_hh0"], params["b0"],
      params["w_ih1"], params["w_hh1"], params["b1"],
      params["w_fc"], params["b_fc"])

    return out_padded[:B, :O]


def _pad_gate_cols(w_t, in_pad, H, Hp):
    """(in, 4H) gate-blocked [i|f|g|o] -> zero-padded (in_pad, 4Hp), each gate
    block starting on a 128-lane boundary."""
    in_dim = w_t.shape[0]
    out = jnp.zeros((in_pad, 4 * Hp), jnp.float32)
    for g in range(4):
        out = out.at[:in_dim, g * Hp:g * Hp + H].set(w_t[:, g * H:(g + 1) * H])
    return out


def _pad_gate_bias(b, H, Hp):
    out = jnp.zeros((1, 4 * Hp), jnp.float32)
    for g in range(4):
        out = out.at[0, g * Hp:g * Hp + H].set(b[g * H:(g + 1) * H])
    return out


def init_params(key, input_size=10, hidden_size=64, output_size=24):
    """PyTorch-shaped init (W_ih (4H,in), W_hh (4H,H), biases (4H,); fc (O,H),(O,)),
    then transposed / gate-128-padded / bf16-cast for the kernel.
    Returns (kernel_params, raw_f32_params)."""
    H = hidden_size
    Hp = _round_up(H, 128)
    Dp = _round_up(input_size, 16)      # bf16 sublane-pair alignment only (no 128 pad)
    Op = _round_up(output_size, 128)
    k = 1.0 / (H ** 0.5)
    keys = jax.random.split(key, 10)

    def u(kk, shape):
        return jax.random.uniform(kk, shape, jnp.float32, -k, k)

    w_ih0 = u(keys[0], (4 * H, input_size))
    w_hh0 = u(keys[1], (4 * H, H))
    b_ih0 = u(keys[2], (4 * H,))
    b_hh0 = u(keys[3], (4 * H,))
    w_ih1 = u(keys[4], (4 * H, H))
    w_hh1 = u(keys[5], (4 * H, H))
    b_ih1 = u(keys[6], (4 * H,))
    b_hh1 = u(keys[7], (4 * H,))
    w_fc = u(keys[8], (output_size, H))
    b_fc = u(keys[9], (output_size,))

    params = {
        "w_ih0": _pad_gate_cols(w_ih0.T, Dp, H, Hp).astype(jnp.bfloat16),
        "w_hh0": _pad_gate_cols(w_hh0.T, Hp, H, Hp).astype(jnp.bfloat16),
        "b0": _pad_gate_bias(b_ih0 + b_hh0, H, Hp),
        "w_ih1": _pad_gate_cols(w_ih1.T, Hp, H, Hp).astype(jnp.bfloat16),
        "w_hh1": _pad_gate_cols(w_hh1.T, Hp, H, Hp).astype(jnp.bfloat16),
        "b1": _pad_gate_bias(b_ih1 + b_hh1, H, Hp),
        "w_fc": jnp.zeros((Hp, Op), jnp.float32)
                   .at[:H, :output_size].set(w_fc.T).astype(jnp.bfloat16),
        "b_fc": jnp.zeros((1, Op), jnp.float32).at[0, :output_size].set(b_fc),
        "input_size": input_size,
        "hidden_size": H,
        "output_size": output_size,
    }
    raw = {"w_ih0": w_ih0, "w_hh0": w_hh0, "b_ih0": b_ih0, "b_hh0": b_hh0,
           "w_ih1": w_ih1, "w_hh1": w_hh1, "b_ih1": b_ih1, "b_hh1": b_hh1,
           "w_fc": w_fc, "b_fc": b_fc}
    return params, raw


def reference_forward(x, raw):
    """Pure-JAX f32 reference matching PyTorch nn.LSTM inference semantics."""
    H = raw["w_hh0"].shape[1]
    B, T, _ = x.shape

    def cell(xt, h, c, w_ih, w_hh, b_ih, b_hh):
        g = xt @ w_ih.T + h @ w_hh.T + b_ih + b_hh
        i = jax.nn.sigmoid(g[:, 0 * H:1 * H])
        f = jax.nn.sigmoid(g[:, 1 * H:2 * H])
        gg = jnp.tanh(g[:, 2 * H:3 * H])
        o = jax.nn.sigmoid(g[:, 3 * H:4 * H])
        c = f * c + i * gg
        return o * jnp.tanh(c), c

    h0 = c0 = h1 = c1 = jnp.zeros((B, H), jnp.float32)
    for t in range(T):
        h0, c0 = cell(x[:, t], h0, c0, raw["w_ih0"], raw["w_hh0"],
                      raw["b_ih0"], raw["b_hh0"])
        h1, c1 = cell(h0, h1, c1, raw["w_ih1"], raw["w_hh1"],
                      raw["b_ih1"], raw["b_hh1"])
    return h1 @ raw["w_fc"].T + raw["b_fc"]


if __name__ == "__main__":
    key = jax.random.PRNGKey(0)
    k_param, k_x = jax.random.split(key)

    batch, seq, input_size, hidden_size, output_size = 2, 8, 10, 64, 24
    params, raw = init_params(k_param, input_size, hidden_size, output_size)
    x = jax.random.normal(k_x, (batch, seq, input_size), jnp.float32)

    out = jax.block_until_ready(demand_prediction_forward(x, params))
    assert out.shape == (batch, output_size)
    assert bool(jnp.all(jnp.isfinite(out)))

    ref = reference_forward(x, raw)
    max_err = float(jnp.max(jnp.abs(out - ref)))
    assert max_err < 2e-2, f"max abs err vs f32 reference: {max_err}"
    print("KERNEL_OK")
</pallas_src>

<mosaic_0001>
module attributes {stable_mosaic.version = 11 : i64} {
  func.func @_lstm_fc_kernel(%arg0: i32, %arg1: memref<8x16x16xbf16, #tpu.memory_space<vmem>>, %arg2: memref<16x512xbf16, #tpu.memory_space<vmem>>, %arg3: memref<128x512xbf16, #tpu.memory_space<vmem>>, %arg4: memref<1x512xf32, #tpu.memory_space<vmem>>, %arg5: memref<128x512xbf16, #tpu.memory_space<vmem>>, %arg6: memref<128x512xbf16, #tpu.memory_space<vmem>>, %arg7: memref<1x512xf32, #tpu.memory_space<vmem>>, %arg8: memref<128x128xbf16, #tpu.memory_space<vmem>>, %arg9: memref<1x128xf32, #tpu.memory_space<vmem>>, %arg10: memref<16x128xf32, #tpu.memory_space<vmem>>, %arg11: memref<8x16x512xbf16, #tpu.memory_space<vmem>>) attributes {dimension_semantics = [#tpu.dimension_semantics<parallel>], iteration_bounds = array<i64: 1>, scalar_prefetch = 0 : i64, scratch_operands = 1 : i64, tpu.core_type = #tpu.core_type<tc>, window_params = [{transform_indices = @transform_0, window_bounds = array<i64: 8, 16, 16>}, {pipeline_mode = #tpu.pipeline_mode<synchronous>, transform_indices = @transform_1, window_bounds = array<i64: 16, 512>}, {pipeline_mode = #tpu.pipeline_mode<synchronous>, transform_indices = @transform_2, window_bounds = array<i64: 128, 512>}, {pipeline_mode = #tpu.pipeline_mode<synchronous>, transform_indices = @transform_3, window_bounds = array<i64: 1, 512>}, {pipeline_mode = #tpu.pipeline_mode<synchronous>, transform_indices = @transform_4, window_bounds = array<i64: 128, 512>}, {pipeline_mode = #tpu.pipeline_mode<synchronous>, transform_indices = @transform_5, window_bounds = array<i64: 128, 512>}, {pipeline_mode = #tpu.pipeline_mode<synchronous>, transform_indices = @transform_6, window_bounds = array<i64: 1, 512>}, {pipeline_mode = #tpu.pipeline_mode<synchronous>, transform_indices = @transform_7, window_bounds = array<i64: 128, 128>}, {pipeline_mode = #tpu.pipeline_mode<synchronous>, transform_indices = @transform_8, window_bounds = array<i64: 1, 128>}, {transform_indices = @transform_9, window_bounds = array<i64: 16, 128>}]} {
    %c0 = arith.constant 0 : index
    %c0_0 = arith.constant 0 : index
    %c0_1 = arith.constant 0 : index
    %0 = vector.load %arg1[%c0, %c0_0, %c0_1] : memref<8x16x16xbf16, #tpu.memory_space<vmem>>, vector<8x16x16xbf16>
    %1 = vector.shape_cast %0 : vector<8x16x16xbf16> to vector<128x16xbf16>
    %c0_2 = arith.constant 0 : index
    %c0_3 = arith.constant 0 : index
    %2 = vector.load %arg2[%c0_2, %c0_3] : memref<16x512xbf16, #tpu.memory_space<vmem>>, vector<16x512xbf16>
    %cst = arith.constant dense<0.000000e+00> : vector<128x512xf32>
    %3 = tpu.matmul %1, %2, %cst {dimension_numbers = #tpu.dot_dimension_numbers<[1], [0], [0], [1], [0, 0, 1, 1], [], []>} : vector<128x16xbf16>, vector<16x512xbf16>, vector<128x512xf32> -> vector<128x512xf32>
    %c0_4 = arith.constant 0 : index
    %c0_5 = arith.constant 0 : index
    %4 = vector.load %arg4[%c0_4, %c0_5] : memref<1x512xf32, #tpu.memory_space<vmem>>, vector<1x512xf32>
    %5 = vector.broadcast %4 : vector<1x512xf32> to vector<128x512xf32>
    %6 = arith.addf %3, %5 : vector<128x512xf32>
    %7 = arith.truncf %6 : vector<128x512xf32> to vector<128x512xbf16>
    %8 = vector.shape_cast %7 : vector<128x512xbf16> to vector<8x16x512xbf16>
    %c0_6 = arith.constant 0 : index
    %c0_7 = arith.constant 0 : index
    %c0_8 = arith.constant 0 : index
    %9 = vector.load %arg11[%c0_6, %c0_7, %c0_8] : memref<8x16x512xbf16, #tpu.memory_space<vmem>>, vector<8x16x512xbf16>
    tpu.vector_store %arg11[%c0_6, %c0_7, %c0_8], %8 {strides = array<i32>} : memref<8x16x512xbf16, #tpu.memory_space<vmem>>, vector<8x16x512xbf16>,
    %c0_9 = arith.constant 0 : index
    %c0_10 = arith.constant 0 : index
    %10 = vector.load %arg3[%c0_9, %c0_10] : memref<128x512xbf16, #tpu.memory_space<vmem>>, vector<128x512xbf16>
    %c0_11 = arith.constant 0 : index
    %c0_12 = arith.constant 0 : index
    %11 = vector.load %arg5[%c0_11, %c0_12] : memref<128x512xbf16, #tpu.memory_space<vmem>>, vector<128x512xbf16>
    %c0_13 = arith.constant 0 : index
    %c0_14 = arith.constant 0 : index
    %12 = vector.load %arg6[%c0_13, %c0_14] : memref<128x512xbf16, #tpu.memory_space<vmem>>, vector<128x512xbf16>
    %cst_15 = arith.constant 0.000000e+00 : f32
    %13 = vector.broadcast %cst_15 : f32 to vector<16x128xf32>
    %cst_16 = arith.constant 0.000000e+00 : f32
    %14 = vector.broadcast %cst_16 : f32 to vector<16x128xf32>
    %cst_17 = arith.constant 0.000000e+00 : f32
    %15 = vector.broadcast %cst_17 : f32 to vector<16x128xf32>
    %cst_18 = arith.constant 0.000000e+00 : f32
    %16 = vector.broadcast %cst_18 : f32 to vector<16x128xf32>
    %c0_19 = arith.constant 0 : index
    %c0_20 = arith.constant 0 : index
    %c0_21 = arith.constant 0 : index
    %17 = vector.load %arg11[%c0_19, %c0_20, %c0_21] : memref<8x16x512xbf16, #tpu.memory_space<vmem>>, vector<1x16x512xbf16>
    %18 = vector.shape_cast %17 : vector<1x16x512xbf16> to vector<16x512xbf16>
    %19 = arith.truncf %13 : vector<16x128xf32> to vector<16x128xbf16>
    %cst_22 = arith.constant dense<0.000000e+00> : vector<16x512xf32>
    %20 = tpu.matmul %19, %10, %cst_22 {dimension_numbers = #tpu.dot_dimension_numbers<[1], [0], [0], [1], [0, 0, 1, 1], [], []>} : vector<16x128xbf16>, vector<128x512xbf16>, vector<16x512xf32> -> vector<16x512xf32>
    %21 = arith.extf %18 : vector<16x512xbf16> to vector<16x512xf32>
    %22 = arith.addf %21, %20 : vector<16x512xf32>
    %23 = vector.extract_strided_slice %22 {offsets = [0, 0], sizes = [16, 128], strides = [1, 1]} : vector<16x512xf32> to vector<16x128xf32>
    %24 = arith.negf %23 : vector<16x128xf32>
    %25 = math.exp %24 : vector<16x128xf32>
    %cst_23 = arith.constant 1.000000e+00 : f32
    %26 = vector.broadcast %cst_23 : f32 to vector<16x128xf32>
    %27 = arith.addf %26, %25 : vector<16x128xf32>
    %28 = arith.divf %26, %27 : vector<16x128xf32>
    %29 = vector.extract_strided_slice %22 {offsets = [0, 128], sizes = [16, 128], strides = [1, 1]} : vector<16x512xf32> to vector<16x128xf32>
    %30 = arith.negf %29 : vector<16x128xf32>
    %31 = math.exp %30 : vector<16x128xf32>
    %cst_24 = arith.constant 1.000000e+00 : f32
    %32 = vector.broadcast %cst_24 : f32 to vector<16x128xf32>
    %33 = arith.addf %32, %31 : vector<16x128xf32>
    %34 = arith.divf %32, %33 : vector<16x128xf32>
    %35 = vector.extract_strided_slice %22 {offsets = [0, 256], sizes = [16, 128], strides = [1, 1]} : vector<16x512xf32> to vector<16x128xf32>
    %36 = math.tanh %35 : vector<16x128xf32>
    %37 = vector.extract_strided_slice %22 {offsets = [0, 384], sizes = [16, 128], strides = [1, 1]} : vector<16x512xf32> to vector<16x128xf32>
    %38 = arith.negf %37 : vector<16x128xf32>
    %39 = math.exp %38 : vector<16x128xf32>
    %cst_25 = arith.constant 1.000000e+00 : f32
    %40 = vector.broadcast %cst_25 : f32 to vector<16x128xf32>
    %41 = arith.addf %40, %39 : vector<16x128xf32>
    %42 = arith.divf %40, %41 : vector<16x128xf32>
    %43 = arith.mulf %34, %14 : vector<16x128xf32>
    %44 = arith.mulf %28, %36 : vector<16x128xf32>
    %45 = arith.addf %43, %44 : vector<16x128xf32>
    %46 = math.tanh %45 : vector<16x128xf32>
    %47 = arith.mulf %42, %46 : vector<16x128xf32>
    %48 = arith.truncf %47 : vector<16x128xf32> to vector<16x128xbf16>
    %cst_26 = arith.constant dense<0.000000e+00> : vector<16x512xf32>
    %49 = tpu.matmul %48, %11, %cst_26 {dimension_numbers = #tpu.dot_dimension_numbers<[1], [0], [0], [1], [0, 0, 1, 1], [], []>} : vector<16x128xbf16>, vector<128x512xbf16>, vector<16x512xf32> -> vector<16x512xf32>
    %50 = arith.truncf %15 : vector<16x128xf32> to vector<16x128xbf16>
    %cst_27 = arith.constant dense<0.000000e+00> : vector<16x512xf32>
    %51 = tpu.matmul %50, %12, %cst_27 {dimension_numbers = #tpu.dot_dimension_numbers<[1], [0], [0], [1], [0, 0, 1, 1], [], []>} : vector<16x128xbf16>, vector<128x512xbf16>, vector<16x512xf32> -> vector<16x512xf32>
    %52 = arith.addf %49, %51 : vector<16x512xf32>
    %c0_28 = arith.constant 0 : index
    %c0_29 = arith.constant 0 : index
    %53 = vector.load %arg7[%c0_28, %c0_29] : memref<1x512xf32, #tpu.memory_space<vmem>>, vector<1x512xf32>
    %54 = vector.broadcast %53 : vector<1x512xf32> to vector<16x512xf32>
    %55 = arith.addf %52, %54 : vector<16x512xf32>
    %56 = vector.extract_strided_slice %55 {offsets = [0, 0], sizes = [16, 128], strides = [1, 1]} : vector<16x512xf32> to vector<16x128xf32>
    %57 = arith.negf %56 : vector<16x128xf32>
    %58 = math.exp %57 : vector<16x128xf32>
    %cst_30 = arith.constant 1.000000e+00 : f32
    %59 = vector.broadcast %cst_30 : f32 to vector<16x128xf32>
    %60 = arith.addf %59, %58 : vector<16x128xf32>
    %61 = arith.divf %59, %60 : vector<16x128xf32>
    %62 = vector.extract_strided_slice %55 {offsets = [0, 128], sizes = [16, 128], strides = [1, 1]} : vector<16x512xf32> to vector<16x128xf32>
    %63 = arith.negf %62 : vector<16x128xf32>
    %64 = math.exp %63 : vector<16x128xf32>
    %cst_31 = arith.constant 1.000000e+00 : f32
    %65 = vector.broadcast %cst_31 : f32 to vector<16x128xf32>
    %66 = arith.addf %65, %64 : vector<16x128xf32>
    %67 = arith.divf %65, %66 : vector<16x128xf32>
    %68 = vector.extract_strided_slice %55 {offsets = [0, 256], sizes = [16, 128], strides = [1, 1]} : vector<16x512xf32> to vector<16x128xf32>
    %69 = math.tanh %68 : vector<16x128xf32>
    %70 = vector.extract_strided_slice %55 {offsets = [0, 384], sizes = [16, 128], strides = [1, 1]} : vector<16x512xf32> to vector<16x128xf32>
    %71 = arith.negf %70 : vector<16x128xf32>
    %72 = math.exp %71 : vector<16x128xf32>
    %cst_32 = arith.constant 1.000000e+00 : f32
    %73 = vector.broadcast %cst_32 : f32 to vector<16x128xf32>
    %74 = arith.addf %73, %72 : vector<16x128xf32>
    %75 = arith.divf %73, %74 : vector<16x128xf32>
    %76 = arith.mulf %67, %16 : vector<16x128xf32>
    %77 = arith.mulf %61, %69 : vector<16x128xf32>
    %78 = arith.addf %76, %77 : vector<16x128xf32>
    %79 = math.tanh %78 : vector<16x128xf32>
    %80 = arith.mulf %75, %79 : vector<16x128xf32>
    %c1 = arith.constant 1 : index
    %c0_33 = arith.constant 0 : index
    %c0_34 = arith.constant 0 : index
    %81 = vector.load %arg11[%c1, %c0_33, %c0_34] : memref<8x16x512xbf16, #tpu.memory_space<vmem>>, vector<1x16x512xbf16>
    %82 = vector.shape_cast %81 : vector<1x16x512xbf16> to vector<16x512xbf16>
    %83 = arith.truncf %47 : vector<16x128xf32> to vector<16x128xbf16>
    %cst_35 = arith.constant dense<0.000000e+00> : vector<16x512xf32>
    %84 = tpu.matmul %83, %10, %cst_35 {dimension_numbers = #tpu.dot_dimension_numbers<[1], [0], [0], [1], [0, 0, 1, 1], [], []>} : vector<16x128xbf16>, vector<128x512xbf16>, vector<16x512xf32> -> vector<16x512xf32>
    %85 = arith.extf %82 : vector<16x512xbf16> to vector<16x512xf32>
    %86 = arith.addf %85, %84 : vector<16x512xf32>
    %87 = vector.extract_strided_slice %86 {offsets = [0, 0], sizes = [16, 128], strides = [1, 1]} : vector<16x512xf32> to vector<16x128xf32>
    %88 = arith.negf %87 : vector<16x128xf32>
    %89 = math.exp %88 : vector<16x128xf32>
    %cst_36 = arith.constant 1.000000e+00 : f32
    %90 = vector.broadcast %cst_36 : f32 to vector<16x128xf32>
    %91 = arith.addf %90, %89 : vector<16x128xf32>
    %92 = arith.divf %90, %91 : vector<16x128xf32>
    %93 = vector.extract_strided_slice %86 {offsets = [0, 128], sizes = [16, 128], strides = [1, 1]} : vector<16x512xf32> to vector<16x128xf32>
    %94 = arith.negf %93 : vector<16x128xf32>
    %95 = math.exp %94 : vector<16x128xf32>
    %cst_37 = arith.constant 1.000000e+00 : f32
    %96 = vector.broadcast %cst_37 : f32 to vector<16x128xf32>
    %97 = arith.addf %96, %95 : vector<16x128xf32>
    %98 = arith.divf %96, %97 : vector<16x128xf32>
    %99 = vector.extract_strided_slice %86 {offsets = [0, 256], sizes = [16, 128], strides = [1, 1]} : vector<16x512xf32> to vector<16x128xf32>
    %100 = math.tanh %99 : vector<16x128xf32>
    %101 = vector.extract_strided_slice %86 {offsets = [0, 384], sizes = [16, 128], strides = [1, 1]} : vector<16x512xf32> to vector<16x128xf32>
    %102 = arith.negf %101 : vector<16x128xf32>
    %103 = math.exp %102 : vector<16x128xf32>
    %cst_38 = arith.constant 1.000000e+00 : f32
    %104 = vector.broadcast %cst_38 : f32 to vector<16x128xf32>
    %105 = arith.addf %104, %103 : vector<16x128xf32>
    %106 = arith.divf %104, %105 : vector<16x128xf32>
    %107 = arith.mulf %98, %45 : vector<16x128xf32>
    %108 = arith.mulf %92, %100 : vector<16x128xf32>
    %109 = arith.addf %107, %108 : vector<16x128xf32>
    %110 = math.tanh %109 : vector<16x128xf32>
    %111 = arith.mulf %106, %110 : vector<16x128xf32>
    %112 = arith.truncf %111 : vector<16x128xf32> to vector<16x128xbf16>
    %cst_39 = arith.constant dense<0.000000e+00> : vector<16x512xf32>
    %113 = tpu.matmul %112, %11, %cst_39 {dimension_numbers = #tpu.dot_dimension_numbers<[1], [0], [0], [1], [0, 0, 1, 1], [], []>} : vector<16x128xbf16>, vector<128x512xbf16>, vector<16x512xf32> -> vector<16x512xf32>
    %114 = arith.truncf %80 : vector<16x128xf32> to vector<16x128xbf16>
    %cst_40 = arith.constant dense<0.000000e+00> : vector<16x512xf32>
    %115 = tpu.matmul %114, %12, %cst_40 {dimension_numbers = #tpu.dot_dimension_numbers<[1], [0], [0], [1], [0, 0, 1, 1], [], []>} : vector<16x128xbf16>, vector<128x512xbf16>, vector<16x512xf32> -> vector<16x512xf32>
    %116 = arith.addf %113, %115 : vector<16x512xf32>
    %c0_41 = arith.constant 0 : index
    %c0_42 = arith.constant 0 : index
    %117 = vector.load %arg7[%c0_41, %c0_42] : memref<1x512xf32, #tpu.memory_space<vmem>>, vector<1x512xf32>
    %118 = vector.broadcast %117 : vector<1x512xf32> to vector<16x512xf32>
    %119 = arith.addf %116, %118 : vector<16x512xf32>
    %120 = vector.extract_strided_slice %119 {offsets = [0, 0], sizes = [16, 128], strides = [1, 1]} : vector<16x512xf32> to vector<16x128xf32>
    %121 = arith.negf %120 : vector<16x128xf32>
    %122 = math.exp %121 : vector<16x128xf32>
    %cst_43 = arith.constant 1.000000e+00 : f32
    %123 = vector.broadcast %cst_43 : f32 to vector<16x128xf32>
    %124 = arith.addf %123, %122 : vector<16x128xf32>
    %125 = arith.divf %123, %124 : vector<16x128xf32>
    %126 = vector.extract_strided_slice %119 {offsets = [0, 128], sizes = [16, 128], strides = [1, 1]} : vector<16x512xf32> to vector<16x128xf32>
    %127 = arith.negf %126 : vector<16x128xf32>
    %128 = math.exp %127 : vector<16x128xf32>
    %cst_44 = arith.constant 1.000000e+00 : f32
    %129 = vector.broadcast %cst_44 : f32 to vector<16x128xf32>
    %130 = arith.addf %129, %128 : vector<16x128xf32>
    %131 = arith.divf %129, %130 : vector<16x128xf32>
    %132 = vector.extract_strided_slice %119 {offsets = [0, 256], sizes = [16, 128], strides = [1, 1]} : vector<16x512xf32> to vector<16x128xf32>
    %133 = math.tanh %132 : vector<16x128xf32>
    %134 = vector.extract_strided_slice %119 {offsets = [0, 384], sizes = [16, 128], strides = [1, 1]} : vector<16x512xf32> to vector<16x128xf32>
    %135 = arith.negf %134 : vector<16x128xf32>
    %136 = math.exp %135 : vector<16x128xf32>
    %cst_45 = arith.constant 1.000000e+00 : f32
    %137 = vector.broadcast %cst_45 : f32 to vector<16x128xf32>
    %138 = arith.addf %137, %136 : vector<16x128xf32>
    %139 = arith.divf %137, %138 : vector<16x128xf32>
    %140 = arith.mulf %131, %78 : vector<16x128xf32>
    %141 = arith.mulf %125, %133 : vector<16x128xf32>
    %142 = arith.addf %140, %141 : vector<16x128xf32>
    %143 = math.tanh %142 : vector<16x128xf32>
    %144 = arith.mulf %139, %143 : vector<16x128xf32>
    %c2 = arith.constant 2 : index
    %c0_46 = arith.constant 0 : index
    %c0_47 = arith.constant 0 : index
    %145 = vector.load %arg11[%c2, %c0_46, %c0_47] : memref<8x16x512xbf16, #tpu.memory_space<vmem>>, vector<1x16x512xbf16>
    %146 = vector.shape_cast %145 : vector<1x16x512xbf16> to vector<16x512xbf16>
    %147 = arith.truncf %111 : vector<16x128xf32> to vector<16x128xbf16>
    %cst_48 = arith.constant dense<0.000000e+00> : vector<16x512xf32>
    %148 = tpu.matmul %147, %10, %cst_48 {dimension_numbers = #tpu.dot_dimension_numbers<[1], [0], [0], [1], [0, 0, 1, 1], [], []>} : vector<16x128xbf16>, vector<128x512xbf16>, vector<16x512xf32> -> vector<16x512xf32>
    %149 = arith.extf %146 : vector<16x512xbf16> to vector<16x512xf32>
    %150 = arith.addf %149, %148 : vector<16x512xf32>
    %151 = vector.extract_strided_slice %150 {offsets = [0, 0], sizes = [16, 128], strides = [1, 1]} : vector<16x512xf32> to vector<16x128xf32>
    %152 = arith.negf %151 : vector<16x128xf32>
    %153 = math.exp %152 : vector<16x128xf32>
    %cst_49 = arith.constant 1.000000e+00 : f32
    %154 = vector.broadcast %cst_49 : f32 to vector<16x128xf32>
    %155 = arith.addf %154, %153 : vector<16x128xf32>
    %156 = arith.divf %154, %155 : vector<16x128xf32>
    %157 = vector.extract_strided_slice %150 {offsets = [0, 128], sizes = [16, 128], strides = [1, 1]} : vector<16x512xf32> to vector<16x128xf32>
    %158 = arith.negf %157 : vector<16x128xf32>
    %159 = math.exp %158 : vector<16x128xf32>
    %cst_50 = arith.constant 1.000000e+00 : f32
    %160 = vector.broadcast %cst_50 : f32 to vector<16x128xf32>
    %161 = arith.addf %160, %159 : vector<16x128xf32>
    %162 = arith.divf %160, %161 : vector<16x128xf32>
    %163 = vector.extract_strided_slice %150 {offsets = [0, 256], sizes = [16, 128], strides = [1, 1]} : vector<16x512xf32> to vector<16x128xf32>
    %164 = math.tanh %163 : vector<16x128xf32>
    %165 = vector.extract_strided_slice %150 {offsets = [0, 384], sizes = [16, 128], strides = [1, 1]} : vector<16x512xf32> to vector<16x128xf32>
    %166 = arith.negf %165 : vector<16x128xf32>
    %167 = math.exp %166 : vector<16x128xf32>
    %cst_51 = arith.constant 1.000000e+00 : f32
    %168 = vector.broadcast %cst_51 : f32 to vector<16x128xf32>
    %169 = arith.addf %168, %167 : vector<16x128xf32>
    %170 = arith.divf %168, %169 : vector<16x128xf32>
    %171 = arith.mulf %162, %109 : vector<16x128xf32>
    %172 = arith.mulf %156, %164 : vector<16x128xf32>
    %173 = arith.addf %171, %172 : vector<16x128xf32>
    %174 = math.tanh %173 : vector<16x128xf32>
    %175 = arith.mulf %170, %174 : vector<16x128xf32>
    %176 = arith.truncf %175 : vector<16x128xf32> to vector<16x128xbf16>
    %cst_52 = arith.constant dense<0.000000e+00> : vector<16x512xf32>
    %177 = tpu.matmul %176, %11, %cst_52 {dimension_numbers = #tpu.dot_dimension_numbers<[1], [0], [0], [1], [0, 0, 1, 1], [], []>} : vector<16x128xbf16>, vector<128x512xbf16>, vector<16x512xf32> -> vector<16x512xf32>
    %178 = arith.truncf %144 : vector<16x128xf32> to vector<16x128xbf16>
    %cst_53 = arith.constant dense<0.000000e+00> : vector<16x512xf32>
    %179 = tpu.matmul %178, %12, %cst_53 {dimension_numbers = #tpu.dot_dimension_numbers<[1], [0], [0], [1], [0, 0, 1, 1], [], []>} : vector<16x128xbf16>, vector<128x512xbf16>, vector<16x512xf32> -> vector<16x512xf32>
    %180 = arith.addf %177, %179 : vector<16x512xf32>
    %c0_54 = arith.constant 0 : index
    %c0_55 = arith.constant 0 : index
    %181 = vector.load %arg7[%c0_54, %c0_55] : memref<1x512xf32, #tpu.memory_space<vmem>>, vector<1x512xf32>
    %182 = vector.broadcast %181 : vector<1x512xf32> to vector<16x512xf32>
    %183 = arith.addf %180, %182 : vector<16x512xf32>
    %184 = vector.extract_strided_slice %183 {offsets = [0, 0], sizes = [16, 128], strides = [1, 1]} : vector<16x512xf32> to vector<16x128xf32>
    %185 = arith.negf %184 : vector<16x128xf32>
    %186 = math.exp %185 : vector<16x128xf32>
    %cst_56 = arith.constant 1.000000e+00 : f32
    %187 = vector.broadcast %cst_56 : f32 to vector<16x128xf32>
    %188 = arith.addf %187, %186 : vector<16x128xf32>
    %189 = arith.divf %187, %188 : vector<16x128xf32>
    %190 = vector.extract_strided_slice %183 {offsets = [0, 128], sizes = [16, 128], strides = [1, 1]} : vector<16x512xf32> to vector<16x128xf32>
    %191 = arith.negf %190 : vector<16x128xf32>
    %192 = math.exp %191 : vector<16x128xf32>
    %cst_57 = arith.constant 1.000000e+00 : f32
    %193 = vector.broadcast %cst_57 : f32 to vector<16x128xf32>
    %194 = arith.addf %193, %192 : vector<16x128xf32>
    %195 = arith.divf %193, %194 : vector<16x128xf32>
    %196 = vector.extract_strided_slice %183 {offsets = [0, 256], sizes = [16, 128], strides = [1, 1]} : vector<16x512xf32> to vector<16x128xf32>
    %197 = math.tanh %196 : vector<16x128xf32>
    %198 = vector.extract_strided_slice %183 {offsets = [0, 384], sizes = [16, 128], strides = [1, 1]} : vector<16x512xf32> to vector<16x128xf32>
    %199 = arith.negf %198 : vector<16x128xf32>
    %200 = math.exp %199 : vector<16x128xf32>
    %cst_58 = arith.constant 1.000000e+00 : f32
    %201 = vector.broadcast %cst_58 : f32 to vector<16x128xf32>
    %202 = arith.addf %201, %200 : vector<16x128xf32>
    %203 = arith.divf %201, %202 : vector<16x128xf32>
    %204 = arith.mulf %195, %142 : vector<16x128xf32>
    %205 = arith.mulf %189, %197 : vector<16x128xf32>
    %206 = arith.addf %204, %205 : vector<16x128xf32>
    %207 = math.tanh %206 : vector<16x128xf32>
    %208 = arith.mulf %203, %207 : vector<16x128xf32>
    %c3 = arith.constant 3 : index
    %c0_59 = arith.constant 0 : index
    %c0_60 = arith.constant 0 : index
    %209 = vector.load %arg11[%c3, %c0_59, %c0_60] : memref<8x16x512xbf16, #tpu.memory_space<vmem>>, vector<1x16x512xbf16>
    %210 = vector.shape_cast %209 : vector<1x16x512xbf16> to vector<16x512xbf16>
    %211 = arith.truncf %175 : vector<16x128xf32> to vector<16x128xbf16>
    %cst_61 = arith.constant dense<0.000000e+00> : vector<16x512xf32>
    %212 = tpu.matmul %211, %10, %cst_61 {dimension_numbers = #tpu.dot_dimension_numbers<[1], [0], [0], [1], [0, 0, 1, 1], [], []>} : vector<16x128xbf16>, vector<128x512xbf16>, vector<16x512xf32> -> vector<16x512xf32>
    %213 = arith.extf %210 : vector<16x512xbf16> to vector<16x512xf32>
    %214 = arith.addf %213, %212 : vector<16x512xf32>
    %215 = vector.extract_strided_slice %214 {offsets = [0, 0], sizes = [16, 128], strides = [1, 1]} : vector<16x512xf32> to vector<16x128xf32>
    %216 = arith.negf %215 : vector<16x128xf32>
    %217 = math.exp %216 : vector<16x128xf32>
    %cst_62 = arith.constant 1.000000e+00 : f32
    %218 = vector.broadcast %cst_62 : f32 to vector<16x128xf32>
    %219 = arith.addf %218, %217 : vector<16x128xf32>
    %220 = arith.divf %218, %219 : vector<16x128xf32>
    %221 = vector.extract_strided_slice %214 {offsets = [0, 128], sizes = [16, 128], strides = [1, 1]} : vector<16x512xf32> to vector<16x128xf32>
    %222 = arith.negf %221 : vector<16x128xf32>
    %223 = math.exp %222 : vector<16x128xf32>
    %cst_63 = arith.constant 1.000000e+00 : f32
    %224 = vector.broadcast %cst_63 : f32 to vector<16x128xf32>
    %225 = arith.addf %224, %223 : vector<16x128xf32>
    %226 = arith.divf %224, %225 : vector<16x128xf32>
    %227 = vector.extract_strided_slice %214 {offsets = [0, 256], sizes = [16, 128], strides = [1, 1]} : vector<16x512xf32> to vector<16x128xf32>
    %228 = math.tanh %227 : vector<16x128xf32>
    %229 = vector.extract_strided_slice %214 {offsets = [0, 384], sizes = [16, 128], strides = [1, 1]} : vector<16x512xf32> to vector<16x128xf32>
    %230 = arith.negf %229 : vector<16x128xf32>
    %231 = math.exp %230 : vector<16x128xf32>
    %cst_64 = arith.constant 1.000000e+00 : f32
    %232 = vector.broadcast %cst_64 : f32 to vector<16x128xf32>
    %233 = arith.addf %232, %231 : vector<16x128xf32>
    %234 = arith.divf %232, %233 : vector<16x128xf32>
    %235 = arith.mulf %226, %173 : vector<16x128xf32>
    %236 = arith.mulf %220, %228 : vector<16x128xf32>
    %237 = arith.addf %235, %236 : vector<16x128xf32>
    %238 = math.tanh %237 : vector<16x128xf32>
    %239 = arith.mulf %234, %238 : vector<16x128xf32>
    %240 = arith.truncf %239 : vector<16x128xf32> to vector<16x128xbf16>
    %cst_65 = arith.constant dense<0.000000e+00> : vector<16x512xf32>
    %241 = tpu.matmul %240, %11, %cst_65 {dimension_numbers = #tpu.dot_dimension_numbers<[1], [0], [0], [1], [0, 0, 1, 1], [], []>} : vector<16x128xbf16>, vector<128x512xbf16>, vector<16x512xf32> -> vector<16x512xf32>
    %242 = arith.truncf %208 : vector<16x128xf32> to vector<16x128xbf16>
    %cst_66 = arith.constant dense<0.000000e+00> : vector<16x512xf32>
    %243 = tpu.matmul %242, %12, %cst_66 {dimension_numbers = #tpu.dot_dimension_numbers<[1], [0], [0], [1], [0, 0, 1, 1], [], []>} : vector<16x128xbf16>, vector<128x512xbf16>, vector<16x512xf32> -> vector<16x512xf32>
    %244 = arith.addf %241, %243 : vector<16x512xf32>
    %c0_67 = arith.constant 0 : index
    %c0_68 = arith.constant 0 : index
    %245 = vector.load %arg7[%c0_67, %c0_68] : memref<1x512xf32, #tpu.memory_space<vmem>>, vector<1x512xf32>
    %246 = vector.broadcast %245 : vector<1x512xf32> to vector<16x512xf32>
    %247 = arith.addf %244, %246 : vector<16x512xf32>
    %248 = vector.extract_strided_slice %247 {offsets = [0, 0], sizes = [16, 128], strides = [1, 1]} : vector<16x512xf32> to vector<16x128xf32>
    %249 = arith.negf %248 : vector<16x128xf32>
    %250 = math.exp %249 : vector<16x128xf32>
    %cst_69 = arith.constant 1.000000e+00 : f32
    %251 = vector.broadcast %cst_69 : f32 to vector<16x128xf32>
    %252 = arith.addf %251, %250 : vector<16x128xf32>
    %253 = arith.divf %251, %252 : vector<16x128xf32>
    %254 = vector.extract_strided_slice %247 {offsets = [0, 128], sizes = [16, 128], strides = [1, 1]} : vector<16x512xf32> to vector<16x128xf32>
    %255 = arith.negf %254 : vector<16x128xf32>
    %256 = math.exp %255 : vector<16x128xf32>
    %cst_70 = arith.constant 1.000000e+00 : f32
    %257 = vector.broadcast %cst_70 : f32 to vector<16x128xf32>
    %258 = arith.addf %257, %256 : vector<16x128xf32>
    %259 = arith.divf %257, %258 : vector<16x128xf32>
    %260 = vector.extract_strided_slice %247 {offsets = [0, 256], sizes = [16, 128], strides = [1, 1]} : vector<16x512xf32> to vector<16x128xf32>
    %261 = math.tanh %260 : vector<16x128xf32>
    %262 = vector.extract_strided_slice %247 {offsets = [0, 384], sizes = [16, 128], strides = [1, 1]} : vector<16x512xf32> to vector<16x128xf32>
    %263 = arith.negf %262 : vector<16x128xf32>
    %264 = math.exp %263 : vector<16x128xf32>
    %cst_71 = arith.constant 1.000000e+00 : f32
    %265 = vector.broadcast %cst_71 : f32 to vector<16x128xf32>
    %266 = arith.addf %265, %264 : vector<16x128xf32>
    %267 = arith.divf %265, %266 : vector<16x128xf32>
    %268 = arith.mulf %259, %206 : vector<16x128xf32>
    %269 = arith.mulf %253, %261 : vector<16x128xf32>
    %270 = arith.addf %268, %269 : vector<16x128xf32>
    %271 = math.tanh %270 : vector<16x128xf32>
    %272 = arith.mulf %267, %271 : vector<16x128xf32>
    %c4 = arith.constant 4 : index
    %c0_72 = arith.constant 0 : index
    %c0_73 = arith.constant 0 : index
    %273 = vector.load %arg11[%c4, %c0_72, %c0_73] : memref<8x16x512xbf16, #tpu.memory_space<vmem>>, vector<1x16x512xbf16>
    %274 = vector.shape_cast %273 : vector<1x16x512xbf16> to vector<16x512xbf16>
    %275 = arith.truncf %239 : vector<16x128xf32> to vector<16x128xbf16>
    %cst_74 = arith.constant dense<0.000000e+00> : vector<16x512xf32>
    %276 = tpu.matmul %275, %10, %cst_74 {dimension_numbers = #tpu.dot_dimension_numbers<[1], [0], [0], [1], [0, 0, 1, 1], [], []>} : vector<16x128xbf16>, vector<128x512xbf16>, vector<16x512xf32> -> vector<16x512xf32>
    %277 = arith.extf %274 : vector<16x512xbf16> to vector<16x512xf32>
    %278 = arith.addf %277, %276 : vector<16x512xf32>
    %279 = vector.extract_strided_slice %278 {offsets = [0, 0], sizes = [16, 128], strides = [1, 1]} : vector<16x512xf32> to vector<16x128xf32>
    %280 = arith.negf %279 : vector<16x128xf32>
    %281 = math.exp %280 : vector<16x128xf32>
    %cst_75 = arith.constant 1.000000e+00 : f32
    %282 = vector.broadcast %cst_75 : f32 to vector<16x128xf32>
    %283 = arith.addf %282, %281 : vector<16x128xf32>
    %284 = arith.divf %282, %283 : vector<16x128xf32>
    %285 = vector.extract_strided_slice %278 {offsets = [0, 128], sizes = [16, 128], strides = [1, 1]} : vector<16x512xf32> to vector<16x128xf32>
    %286 = arith.negf %285 : vector<16x128xf32>
    %287 = math.exp %286 : vector<16x128xf32>
    %cst_76 = arith.constant 1.000000e+00 : f32
    %288 = vector.broadcast %cst_76 : f32 to vector<16x128xf32>
    %289 = arith.addf %288, %287 : vector<16x128xf32>
    %290 = arith.divf %288, %289 : vector<16x128xf32>
    %291 = vector.extract_strided_slice %278 {offsets = [0, 256], sizes = [16, 128], strides = [1, 1]} : vector<16x512xf32> to vector<16x128xf32>
    %292 = math.tanh %291 : vector<16x128xf32>
    %293 = vector.extract_strided_slice %278 {offsets = [0, 384], sizes = [16, 128], strides = [1, 1]} : vector<16x512xf32> to vector<16x128xf32>
    %294 = arith.negf %293 : vector<16x128xf32>
    %295 = math.exp %294 : vector<16x128xf32>
    %cst_77 = arith.constant 1.000000e+00 : f32
    %296 = vector.broadcast %cst_77 : f32 to vector<16x128xf32>
    %297 = arith.addf %296, %295 : vector<16x128xf32>
    %298 = arith.divf %296, %297 : vector<16x128xf32>
    %299 = arith.mulf %290, %237 : vector<16x128xf32>
    %300 = arith.mulf %284, %292 : vector<16x128xf32>
    %301 = arith.addf %299, %300 : vector<16x128xf32>
    %302 = math.tanh %301 : vector<16x128xf32>
    %303 = arith.mulf %298, %302 : vector<16x128xf32>
    %304 = arith.truncf %303 : vector<16x128xf32> to vector<16x128xbf16>
    %cst_78 = arith.constant dense<0.000000e+00> : vector<16x512xf32>
    %305 = tpu.matmul %304, %11, %cst_78 {dimension_numbers = #tpu.dot_dimension_numbers<[1], [0], [0], [1], [0, 0, 1, 1], [], []>} : vector<16x128xbf16>, vector<128x512xbf16>, vector<16x512xf32> -> vector<16x512xf32>
    %306 = arith.truncf %272 : vector<16x128xf32> to vector<16x128xbf16>
    %cst_79 = arith.constant dense<0.000000e+00> : vector<16x512xf32>
    %307 = tpu.matmul %306, %12, %cst_79 {dimension_numbers = #tpu.dot_dimension_numbers<[1], [0], [0], [1], [0, 0, 1, 1], [], []>} : vector<16x128xbf16>, vector<128x512xbf16>, vector<16x512xf32> -> vector<16x512xf32>
    %308 = arith.addf %305, %307 : vector<16x512xf32>
    %c0_80 = arith.constant 0 : index
    %c0_81 = arith.constant 0 : index
    %309 = vector.load %arg7[%c0_80, %c0_81] : memref<1x512xf32, #tpu.memory_space<vmem>>, vector<1x512xf32>
    %310 = vector.broadcast %309 : vector<1x512xf32> to vector<16x512xf32>
    %311 = arith.addf %308, %310 : vector<16x512xf32>
    %312 = vector.extract_strided_slice %311 {offsets = [0, 0], sizes = [16, 128], strides = [1, 1]} : vector<16x512xf32> to vector<16x128xf32>
    %313 = arith.negf %312 : vector<16x128xf32>
    %314 = math.exp %313 : vector<16x128xf32>
    %cst_82 = arith.constant 1.000000e+00 : f32
    %315 = vector.broadcast %cst_82 : f32 to vector<16x128xf32>
    %316 = arith.addf %315, %314 : vector<16x128xf32>
    %317 = arith.divf %315, %316 : vector<16x128xf32>
    %318 = vector.extract_strided_slice %311 {offsets = [0, 128], sizes = [16, 128], strides = [1, 1]} : vector<16x512xf32> to vector<16x128xf32>
    %319 = arith.negf %318 : vector<16x128xf32>
    %320 = math.exp %319 : vector<16x128xf32>
    %cst_83 = arith.constant 1.000000e+00 : f32
    %321 = vector.broadcast %cst_83 : f32 to vector<16x128xf32>
    %322 = arith.addf %321, %320 : vector<16x128xf32>
    %323 = arith.divf %321, %322 : vector<16x128xf32>
    %324 = vector.extract_strided_slice %311 {offsets = [0, 256], sizes = [16, 128], strides = [1, 1]} : vector<16x512xf32> to vector<16x128xf32>
    %325 = math.tanh %324 : vector<16x128xf32>
    %326 = vector.extract_strided_slice %311 {offsets = [0, 384], sizes = [16, 128], strides = [1, 1]} : vector<16x512xf32> to vector<16x128xf32>
    %327 = arith.negf %326 : vector<16x128xf32>
    %328 = math.exp %327 : vector<16x128xf32>
    %cst_84 = arith.constant 1.000000e+00 : f32
    %329 = vector.broadcast %cst_84 : f32 to vector<16x128xf32>
    %330 = arith.addf %329, %328 : vector<16x128xf32>
    %331 = arith.divf %329, %330 : vector<16x128xf32>
    %332 = arith.mulf %323, %270 : vector<16x128xf32>
    %333 = arith.mulf %317, %325 : vector<16x128xf32>
    %334 = arith.addf %332, %333 : vector<16x128xf32>
    %335 = math.tanh %334 : vector<16x128xf32>
    %336 = arith.mulf %331, %335 : vector<16x128xf32>
    %c5 = arith.constant 5 : index
    %c0_85 = arith.constant 0 : index
    %c0_86 = arith.constant 0 : index
    %337 = vector.load %arg11[%c5, %c0_85, %c0_86] : memref<8x16x512xbf16, #tpu.memory_space<vmem>>, vector<1x16x512xbf16>
    %338 = vector.shape_cast %337 : vector<1x16x512xbf16> to vector<16x512xbf16>
    %339 = arith.truncf %303 : vector<16x128xf32> to vector<16x128xbf16>
    %cst_87 = arith.constant dense<0.000000e+00> : vector<16x512xf32>
    %340 = tpu.matmul %339, %10, %cst_87 {dimension_numbers = #tpu.dot_dimension_numbers<[1], [0], [0], [1], [0, 0, 1, 1], [], []>} : vector<16x128xbf16>, vector<128x512xbf16>, vector<16x512xf32> -> vector<16x512xf32>
    %341 = arith.extf %338 : vector<16x512xbf16> to vector<16x512xf32>
    %342 = arith.addf %341, %340 : vector<16x512xf32>
    %343 = vector.extract_strided_slice %342 {offsets = [0, 0], sizes = [16, 128], strides = [1, 1]} : vector<16x512xf32> to vector<16x128xf32>
    %344 = arith.negf %343 : vector<16x128xf32>
    %345 = math.exp %344 : vector<16x128xf32>
    %cst_88 = arith.constant 1.000000e+00 : f32
    %346 = vector.broadcast %cst_88 : f32 to vector<16x128xf32>
    %347 = arith.addf %346, %345 : vector<16x128xf32>
    %348 = arith.divf %346, %347 : vector<16x128xf32>
    %349 = vector.extract_strided_slice %342 {offsets = [0, 128], sizes = [16, 128], strides = [1, 1]} : vector<16x512xf32> to vector<16x128xf32>
    %350 = arith.negf %349 : vector<16x128xf32>
    %351 = math.exp %350 : vector<16x128xf32>
    %cst_89 = arith.constant 1.000000e+00 : f32
    %352 = vector.broadcast %cst_89 : f32 to vector<16x128xf32>
    %353 = arith.addf %352, %351 : vector<16x128xf32>
    %354 = arith.divf %352, %353 : vector<16x128xf32>
    %355 = vector.extract_strided_slice %342 {offsets = [0, 256], sizes = [16, 128], strides = [1, 1]} : vector<16x512xf32> to vector<16x128xf32>
    %356 = math.tanh %355 : vector<16x128xf32>
    %357 = vector.extract_strided_slice %342 {offsets = [0, 384], sizes = [16, 128], strides = [1, 1]} : vector<16x512xf32> to vector<16x128xf32>
    %358 = arith.negf %357 : vector<16x128xf32>
    %359 = math.exp %358 : vector<16x128xf32>
    %cst_90 = arith.constant 1.000000e+00 : f32
    %360 = vector.broadcast %cst_90 : f32 to vector<16x128xf32>
    %361 = arith.addf %360, %359 : vector<16x128xf32>
    %362 = arith.divf %360, %361 : vector<16x128xf32>
    %363 = arith.mulf %354, %301 : vector<16x128xf32>
    %364 = arith.mulf %348, %356 : vector<16x128xf32>
    %365 = arith.addf %363, %364 : vector<16x128xf32>
    %366 = math.tanh %365 : vector<16x128xf32>
    %367 = arith.mulf %362, %366 : vector<16x128xf32>
    %368 = arith.truncf %367 : vector<16x128xf32> to vector<16x128xbf16>
    %cst_91 = arith.constant dense<0.000000e+00> : vector<16x512xf32>
    %369 = tpu.matmul %368, %11, %cst_91 {dimension_numbers = #tpu.dot_dimension_numbers<[1], [0], [0], [1], [0, 0, 1, 1], [], []>} : vector<16x128xbf16>, vector<128x512xbf16>, vector<16x512xf32> -> vector<16x512xf32>
    %370 = arith.truncf %336 : vector<16x128xf32> to vector<16x128xbf16>
    %cst_92 = arith.constant dense<0.000000e+00> : vector<16x512xf32>
    %371 = tpu.matmul %370, %12, %cst_92 {dimension_numbers = #tpu.dot_dimension_numbers<[1], [0], [0], [1], [0, 0, 1, 1], [], []>} : vector<16x128xbf16>, vector<128x512xbf16>, vector<16x512xf32> -> vector<16x512xf32>
    %372 = arith.addf %369, %371 : vector<16x512xf32>
    %c0_93 = arith.constant 0 : index
    %c0_94 = arith.constant 0 : index
    %373 = vector.load %arg7[%c0_93, %c0_94] : memref<1x512xf32, #tpu.memory_space<vmem>>, vector<1x512xf32>
    %374 = vector.broadcast %373 : vector<1x512xf32> to vector<16x512xf32>
    %375 = arith.addf %372, %374 : vector<16x512xf32>
    %376 = vector.extract_strided_slice %375 {offsets = [0, 0], sizes = [16, 128], strides = [1, 1]} : vector<16x512xf32> to vector<16x128xf32>
    %377 = arith.negf %376 : vector<16x128xf32>
    %378 = math.exp %377 : vector<16x128xf32>
    %cst_95 = arith.constant 1.000000e+00 : f32
    %379 = vector.broadcast %cst_95 : f32 to vector<16x128xf32>
    %380 = arith.addf %379, %378 : vector<16x128xf32>
    %381 = arith.divf %379, %380 : vector<16x128xf32>
    %382 = vector.extract_strided_slice %375 {offsets = [0, 128], sizes = [16, 128], strides = [1, 1]} : vector<16x512xf32> to vector<16x128xf32>
    %383 = arith.negf %382 : vector<16x128xf32>
    %384 = math.exp %383 : vector<16x128xf32>
    %cst_96 = arith.constant 1.000000e+00 : f32
    %385 = vector.broadcast %cst_96 : f32 to vector<16x128xf32>
    %386 = arith.addf %385, %384 : vector<16x128xf32>
    %387 = arith.divf %385, %386 : vector<16x128xf32>
    %388 = vector.extract_strided_slice %375 {offsets = [0, 256], sizes = [16, 128], strides = [1, 1]} : vector<16x512xf32> to vector<16x128xf32>
    %389 = math.tanh %388 : vector<16x128xf32>
    %390 = vector.extract_strided_slice %375 {offsets = [0, 384], sizes = [16, 128], strides = [1, 1]} : vector<16x512xf32> to vector<16x128xf32>
    %391 = arith.negf %390 : vector<16x128xf32>
    %392 = math.exp %391 : vector<16x128xf32>
    %cst_97 = arith.constant 1.000000e+00 : f32
    %393 = vector.broadcast %cst_97 : f32 to vector<16x128xf32>
    %394 = arith.addf %393, %392 : vector<16x128xf32>
    %395 = arith.divf %393, %394 : vector<16x128xf32>
    %396 = arith.mulf %387, %334 : vector<16x128xf32>
    %397 = arith.mulf %381, %389 : vector<16x128xf32>
    %398 = arith.addf %396, %397 : vector<16x128xf32>
    %399 = math.tanh %398 : vector<16x128xf32>
    %400 = arith.mulf %395, %399 : vector<16x128xf32>
    %c6 = arith.constant 6 : index
    %c0_98 = arith.constant 0 : index
    %c0_99 = arith.constant 0 : index
    %401 = vector.load %arg11[%c6, %c0_98, %c0_99] : memref<8x16x512xbf16, #tpu.memory_space<vmem>>, vector<1x16x512xbf16>
    %402 = vector.shape_cast %401 : vector<1x16x512xbf16> to vector<16x512xbf16>
    %403 = arith.truncf %367 : vector<16x128xf32> to vector<16x128xbf16>
    %cst_100 = arith.constant dense<0.000000e+00> : vector<16x512xf32>
    %404 = tpu.matmul %403, %10, %cst_100 {dimension_numbers = #tpu.dot_dimension_numbers<[1], [0], [0], [1], [0, 0, 1, 1], [], []>} : vector<16x128xbf16>, vector<128x512xbf16>, vector<16x512xf32> -> vector<16x512xf32>
    %405 = arith.extf %402 : vector<16x512xbf16> to vector<16x512xf32>
    %406 = arith.addf %405, %404 : vector<16x512xf32>
    %407 = vector.extract_strided_slice %406 {offsets = [0, 0], sizes = [16, 128], strides = [1, 1]} : vector<16x512xf32> to vector<16x128xf32>
    %408 = arith.negf %407 : vector<16x128xf32>
    %409 = math.exp %408 : vector<16x128xf32>
    %cst_101 = arith.constant 1.000000e+00 : f32
    %410 = vector.broadcast %cst_101 : f32 to vector<16x128xf32>
    %411 = arith.addf %410, %409 : vector<16x128xf32>
    %412 = arith.divf %410, %411 : vector<16x128xf32>
    %413 = vector.extract_strided_slice %406 {offsets = [0, 128], sizes = [16, 128], strides = [1, 1]} : vector<16x512xf32> to vector<16x128xf32>
    %414 = arith.negf %413 : vector<16x128xf32>
    %415 = math.exp %414 : vector<16x128xf32>
    %cst_102 = arith.constant 1.000000e+00 : f32
    %416 = vector.broadcast %cst_102 : f32 to vector<16x128xf32>
    %417 = arith.addf %416, %415 : vector<16x128xf32>
    %418 = arith.divf %416, %417 : vector<16x128xf32>
    %419 = vector.extract_strided_slice %406 {offsets = [0, 256], sizes = [16, 128], strides = [1, 1]} : vector<16x512xf32> to vector<16x128xf32>
    %420 = math.tanh %419 : vector<16x128xf32>
    %421 = vector.extract_strided_slice %406 {offsets = [0, 384], sizes = [16, 128], strides = [1, 1]} : vector<16x512xf32> to vector<16x128xf32>
    %422 = arith.negf %421 : vector<16x128xf32>
    %423 = math.exp %422 : vector<16x128xf32>
    %cst_103 = arith.constant 1.000000e+00 : f32
    %424 = vector.broadcast %cst_103 : f32 to vector<16x128xf32>
    %425 = arith.addf %424, %423 : vector<16x128xf32>
    %426 = arith.divf %424, %425 : vector<16x128xf32>
    %427 = arith.mulf %418, %365 : vector<16x128xf32>
    %428 = arith.mulf %412, %420 : vector<16x128xf32>
    %429 = arith.addf %427, %428 : vector<16x128xf32>
    %430 = math.tanh %429 : vector<16x128xf32>
    %431 = arith.mulf %426, %430 : vector<16x128xf32>
    %432 = arith.truncf %431 : vector<16x128xf32> to vector<16x128xbf16>
    %cst_104 = arith.constant dense<0.000000e+00> : vector<16x512xf32>
    %433 = tpu.matmul %432, %11, %cst_104 {dimension_numbers = #tpu.dot_dimension_numbers<[1], [0], [0], [1], [0, 0, 1, 1], [], []>} : vector<16x128xbf16>, vector<128x512xbf16>, vector<16x512xf32> -> vector<16x512xf32>
    %434 = arith.truncf %400 : vector<16x128xf32> to vector<16x128xbf16>
    %cst_105 = arith.constant dense<0.000000e+00> : vector<16x512xf32>
    %435 = tpu.matmul %434, %12, %cst_105 {dimension_numbers = #tpu.dot_dimension_numbers<[1], [0], [0], [1], [0, 0, 1, 1], [], []>} : vector<16x128xbf16>, vector<128x512xbf16>, vector<16x512xf32> -> vector<16x512xf32>
    %436 = arith.addf %433, %435 : vector<16x512xf32>
    %c0_106 = arith.constant 0 : index
    %c0_107 = arith.constant 0 : index
    %437 = vector.load %arg7[%c0_106, %c0_107] : memref<1x512xf32, #tpu.memory_space<vmem>>, vector<1x512xf32>
    %438 = vector.broadcast %437 : vector<1x512xf32> to vector<16x512xf32>
    %439 = arith.addf %436, %438 : vector<16x512xf32>
    %440 = vector.extract_strided_slice %439 {offsets = [0, 0], sizes = [16, 128], strides = [1, 1]} : vector<16x512xf32> to vector<16x128xf32>
    %441 = arith.negf %440 : vector<16x128xf32>
    %442 = math.exp %441 : vector<16x128xf32>
    %cst_108 = arith.constant 1.000000e+00 : f32
    %443 = vector.broadcast %cst_108 : f32 to vector<16x128xf32>
    %444 = arith.addf %443, %442 : vector<16x128xf32>
    %445 = arith.divf %443, %444 : vector<16x128xf32>
    %446 = vector.extract_strided_slice %439 {offsets = [0, 128], sizes = [16, 128], strides = [1, 1]} : vector<16x512xf32> to vector<16x128xf32>
    %447 = arith.negf %446 : vector<16x128xf32>
    %448 = math.exp %447 : vector<16x128xf32>
    %cst_109 = arith.constant 1.000000e+00 : f32
    %449 = vector.broadcast %cst_109 : f32 to vector<16x128xf32>
    %450 = arith.addf %449, %448 : vector<16x128xf32>
    %451 = arith.divf %449, %450 : vector<16x128xf32>
    %452 = vector.extract_strided_slice %439 {offsets = [0, 256], sizes = [16, 128], strides = [1, 1]} : vector<16x512xf32> to vector<16x128xf32>
    %453 = math.tanh %452 : vector<16x128xf32>
    %454 = vector.extract_strided_slice %439 {offsets = [0, 384], sizes = [16, 128], strides = [1, 1]} : vector<16x512xf32> to vector<16x128xf32>
    %455 = arith.negf %454 : vector<16x128xf32>
    %456 = math.exp %455 : vector<16x128xf32>
    %cst_110 = arith.constant 1.000000e+00 : f32
    %457 = vector.broadcast %cst_110 : f32 to vector<16x128xf32>
    %458 = arith.addf %457, %456 : vector<16x128xf32>
    %459 = arith.divf %457, %458 : vector<16x128xf32>
    %460 = arith.mulf %451, %398 : vector<16x128xf32>
    %461 = arith.mulf %445, %453 : vector<16x128xf32>
    %462 = arith.addf %460, %461 : vector<16x128xf32>
    %463 = math.tanh %462 : vector<16x128xf32>
    %464 = arith.mulf %459, %463 : vector<16x128xf32>
    %c7 = arith.constant 7 : index
    %c0_111 = arith.constant 0 : index
    %c0_112 = arith.constant 0 : index
    %465 = vector.load %arg11[%c7, %c0_111, %c0_112] : memref<8x16x512xbf16, #tpu.memory_space<vmem>>, vector<1x16x512xbf16>
    %466 = vector.shape_cast %465 : vector<1x16x512xbf16> to vector<16x512xbf16>
    %467 = arith.truncf %431 : vector<16x128xf32> to vector<16x128xbf16>
    %cst_113 = arith.constant dense<0.000000e+00> : vector<16x512xf32>
    %468 = tpu.matmul %467, %10, %cst_113 {dimension_numbers = #tpu.dot_dimension_numbers<[1], [0], [0], [1], [0, 0, 1, 1], [], []>} : vector<16x128xbf16>, vector<128x512xbf16>, vector<16x512xf32> -> vector<16x512xf32>
    %469 = arith.extf %466 : vector<16x512xbf16> to vector<16x512xf32>
    %470 = arith.addf %469, %468 : vector<16x512xf32>
    %471 = vector.extract_strided_slice %470 {offsets = [0, 0], sizes = [16, 128], strides = [1, 1]} : vector<16x512xf32> to vector<16x128xf32>
    %472 = arith.negf %471 : vector<16x128xf32>
    %473 = math.exp %472 : vector<16x128xf32>
    %cst_114 = arith.constant 1.000000e+00 : f32
    %474 = vector.broadcast %cst_114 : f32 to vector<16x128xf32>
    %475 = arith.addf %474, %473 : vector<16x128xf32>
    %476 = arith.divf %474, %475 : vector<16x128xf32>
    %477 = vector.extract_strided_slice %470 {offsets = [0, 128], sizes = [16, 128], strides = [1, 1]} : vector<16x512xf32> to vector<16x128xf32>
    %478 = arith.negf %477 : vector<16x128xf32>
    %479 = math.exp %478 : vector<16x128xf32>
    %cst_115 = arith.constant 1.000000e+00 : f32
    %480 = vector.broadcast %cst_115 : f32 to vector<16x128xf32>
    %481 = arith.addf %480, %479 : vector<16x128xf32>
    %482 = arith.divf %480, %481 : vector<16x128xf32>
    %483 = vector.extract_strided_slice %470 {offsets = [0, 256], sizes = [16, 128], strides = [1, 1]} : vector<16x512xf32> to vector<16x128xf32>
    %484 = math.tanh %483 : vector<16x128xf32>
    %485 = vector.extract_strided_slice %470 {offsets = [0, 384], sizes = [16, 128], strides = [1, 1]} : vector<16x512xf32> to vector<16x128xf32>
    %486 = arith.negf %485 : vector<16x128xf32>
    %487 = math.exp %486 : vector<16x128xf32>
    %cst_116 = arith.constant 1.000000e+00 : f32
    %488 = vector.broadcast %cst_116 : f32 to vector<16x128xf32>
    %489 = arith.addf %488, %487 : vector<16x128xf32>
    %490 = arith.divf %488, %489 : vector<16x128xf32>
    %491 = arith.mulf %482, %429 : vector<16x128xf32>
    %492 = arith.mulf %476, %484 : vector<16x128xf32>
    %493 = arith.addf %491, %492 : vector<16x128xf32>
    %494 = math.tanh %493 : vector<16x128xf32>
    %495 = arith.mulf %490, %494 : vector<16x128xf32>
    %496 = arith.truncf %495 : vector<16x128xf32> to vector<16x128xbf16>
    %cst_117 = arith.constant dense<0.000000e+00> : vector<16x512xf32>
    %497 = tpu.matmul %496, %11, %cst_117 {dimension_numbers = #tpu.dot_dimension_numbers<[1], [0], [0], [1], [0, 0, 1, 1], [], []>} : vector<16x128xbf16>, vector<128x512xbf16>, vector<16x512xf32> -> vector<16x512xf32>
    %498 = arith.truncf %464 : vector<16x128xf32> to vector<16x128xbf16>
    %cst_118 = arith.constant dense<0.000000e+00> : vector<16x512xf32>
    %499 = tpu.matmul %498, %12, %cst_118 {dimension_numbers = #tpu.dot_dimension_numbers<[1], [0], [0], [1], [0, 0, 1, 1], [], []>} : vector<16x128xbf16>, vector<128x512xbf16>, vector<16x512xf32> -> vector<16x512xf32>
    %500 = arith.addf %497, %499 : vector<16x512xf32>
    %c0_119 = arith.constant 0 : index
    %c0_120 = arith.constant 0 : index
    %501 = vector.load %arg7[%c0_119, %c0_120] : memref<1x512xf32, #tpu.memory_space<vmem>>, vector<1x512xf32>
    %502 = vector.broadcast %501 : vector<1x512xf32> to vector<16x512xf32>
    %503 = arith.addf %500, %502 : vector<16x512xf32>
    %504 = vector.extract_strided_slice %503 {offsets = [0, 0], sizes = [16, 128], strides = [1, 1]} : vector<16x512xf32> to vector<16x128xf32>
    %505 = arith.negf %504 : vector<16x128xf32>
    %506 = math.exp %505 : vector<16x128xf32>
    %cst_121 = arith.constant 1.000000e+00 : f32
    %507 = vector.broadcast %cst_121 : f32 to vector<16x128xf32>
    %508 = arith.addf %507, %506 : vector<16x128xf32>
    %509 = arith.divf %507, %508 : vector<16x128xf32>
    %510 = vector.extract_strided_slice %503 {offsets = [0, 128], sizes = [16, 128], strides = [1, 1]} : vector<16x512xf32> to vector<16x128xf32>
    %511 = arith.negf %510 : vector<16x128xf32>
    %512 = math.exp %511 : vector<16x128xf32>
    %cst_122 = arith.constant 1.000000e+00 : f32
    %513 = vector.broadcast %cst_122 : f32 to vector<16x128xf32>
    %514 = arith.addf %513, %512 : vector<16x128xf32>
    %515 = arith.divf %513, %514 : vector<16x128xf32>
    %516 = vector.extract_strided_slice %503 {offsets = [0, 256], sizes = [16, 128], strides = [1, 1]} : vector<16x512xf32> to vector<16x128xf32>
    %517 = math.tanh %516 : vector<16x128xf32>
    %518 = vector.extract_strided_slice %503 {offsets = [0, 384], sizes = [16, 128], strides = [1, 1]} : vector<16x512xf32> to vector<16x128xf32>
    %519 = arith.negf %518 : vector<16x128xf32>
    %520 = math.exp %519 : vector<16x128xf32>
    %cst_123 = arith.constant 1.000000e+00 : f32
    %521 = vector.broadcast %cst_123 : f32 to vector<16x128xf32>
    %522 = arith.addf %521, %520 : vector<16x128xf32>
    %523 = arith.divf %521, %522 : vector<16x128xf32>
    %524 = arith.mulf %515, %462 : vector<16x128xf32>
    %525 = arith.mulf %509, %517 : vector<16x128xf32>
    %526 = arith.addf %524, %525 : vector<16x128xf32>
    %527 = math.tanh %526 : vector<16x128xf32>
    %528 = arith.mulf %523, %527 : vector<16x128xf32>
    %529 = arith.truncf %528 : vector<16x128xf32> to vector<16x128xbf16>
    %c0_124 = arith.constant 0 : index
    %c0_125 = arith.constant 0 : index
    %530 = vector.load %arg8[%c0_124, %c0_125] : memref<128x128xbf16, #tpu.memory_space<vmem>>, vector<128x128xbf16>
    %cst_126 = arith.constant dense<0.000000e+00> : vector<16x128xf32>
    %531 = tpu.matmul %529, %530, %cst_126 {dimension_numbers = #tpu.dot_dimension_numbers<[1], [0], [0], [1], [0, 0, 1, 1], [], []>} : vector<16x128xbf16>, vector<128x128xbf16>, vector<16x128xf32> -> vector<16x128xf32>
    %c0_127 = arith.constant 0 : index
    %c0_128 = arith.constant 0 : index
    %532 = vector.load %arg9[%c0_127, %c0_128] : memref<1x128xf32, #tpu.memory_space<vmem>>, vector<1x128xf32>
    %533 = vector.broadcast %532 : vector<1x128xf32> to vector<16x128xf32>
    %534 = arith.addf %531, %533 : vector<16x128xf32>
    %c0_129 = arith.constant 0 : index
    %c0_130 = arith.constant 0 : index
    %535 = vector.load %arg10[%c0_129, %c0_130] : memref<16x128xf32, #tpu.memory_space<vmem>>, vector<16x128xf32>
    tpu.vector_store %arg10[%c0_129, %c0_130], %534 {strides = array<i32>} : memref<16x128xf32, #tpu.memory_space<vmem>>, vector<16x128xf32>,
    return
  }
  func.func @transform_0(%arg0: i32) -> (i32, i32, i32) {
    %c0_i32 = arith.constant 0 : i32
    %c0_i32_0 = arith.constant 0 : i32
    %c0_i32_1 = arith.constant 0 : i32
    return %c0_i32, %arg0, %c0_i32_0 : i32, i32, i32
  }
  func.func @transform_1(%arg0: i32) -> (i32, i32) {
    %c0_i32 = arith.constant 0 : i32
    %c0_i32_0 = arith.constant 0 : i32
    %c0_i32_1 = arith.constant 0 : i32
    return %c0_i32, %c0_i32_0 : i32, i32
  }
  func.func @transform_2(%arg0: i32) -> (i32, i32) {
    %c0_i32 = arith.constant 0 : i32
    %c0_i32_0 = arith.constant 0 : i32
    %c0_i32_1 = arith.constant 0 : i32
    return %c0_i32, %c0_i32_0 : i32, i32
  }
  func.func @transform_3(%arg0: i32) -> (i32, i32) {
    %c0_i32 = arith.constant 0 : i32
    %c0_i32_0 = arith.constant 0 : i32
    %c0_i32_1 = arith.constant 0 : i32
    return %c0_i32, %c0_i32_0 : i32, i32
  }
  func.func @transform_4(%arg0: i32) -> (i32, i32) {
    %c0_i32 = arith.constant 0 : i32
    %c0_i32_0 = arith.constant 0 : i32
    %c0_i32_1 = arith.constant 0 : i32
    return %c0_i32, %c0_i32_0 : i32, i32
  }
  func.func @transform_5(%arg0: i32) -> (i32, i32) {
    %c0_i32 = arith.constant 0 : i32
    %c0_i32_0 = arith.constant 0 : i32
    %c0_i32_1 = arith.constant 0 : i32
    return %c0_i32, %c0_i32_0 : i32, i32
  }
  func.func @transform_6(%arg0: i32) -> (i32, i32) {
    %c0_i32 = arith.constant 0 : i32
    %c0_i32_0 = arith.constant 0 : i32
    %c0_i32_1 = arith.constant 0 : i32
    return %c0_i32, %c0_i32_0 : i32, i32
  }
  func.func @transform_7(%arg0: i32) -> (i32, i32) {
    %c0_i32 = arith.constant 0 : i32
    %c0_i32_0 = arith.constant 0 : i32
    %c0_i32_1 = arith.constant 0 : i32
    return %c0_i32, %c0_i32_0 : i32, i32
  }
  func.func @transform_8(%arg0: i32) -> (i32, i32) {
    %c0_i32 = arith.constant 0 : i32
    %c0_i32_0 = arith.constant 0 : i32
    %c0_i32_1 = arith.constant 0 : i32
    return %c0_i32, %c0_i32_0 : i32, i32
  }
  func.func @transform_9(%arg0: i32) -> (i32, i32) {
    %c0_i32 = arith.constant 0 : i32
    %c0_i32_0 = arith.constant 0 : i32
    return %arg0, %c0_i32 : i32, i32
  }
}

</mosaic_0001>

<bundles_post_ra>
// kernel: tpu_custom_call.1
= control target key start
LH: loop header
LB: loop body
LE: loop exit
PB: predicated region body
PF: predicated region fallthrough
CT: control target
= control target key end

     0   :  { %14 = vsyncpa [#allocation4], 0  ;;  %s7701_s0 = inlined_call_operand.hbm [shape: bf16[8,16,16], index: 0, kind: input, shape index: {}]   ;;  %s7702_s1 = inlined_call_operand.hbm [shape: bf16[16,512], index: 1, kind: input, shape index: {}]   ;;  %s7703_s2 = inlined_call_operand.hbm [shape: bf16[128,512], index: 2, kind: input, shape index: {}]   ;;  %s7704_s3 = inlined_call_operand.vmem [shape: f32[1,512], index: 3, kind: input, shape index: {}]   ;;  %s7705_s4 = inlined_call_operand.hbm [shape: bf16[128,512], index: 4, kind: input, shape index: {}]   ;;  %s7706_s5 = inlined_call_operand.hbm [shape: bf16[128,512], index: 5, kind: input, shape index: {}]   ;;  %s7707_s6 = inlined_call_operand.vmem [shape: f32[1,512], index: 6, kind: input, shape index: {}]   ;;  %s7708_s7 = inlined_call_operand.hbm [shape: bf16[128,128], index: 7, kind: input, shape index: {}]   ;;  %s7709_s8 = inlined_call_operand.vmem [shape: f32[1,128], index: 8, kind: input, shape index: {}]   ;;  %s7710_s9 = inlined_call_operand.hbm [shape: f32[16,128], index: 9, kind: output, shape index: {}]  }
   0x1   :  { %15 = vsyncpa [#allocation7], 0 }
   0x2   :  { %16 = vsyncpa [#allocation10], 0 }
   0x3   :  { %17 = vsyncpa [#allocation13], 0 }
   0x4   :  { %18 = vsyncpa [#allocation5], 0  ;;  %s5755_s30 = smov [#allocation6]   ;;  %s5591_s13 = scalar_lea.hbm %s7702_s1, 512 }
   0x5   :  { %s36_s10 = sshll.u32 %s5755_s30, 4  ;;  %p5592_p0 = scmp.ne.s32.totalorder %s7702_s1, %s5591_s13  ;;  %s37_s10 = int_to_ptr.vmem [resolvable:$true] %s36_s10 }
   0x6   :  { %p5595_p1 = scmp.lt.u32.totalorder %s5591_s13, %s7702_s1 }
   0x8   :  { %p5597_p2 = pnand %p5595_p1, %p5592_p0 }
   0xa   :  { %5600 = shalt.err (!%p5597_p2)
}
   0xb   :  { %s5601_s18 = scalar_lea.vmem %s37_s10, 512  ;;  %p5606_p4 = scmp.lt.s32.totalorder %s37_s10, %s37_s10 }
   0xc   :  { %p5602_p3 = scmp.ne.s32.totalorder %s37_s10, %s5601_s18  ;;  %p5607_p5 = scmp.lt.s32.totalorder %s5601_s18, %s5601_s18 }
   0xe   :  { %p5608_p6 = por %p5607_p5, %p5606_p4 }
  0x10   :  { %p5609_p7 = pnand %p5608_p6, %p5602_p3 }
  0x12   :  { %5612 = shalt.err (!%p5609_p7)
}
  0x13   :  { %s5756_s19 = smov 256   ;;  %s5757_s20 = smov 16  }
  0x14   :  { %42 = dma.hbm_to_vmem [thread:$0]  %s7702_s1, 512, %s37_s10, [#allocation7], %s5756_s19, %s5756_s19, %s5757_s20  }
  0x15   :  { %s5758_s23 = smov [#allocation9]   ;;  %s5759_s25 = smov [#allocation3]  }
  0x16   :  { %s62_s24 = sshll.u32 %s5758_s23, 4  ;;  %s24_s26 = sshll.u32 %s5759_s25, 4  ;;  %s63_s24 = int_to_ptr.vmem [resolvable:$true] %s62_s24  ;;  %s25_s26 = int_to_ptr.vmem [resolvable:$true] %s24_s26 }
  0x17   :  { %s5613_s29 = scalar_lea.hbm %s7705_s4, 4096 }
  0x18   :  { %p5614_p8 = scmp.ne.s32.totalorder %s7705_s4, %s5613_s29  ;;  %p5617_p9 = scmp.lt.u32.totalorder %s5613_s29, %s7705_s4 }
  0x1a   :  { %p5619_p10 = pnand %p5617_p9, %p5614_p8 }
  0x1c   :  { %5622 = shalt.err (!%p5619_p10)
}
  0x1d   :  { %s5623_s1 = scalar_lea.vmem %s63_s24, 4096  ;;  %p5628_p12 = scmp.lt.s32.totalorder %s63_s24, %s63_s24 }
  0x1e   :  { %p5624_p11 = scmp.ne.s32.totalorder %s63_s24, %s5623_s1  ;;  %p5629_p13 = scmp.lt.s32.totalorder %s5623_s1, %s5623_s1 }
  0x20   :  { %p5630_p0 = por %p5629_p13, %p5628_p12 }
  0x22   :  { %p5631_p1 = pnand %p5630_p0, %p5624_p11 }
  0x24   :  { %5634 = shalt.err (!%p5631_p1)
}
  0x25   :  { %68 = dma.hbm_to_vmem [thread:$0]  %s7705_s4, 4096, %s63_s24, [#allocation10], %s5756_s19, %s5756_s19, %s5757_s20  }
  0x26   :  { %s5635_s17 = scalar_lea.hbm %s7701_s0, 1024 }
  0x27   :  { %p5636_p2 = scmp.ne.s32.totalorder %s7701_s0, %s5635_s17  ;;  %p5639_p3 = scmp.lt.u32.totalorder %s5635_s17, %s7701_s0 }
  0x29   :  { %p5641_p4 = pnand %p5639_p3, %p5636_p2 }
  0x2b   :  { %5644 = shalt.err (!%p5641_p4)
}
  0x2c   :  { %s5645_s25 = scalar_lea.vmem %s25_s26, 1024  ;;  %p5650_p6 = scmp.lt.s32.totalorder %s25_s26, %s25_s26 }
  0x2d   :  { %p5646_p5 = scmp.ne.s32.totalorder %s25_s26, %s5645_s25  ;;  %p5651_p7 = scmp.lt.s32.totalorder %s5645_s25, %s5645_s25 }
  0x2f   :  { %p5652_p8 = por %p5651_p7, %p5650_p6 }
  0x31   :  { %p5653_p9 = pnand %p5652_p8, %p5646_p5 }
  0x33   :  { %5656 = shalt.err (!%p5653_p9)
}
  0x34   :  { %s5760_s4 = smov 64   ;;  %s5761_s24 = smov 4  }
  0x35   :  { %30 = dma.hbm_to_vmem [thread:$0]  %s7701_s0, 1024, %s25_s26, [#allocation4], %s5760_s4, %s5760_s4, %s5761_s24  }
  0x36   :  { %s5762_s29 = smov [#allocation8]   ;;  %s5763_s11 = smov [#allocation11]  }
  0x37   :  { %s48_s30 = sshll.u32 %s5762_s29, 4  ;;  %s74_s12 = sshll.u32 %s5763_s11, 4  ;;  %s49_s30 = int_to_ptr.vmem [resolvable:$true] %s48_s30  ;;  %s75_s12 = int_to_ptr.vmem [resolvable:$true] %s74_s12 }
  0x38   :  { %s5657_s10 = scalar_lea.hbm %s7703_s2, 4096 }
  0x39   :  { %p5658_p10 = scmp.ne.s32.totalorder %s7703_s2, %s5657_s10  ;;  %p5661_p11 = scmp.lt.u32.totalorder %s5657_s10, %s7703_s2 }
  0x3b   :  { %p5663_p12 = pnand %p5661_p11, %p5658_p10 }
  0x3d   :  { %5666 = shalt.err (!%p5663_p12)
}
  0x3e   :  { %s5667_s0 = scalar_lea.vmem %s49_s30, 4096  ;;  %p5672_p0 = scmp.lt.s32.totalorder %s49_s30, %s49_s30 }
  0x3f   :  { %p5668_p13 = scmp.ne.s32.totalorder %s49_s30, %s5667_s0  ;;  %p5673_p1 = scmp.lt.s32.totalorder %s5667_s0, %s5667_s0 }
  0x41   :  { %p5674_p2 = por %p5673_p1, %p5672_p0 }
  0x43   :  { %p5675_p3 = pnand %p5674_p2, %p5668_p13 }
  0x45   :  { %5678 = shalt.err (!%p5675_p3)
}
  0x46   :  { %54 = dma.hbm_to_vmem [thread:$0]  %s7703_s2, 4096, %s49_s30, [#allocation7], %s5756_s19, %s5756_s19, %s5757_s20  }
  0x47   :  { %s5679_s23 = scalar_lea.hbm %s7706_s5, 4096 }
  0x48   :  { %p5680_p4 = scmp.ne.s32.totalorder %s7706_s5, %s5679_s23  ;;  %p5683_p5 = scmp.lt.u32.totalorder %s5679_s23, %s7706_s5 }
  0x4a   :  { %p5685_p6 = pnand %p5683_p5, %p5680_p4 }
  0x4c   :  { %5688 = shalt.err (!%p5685_p6)
}
  0x4d   :  { %s5689_s11 = scalar_lea.vmem %s75_s12, 4096  ;;  %p5694_p8 = scmp.lt.s32.totalorder %s75_s12, %s75_s12 }
  0x4e   :  { %p5690_p7 = scmp.ne.s32.totalorder %s75_s12, %s5689_s11  ;;  %p5695_p9 = scmp.lt.s32.totalorder %s5689_s11, %s5689_s11 }
  0x50   :  { %p5696_p10 = por %p5695_p9, %p5694_p8 }
  0x52   :  { %p5697_p11 = pnand %p5696_p10, %p5690_p7 }
  0x54   :  { %5700 = shalt.err (!%p5697_p11)
}
  0x55   :  { %80 = dma.hbm_to_vmem [thread:$0]  %s7706_s5, 4096, %s75_s12, [#allocation10], %s5756_s19, %s5756_s19, %s5757_s20  }
  0x56   :  { %s5764_s13 = smov [#allocation12]   ;;  %s5701_s15 = scalar_lea.hbm %s7708_s7, 1024 }
  0x57   :  { %s88_s1 = sshll.u32 %s5764_s13, 4  ;;  %p5702_p12 = scmp.ne.s32.totalorder %s7708_s7, %s5701_s15  ;;  %s89_s1 = int_to_ptr.vmem [resolvable:$true] %s88_s1 }
  0x58   :  { %p5705_p13 = scmp.lt.u32.totalorder %s5701_s15, %s7708_s7 }
  0x5a   :  { %p5707_p0 = pnand %p5705_p13, %p5702_p12 }
  0x5c   :  { %5710 = shalt.err (!%p5707_p0)
}
  0x5d   :  { %s5711_s18 = scalar_lea.vmem %s89_s1, 1024  ;;  %p5716_p2 = scmp.lt.s32.totalorder %s89_s1, %s89_s1 }
  0x5e   :  { %p5712_p1 = scmp.ne.s32.totalorder %s89_s1, %s5711_s18  ;;  %p5717_p3 = scmp.lt.s32.totalorder %s5711_s18, %s5711_s18 }
  0x60   :  { %p5718_p4 = por %p5717_p3, %p5716_p2 }
  0x62   :  { %p5719_p5 = pnand %p5718_p4, %p5712_p1 }
  0x64   :  { %5722 = shalt.err (!%p5719_p5)
}
  0x65   :  { %94 = dma.hbm_to_vmem [thread:$0]  %s7708_s7, 1024, %s89_s1, [#allocation13], %s5760_s4, %s5760_s4, %s5761_s24  }
  0x66   :  { %5745 = dma.done.wait [#allocation4], 1024  }
  0x67   :  { %5746 = vsyncadd [#allocation4], 4294966272 }
  0x68   :  { %5747 = dma.done.wait [#allocation7], 4608  }
  0x69   :  { %5748 = vsyncadd [#allocation7], 4294962688 }
  0x6a   :  { %5749 = dma.done.wait [#allocation10], 8192  }
  0x6b   :  { %5750 = vsyncadd [#allocation10], 4294959104 }
  0x6c   :  { %5751 = dma.done.wait [#allocation13], 1024  }
  0x6d   :  { %5752 = vsyncadd [#allocation13], 4294966272  ;;  %v7711_v0 = vmov 0   ;;  %v4684_v1 = vld [vmem:[#allocation6 + $0x4] ss:$16 sps:$4 sm:$0xff]   ;;  %vm218_vm0 = vcmask 130048  }
  0x6e   :  { %275 = vmatprep.mubr.bf16.mxu0 %v7711_v0  ;;  %335 = vmatprep.mubr.bf16.mxu1 %v7711_v0  ;;  %v4686_v2 = vld [vmem:[#allocation6] ss:$16 sps:$4 sm:$0xff]   ;;  %v4689_v5 = vld [vmem:[#allocation6 + $0x8] ss:$16 sps:$4 sm:$0xff]   ;;  %v4691_v6 = vld [vmem:[#allocation6 + $0xc] ss:$16 sps:$4 sm:$0xff]  }
  0x6f   :  { %243 = vmatprep.subr.bf16.mxu0 %v4684_v1  ;;  %4602 = vmatprep.subr.bf16.mxu1 %v4684_v1  ;;  %v4687_v3 = vld [vmem:[#allocation3] sm:$0xff]   ;;  %v5913_v4 = vld [vmem:[#allocation3 + $0x30] sm:$0xff]   ;;  %v4692_v7 = vld [vmem:[#allocation3 + $0x8] sm:$0xff]   ;;  %vm5767_vm1 = vmmov 0   ;;  %s5768_s12 = smov [#allocation14]  }
  0x70   :  { %244 = vmatpush1.bf16.msra.mxu0 %v4686_v2  ;;  %4603 = vmatpush1.bf16.msra.mxu1 %v4686_v2  ;;  %v5920_v8 = vld [vmem:[#allocation8 + $0x4] ss:$16 sps:$4 sm:$0xff]   ;;  %v5922_v9 = vld [vmem:[#allocation8 + $0xc] ss:$16 sps:$4 sm:$0xff]   ;;  %v4699_v10 = vld [vmem:[#allocation8] ss:$16 sps:$4 sm:$0xff]  }
  0x71   :  { %356 = vmatprep.subr.bf16.mxu1 %v4691_v6  ;;  %v5924_v11 = vld [vmem:[#allocation3 + $0x38] sm:$0xff]   ;;  %793 = vmatprep.subr.bf16.mxu0 %v5920_v8  ;;  %v4701_v12 = vld [vmem:[#allocation8 + $0x24] ss:$16 sps:$4 sm:$0xff]   ;;  %v4703_v13 = vld [vmem:[#allocation8 + $0x20] ss:$16 sps:$4 sm:$0xff]   ;;  %s4329_s21 = sshll.u32 %s5768_s12, 4  ;;  %s4330_s21 = int_to_ptr.vmem [resolvable:$true] %s4329_s21 }
  0x72   :  { %v4705_v14 = vld [vmem:[#allocation8 + $0x44] ss:$16 sps:$4 sm:$0xff]   ;;  %v4709_v15 = vld [vmem:[#allocation8 + $0x40] ss:$16 sps:$4 sm:$0xff]   ;;  %v4700_v18 = vld [vmem:[#allocation8 + $0x8] ss:$16 sps:$4 sm:$0xff]   ;;  %p5728_p7 = scmp.lt.s32.totalorder %s4330_s21, %s4330_s21 }
  0x73   :  { %4356 = vmatmul.mubr.msk.bf16.vlgmr.msra.gmra.mrb[0].mxu0 %vm218_vm0, %v4687_v3  ;;  %4362 = vmatmul.mubr.msk.bf16.vlgmr.msra.gmra.mrb[0].mxu1 %vm218_vm0, %v5913_v4  ;;  %v4711_v16 = vld [vmem:[#allocation8 + $0x64] ss:$16 sps:$4 sm:$0xff]   ;;  %v4707_v19 = vld [vmem:[#allocation8 + $0x2c] ss:$16 sps:$4 sm:$0xff]   ;;  %v4713_v20 = vld [vmem:[#allocation8 + $0x60] ss:$16 sps:$4 sm:$0xff]  }
  0x74   :  { %285 = vmatprep.mubr.bf16.mxu0 %v7711_v0  ;;  %357 = vmatpush1.bf16.msra.mxu1 %v4689_v5  ;;  %v4694_v17 = vld [vmem:[#allocation3 + $0x10] sm:$0xff]   ;;  %v4710_v22 = vld [vmem:[#allocation8 + $0x28] ss:$16 sps:$4 sm:$0xff]   ;;  %v4717_v23 = vld [vmem:[#allocation8 + $0x4c] ss:$16 sps:$4 sm:$0xff]   ;;  %s5723_s22 = scalar_lea.vmem %s4330_s21, 256 }
  0x75   :  { %345 = vmatprep.mubr.bf16.mxu1 %v7711_v0  ;;  %836 = vmatprep.subr.bf16.mxu1 %v5922_v9  ;;  %v4715_v21 = vld [vmem:[#allocation8 + $0x84] ss:$16 sps:$4 sm:$0xff]   ;;  %v4719_v24 = vld [vmem:[#allocation8 + $0x80] ss:$16 sps:$4 sm:$0xff]   ;;  %v4704_v25 = vld [vmem:[#allocation3 + $0x18] sm:$0xff]   ;;  %p5724_p6 = scmp.ne.s32.totalorder %s4330_s21, %s5723_s22  ;;  %p5729_p8 = scmp.lt.s32.totalorder %s5723_s22, %s5723_s22 }
  0x76   :  { %794 = vmatpush1.bf16.msra.mxu0 %v4699_v10  ;;  %v4720_v26 = vld [vmem:[#allocation8 + $0x48] ss:$16 sps:$4 sm:$0xff]   ;;  %v4721_v27 = vld [vmem:[#allocation8 + $0xa4] ss:$16 sps:$4 sm:$0xff]   ;;  %v4723_v28 = vld [vmem:[#allocation8 + $0xa0] ss:$16 sps:$4 sm:$0xff]  }
  0x77   :  { %795 = vmatprep.subr.bf16.mxu0 %v4701_v12  ;;  %v4727_v29 = vld [vmem:[#allocation8 + $0x6c] ss:$16 sps:$4 sm:$0xff]   ;;  %v4725_v30 = vld [vmem:[#allocation8 + $0xc4] ss:$16 sps:$4 sm:$0xff]   ;;  %v4729_v31 = vld [vmem:[#allocation8 + $0xc0] ss:$16 sps:$4 sm:$0xff]   ;;  %p5730_p9 = por %p5729_p8, %p5728_p7 }
  0x78   :  { %v4730_v32 = vld [vmem:[#allocation8 + $0x68] ss:$16 sps:$4 sm:$0xff]   ;;  %v4714_v33 = vld [vmem:[#allocation3 + $0x20] sm:$0xff]   ;;  %v4734_v34 = vld [vmem:[#allocation8 + $0x8c] ss:$16 sps:$4 sm:$0xff]  }
  0x79   :  { %v4731_v35 = vld [vmem:[#allocation8 + $0xe4] ss:$16 sps:$4 sm:$0xff]   ;;  %v4736_v36 = vld [vmem:[#allocation8 + $0x88] ss:$16 sps:$4 sm:$0xff]   ;;  %v4733_v37 = vld [vmem:[#allocation8 + $0xe0] ss:$16 sps:$4 sm:$0xff]   ;;  %p5731_p10 = pnand %p5730_p9, %p5724_p6 }
  0x7a   :  { %796 = vmatpush1.bf16.msra.mxu0 %v4703_v13  ;;  %v4737_v38 = vld [vmem:[#allocation8 + $0xac] ss:$16 sps:$4 sm:$0xff]   ;;  %v5943_v39 = vld [vmem:[#allocation8 + $0xa8] ss:$16 sps:$4 sm:$0xff]   ;;  %v5978_v45 = vld [vmem:[#allocation11 + $0x4] ss:$16 sps:$4 sm:$0xff]  }
  0x7b   :  { %4357 = vmatmul.mubr.msk.bf16.gmra.mrb[4].mxu0 %vm218_vm0, %v4692_v7  ;;  %4363 = vmatmul.mubr.msk.bf16.gmra.mrb[4].mxu1 %vm218_vm0, %v5924_v11  ;;  %v5947_v40 = vld [vmem:[#allocation8 + $0xcc] ss:$16 sps:$4 sm:$0xff]   ;;  %v5949_v42 = vld [vmem:[#allocation8 + $0xc8] ss:$16 sps:$4 sm:$0xff]   ;;  %v5982_v47 = vld [vmem:[#allocation11] ss:$16 sps:$4 sm:$0xff]  }
  0x7c   :  { %295 = vmatprep.mubr.bf16.mxu0 %v7711_v0  ;;  %388 = vmatprep.mubr.bf16.mxu1 %v7711_v0  ;;  %v4724_v41 = vld [vmem:[#allocation3 + $0x28] sm:$0xff]   ;;  %v5990_v49 = vld [vmem:[#allocation11 + $0x24] ss:$16 sps:$4 sm:$0xff]   ;;  %v5994_v51 = vld [vmem:[#allocation11 + $0x20] ss:$16 sps:$4 sm:$0xff]  }
  0x7d   :  { %797 = vmatprep.subr.bf16.mxu0 %v4705_v14  ;;  %v5951_v43 = vld [vmem:[#allocation8 + $0xec] ss:$16 sps:$4 sm:$0xff]   ;;  %v5957_v44 = vld [vmem:[#allocation8 + $0xe8] ss:$16 sps:$4 sm:$0xff]   ;;  %v6002_v53 = vld [vmem:[#allocation11 + $0x44] ss:$16 sps:$4 sm:$0xff]  }
  0x7e   :  { %798 = vmatpush1.bf16.msra.mxu0 %v4709_v15  ;;  %v5980_v46 = vld [vmem:[#allocation11 + $0xc] ss:$16 sps:$4 sm:$0xff]   ;;  %v5984_v48 = vld [vmem:[#allocation11 + $0x8] ss:$16 sps:$4 sm:$0xff]   ;;  %v6006_v55 = vld [vmem:[#allocation11 + $0x40] ss:$16 sps:$4 sm:$0xff]  }
  0x7f   :  { %799 = vmatprep.subr.bf16.mxu0 %v4711_v16  ;;  %v5992_v50 = vld [vmem:[#allocation11 + $0x2c] ss:$16 sps:$4 sm:$0xff]   ;;  %v5996_v52 = vld [vmem:[#allocation11 + $0x28] ss:$16 sps:$4 sm:$0xff]   ;;  %v6014_v57 = vld [vmem:[#allocation11 + $0x64] ss:$16 sps:$4 sm:$0xff]  }
  0x80   :  { %v6004_v54 = vld [vmem:[#allocation11 + $0x4c] ss:$16 sps:$4 sm:$0xff]   ;;  %v6008_v56 = vld [vmem:[#allocation11 + $0x48] ss:$16 sps:$4 sm:$0xff]   ;;  %v6018_v59 = vld [vmem:[#allocation11 + $0x60] ss:$16 sps:$4 sm:$0xff]  }
  0x81   :  { %v6016_v58 = vld [vmem:[#allocation11 + $0x6c] ss:$16 sps:$4 sm:$0xff]   ;;  %v6020_v60 = vld [vmem:[#allocation11 + $0x68] ss:$16 sps:$4 sm:$0xff]   ;;  %v6026_v61 = vld [vmem:[#allocation11 + $0x84] ss:$16 sps:$4 sm:$0xff]  }
  0x82   :  { %800 = vmatpush1.bf16.msra.mxu0 %v4713_v20  ;;  %v6028_v62 = vld [vmem:[#allocation11 + $0x8c] ss:$16 sps:$4 sm:$0xff]   ;;  %v6030_v63 = vld [vmem:[#allocation11 + $0x80] ss:$16 sps:$4 sm:$0xff]   ;;  %v6032_v1 = vld [vmem:[#allocation11 + $0x88] ss:$16 sps:$4 sm:$0xff]  }
  0x83   :  { %4358 = vmatmul.mubr.msk.bf16.gmra.mrb[8].mxu0 %vm218_vm0, %v4694_v17  ;;  %4364 = vmatmul.mubr.msk.bf16.vlgmr.msra.gmra.mrb[8].mxu1 %vm218_vm0, %v4687_v3  ;;  %v6038_v2 = vld [vmem:[#allocation11 + $0xa4] ss:$16 sps:$4 sm:$0xff]   ;;  %v6040_v3 = vld [vmem:[#allocation11 + $0xac] ss:$16 sps:$4 sm:$0xff]   ;;  %v6044_v5 = vld [vmem:[#allocation11 + $0xa8] ss:$16 sps:$4 sm:$0xff]  }
  0x84   :  { %837 = vmatpush1.bf16.msra.mxu1 %v4700_v18  ;;  %305 = vmatprep.mubr.bf16.mxu0 %v7711_v0  ;;  %v6050_v6 = vld [vmem:[#allocation11 + $0xc4] ss:$16 sps:$4 sm:$0xff]   ;;  %v6054_v10 = vld [vmem:[#allocation11 + $0xc0] ss:$16 sps:$4 sm:$0xff]   ;;  %v6064_v13 = vld [vmem:[#allocation11 + $0xec] ss:$16 sps:$4 sm:$0xff]  }
  0x85   :  { %398 = vmatprep.mubr.bf16.mxu1 %v7711_v0  ;;  %838 = vmatprep.subr.bf16.mxu1 %v4707_v19  ;;  %v6062_v12 = vld [vmem:[#allocation11 + $0xe4] ss:$16 sps:$4 sm:$0xff]   ;;  %v6066_v14 = vld [vmem:[#allocation11 + $0xe0] ss:$16 sps:$4 sm:$0xff]   ;;  %v6068_v15 = vld [vmem:[#allocation11 + $0xe8] ss:$16 sps:$4 sm:$0xff]  }
  0x86   :  { %801 = vmatprep.subr.bf16.mxu0 %v4715_v21  ;;  %7996 = vst [vmem:[#allocation20_spill] sm:$0xff] %v6066_v14  ;;  %7997 = vst [vmem:[#allocation21_spill] sm:$0xff] %v6068_v15  ;;  %v6074_v16 = vld [vmem:[#allocation9 + $0x4] ss:$16 sps:$4 sm:$0xff]   ;;  %v4798_v18 = vld [vmem:[#allocation9] ss:$16 sps:$4 sm:$0xff]  }
  0x87   :  { %802 = vmatpush1.bf16.msra.mxu0 %v4719_v24  ;;  %7998 = vst [vmem:[#allocation22_spill] sm:$0xff] %v6074_v16  ;;  %v4799_v19 = vld [vmem:[#allocation9 + $0x8] ss:$16 sps:$4 sm:$0xff]   ;;  %v6082_v20 = vld [vmem:[#allocation9 + $0x24] ss:$16 sps:$4 sm:$0xff]  }
  0x88   :  { %839 = vmatpush1.bf16.msra.mxu1 %v4710_v22  ;;  %803 = vmatprep.subr.bf16.mxu0 %v4721_v27  ;;  %8000 = vst [vmem:[#allocation24_spill] sm:$0xff] %v6082_v20  ;;  %v6084_v21 = vld [vmem:[#allocation9 + $0x2c] ss:$16 sps:$4 sm:$0xff]   ;;  %v6086_v22 = vld [vmem:[#allocation9 + $0x20] ss:$16 sps:$4 sm:$0xff]  }
  0x89   :  { %840 = vmatprep.subr.bf16.mxu1 %v4717_v23  ;;  %8001 = vst [vmem:[#allocation25_spill] sm:$0xff] %v6084_v21  ;;  %8002 = vst [vmem:[#allocation26_spill] sm:$0xff] %v6086_v22  ;;  %v6088_v23 = vld [vmem:[#allocation9 + $0x28] ss:$16 sps:$4 sm:$0xff]   ;;  %v6096_v24 = vld [vmem:[#allocation9 + $0x44] ss:$16 sps:$4 sm:$0xff]  }
  0x8a   :  { %8003 = vst [vmem:[#allocation27_spill] sm:$0xff] %v6088_v23  ;;  %8004 = vst [vmem:[#allocation28_spill] sm:$0xff] %v6096_v24  ;;  %v6102_v27 = vld [vmem:[#allocation9 + $0x48] ss:$16 sps:$4 sm:$0xff]  }
  0x8b   :  { %4359 = vmatmul.mubr.msk.bf16.gmra.mrb[12].mxu0 %vm218_vm0, %v4704_v25  ;;  %4365 = vmatmul.mubr.msk.bf16.gmra.mrb[12].mxu1 %vm218_vm0, %v4692_v7  ;;  %v6052_v7 = vld [vmem:[#allocation11 + $0xcc] ss:$16 sps:$4 sm:$0xff]   ;;  %8007 = vst [vmem:[#allocation31_spill] sm:$0xff] %v6102_v27 }
  0x8c   :  { %315 = vmatprep.mubr.bf16.mxu0 %v7711_v0  ;;  %408 = vmatprep.mubr.bf16.mxu1 %v7711_v0 }
  0x8d   :  { %841 = vmatpush1.bf16.msra.mxu1 %v4720_v26  ;;  %804 = vmatpush1.bf16.msra.mxu0 %v4723_v28  ;;  %v6100_v26 = vld [vmem:[#allocation9 + $0x40] ss:$16 sps:$4 sm:$0xff]   ;;  %v6108_v28 = vld [vmem:[#allocation9 + $0x64] ss:$16 sps:$4 sm:$0xff]  }
  0x8e   :  { %842 = vmatprep.subr.bf16.mxu1 %v4727_v29  ;;  %805 = vmatprep.subr.bf16.mxu0 %v4725_v30  ;;  %8006 = vst [vmem:[#allocation30_spill] sm:$0xff] %v6100_v26  ;;  %8008 = vst [vmem:[#allocation32_spill] sm:$0xff] %v6108_v28  ;;  %v6110_v29 = vld [vmem:[#allocation9 + $0x6c] ss:$16 sps:$4 sm:$0xff]   ;;  %v4816_v30 = vld [vmem:[#allocation9 + $0x60] ss:$16 sps:$4 sm:$0xff]  }
  0x8f   :  { %8009 = vst [vmem:[#allocation33_spill] sm:$0xff] %v6110_v29 }
  0x91   :  { %843 = vmatpush1.bf16.msra.mxu1 %v4730_v32  ;;  %806 = vmatpush1.bf16.msra.mxu0 %v4729_v31  ;;  %v4817_v31 = vld [vmem:[#allocation9 + $0x68] ss:$16 sps:$4 sm:$0xff]   ;;  %v6114_v32 = vld [vmem:[#allocation9 + $0x84] ss:$16 sps:$4 sm:$0xff]  }
  0x92   :  { %844 = vmatprep.subr.bf16.mxu1 %v4734_v34  ;;  %807 = vmatprep.subr.bf16.mxu0 %v4731_v35  ;;  %8010 = vst [vmem:[#allocation34_spill] sm:$0xff] %v6114_v32  ;;  %v4822_v34 = vld [vmem:[#allocation9 + $0x80] ss:$16 sps:$4 sm:$0xff]   ;;  %v4823_v35 = vld [vmem:[#allocation9 + $0x88] ss:$16 sps:$4 sm:$0xff]  }
  0x93   :  { %4360 = vmatmul.mubr.msk.bf16.gmra.mrb[16].mxu0 %vm218_vm0, %v4714_v33  ;;  %4366 = vmatmul.mubr.msk.bf16.gmra.mrb[16].mxu1 %vm218_vm0, %v4694_v17  ;;  %v6076_v17 = vld [vmem:[#allocation9 + $0xc] ss:$16 sps:$4 sm:$0xff]  }
  0x94   :  { %325 = vmatprep.mubr.bf16.mxu0 %v7711_v0  ;;  %418 = vmatprep.mubr.bf16.mxu1 %v7711_v0  ;;  %7999 = vst [vmem:[#allocation23_spill] sm:$0xff] %v6076_v17 }
  0x95   :  { %845 = vmatpush1.bf16.msra.mxu1 %v4736_v36  ;;  %808 = vmatpush1.bf16.msra.mxu0 %v4733_v37  ;;  %v4824_v36 = vld [vmem:[#allocation9 + $0xa4] ss:$16 sps:$4 sm:$0xff]   ;;  %v4826_v37 = vld [vmem:[#allocation9 + $0xac] ss:$16 sps:$4 sm:$0xff]  }
  0x96   :  { %846 = vmatprep.subr.bf16.mxu1 %v4737_v38  ;;  %1104 = vmatprep.subr.bf16.mxu0 %v5978_v45  ;;  %v4828_v38 = vld [vmem:[#allocation9 + $0xa0] ss:$16 sps:$4 sm:$0xff]  }
  0x99   :  { %847 = vmatpush1.bf16.msra.mxu1 %v5943_v39 }
  0x9a   :  { %848 = vmatprep.subr.bf16.mxu1 %v5947_v40 }
  0x9b   :  { %4361 = vmatmul.mubr.msk.bf16.gmra.mrb[20].mxu0 %vm218_vm0, %v4724_v41  ;;  %4367 = vmatmul.mubr.msk.bf16.gmra.mrb[20].mxu1 %vm218_vm0, %v4704_v25  ;;  %v6098_v25 = vld [vmem:[#allocation9 + $0x4c] ss:$16 sps:$4 sm:$0xff]  }
  0x9c   :  { %428 = vmatprep.mubr.bf16.mxu1 %v7711_v0  ;;  %825 = vmatprep.mubr.bf16.mxu0 %v7711_v0  ;;  %8005 = vst [vmem:[#allocation29_spill] sm:$0xff] %v6098_v25 }
  0x9d   :  { %849 = vmatpush1.bf16.msra.mxu1 %v5949_v42 }
  0x9e   :  { %850 = vmatprep.subr.bf16.mxu1 %v5951_v43 }
  0xa1   :  { %851 = vmatpush1.bf16.msra.mxu1 %v5957_v44 }
  0xa2   :  { %1147 = vmatprep.subr.bf16.mxu1 %v5980_v46 }
  0xa3   :  { %4368 = vmatmul.mubr.msk.bf16.gmra.mrb[24].mxu1 %vm218_vm0, %v4714_v33  ;;  %826 = vmatmul.mubr.bf16.vlgmr.msra.gmra.mrb[24].mxu0 %v7711_v0  ;;  %v6116_v33 = vld [vmem:[#allocation9 + $0x8c] ss:$16 sps:$4 sm:$0xff]  }
  0xa4   :  { %438 = vmatprep.mubr.bf16.mxu1 %v7711_v0  ;;  %1136 = vmatprep.mubr.bf16.mxu0 %v7711_v0  ;;  %8011 = vst [vmem:[#allocation35_spill] sm:$0xff] %v6116_v33 }
  0xa5   :  { %1105 = vmatpush1.bf16.msra.mxu0 %v5982_v47 }
  0xa6   :  { %1106 = vmatprep.subr.bf16.mxu0 %v5990_v49 }
  0xa9   :  { %1107 = vmatpush1.bf16.msra.mxu0 %v5994_v51 }
  0xaa   :  { %1108 = vmatprep.subr.bf16.mxu0 %v6002_v53 }
  0xab   :  { %4369 = vmatmul.mubr.msk.bf16.gmra.mrb[28].mxu1 %vm218_vm0, %v4724_v41  ;;  %v4829_v41 = vld [vmem:[#allocation9 + $0xa8] ss:$16 sps:$4 sm:$0xff]  }
  0xac   :  { %448 = vmatprep.mubr.bf16.mxu1 %v7711_v0 }
  0xad   :  { %1109 = vmatpush1.bf16.msra.mxu0 %v6006_v55 }
  0xae   :  { %1110 = vmatprep.subr.bf16.mxu0 %v6014_v57 }
  0xb1   :  { %1111 = vmatpush1.bf16.msra.mxu0 %v6018_v59 }
  0xb2   :  { %1112 = vmatprep.subr.bf16.mxu0 %v6026_v61 }
  0xb3   :  { %4370 = vmatmul.mubr.msk.bf16.gmra.mrb[32].mxu1 %vm218_vm0, %v5913_v4  ;;  %v6042_v4 = vld [vmem:[#allocation11 + $0xa0] ss:$16 sps:$4 sm:$0xff]  }
  0xb4   :  { %458 = vmatprep.mubr.bf16.mxu1 %v7711_v0 }
  0xb5   :  { %1113 = vmatpush1.bf16.msra.mxu0 %v6030_v63 }
  0xb6   :  { %1114 = vmatprep.subr.bf16.mxu0 %v6038_v2 }
  0xb9   :  { %1115 = vmatpush1.bf16.msra.mxu0 %v6042_v4 }
  0xba   :  { %1116 = vmatprep.subr.bf16.mxu0 %v6050_v6 }
  0xbb   :  { %4371 = vmatmul.mubr.msk.bf16.gmra.mrb[36].mxu1 %vm218_vm0, %v5924_v11  ;;  %v6056_v11 = vld [vmem:[#allocation11 + $0xc8] ss:$16 sps:$4 sm:$0xff]  }
  0xbc   :  { %868 = vmatprep.mubr.bf16.mxu1 %v7711_v0 }
  0xbd   :  { %1117 = vmatpush1.bf16.msra.mxu0 %v6054_v10 }
  0xbe   :  { %1118 = vmatprep.subr.bf16.mxu0 %v6062_v12 }
  0xc1   :  { %1119 = vmatpush1.bf16.msra.mxu0 %v6066_v14 }
  0xc2   :  { %1350 = vmatprep.subr.bf16.mxu0 %v6074_v16 }
  0xc3   :  { %869 = vmatmul.mubr.bf16.vlgmr.msra.gmra.mrb[40].mxu1 %v7711_v0 }
  0xc4   :  { %1179 = vmatprep.mubr.bf16.mxu1 %v7711_v0  ;;  %1148 = vmatpush1.bf16.msra.mxu1 %v5984_v48 }
  0xc5   :  { %1149 = vmatprep.subr.bf16.mxu1 %v5992_v50  ;;  %1137 = vmatmul.mubr.bf16.vlgmr.msra.gmra.mrb[28].mxu0 %v7711_v0 }
  0xc6   :  { %1351 = vmatpush1.bf16.msra.mxu0 %v4798_v18  ;;  %1382 = vmatprep.mubr.bf16.mxu0 %v7711_v0  ;;  %v4830_v18 = vld [vmem:[#allocation9 + $0xc4] ss:$16 sps:$4 sm:$0xff]  }
  0xc7   :  { %1352 = vmatprep.subr.bf16.mxu0 %v6082_v20 }
  0xc8   :  { %1150 = vmatpush1.bf16.msra.mxu1 %v5996_v52 }
  0xc9   :  { %1151 = vmatprep.subr.bf16.mxu1 %v6004_v54 }
  0xca   :  { %1353 = vmatpush1.bf16.msra.mxu0 %v6086_v22 }
  0xcb   :  { %1354 = vmatprep.subr.bf16.mxu0 %v6096_v24 }
  0xcc   :  { %1152 = vmatpush1.bf16.msra.mxu1 %v6008_v56 }
  0xcd   :  { %1153 = vmatprep.subr.bf16.mxu1 %v6016_v58 }
  0xce   :  { %1355 = vmatpush1.bf16.msra.mxu0 %v6100_v26 }
  0xcf   :  { %1356 = vmatprep.subr.bf16.mxu0 %v6108_v28 }
  0xd0   :  { %1154 = vmatpush1.bf16.msra.mxu1 %v6020_v60 }
  0xd1   :  { %1155 = vmatprep.subr.bf16.mxu1 %v6028_v62 }
  0xd2   :  { %1357 = vmatpush1.bf16.msra.mxu0 %v4816_v30  ;;  %v6120_v30 = vld [vmem:[#allocation9 + $0xc0] ss:$16 sps:$4 sm:$0xff]  }
  0xd3   :  { %1358 = vmatprep.subr.bf16.mxu0 %v6114_v32  ;;  %8012 = vst [vmem:[#allocation36_spill] sm:$0xff] %v6120_v30 }
  0xd4   :  { %1156 = vmatpush1.bf16.msra.mxu1 %v6032_v1 }
  0xd5   :  { %1157 = vmatprep.subr.bf16.mxu1 %v6040_v3 }
  0xd6   :  { %1359 = vmatpush1.bf16.msra.mxu0 %v4822_v34  ;;  %v6126_v34 = vld [vmem:[#allocation9 + $0xec] ss:$16 sps:$4 sm:$0xff]  }
  0xd7   :  { %1360 = vmatprep.subr.bf16.mxu0 %v4824_v36  ;;  %8015 = vst [vmem:[#allocation39_spill] sm:$0xff] %v6126_v34  ;;  %v6132_v36 = vld [vmem:[#allocation9 + $0xe8] ss:$16 sps:$4 sm:$0xff]  }
  0xd8   :  { %1158 = vmatpush1.bf16.msra.mxu1 %v6044_v5  ;;  %8017 = vst [vmem:[#allocation41_spill] sm:$0xff] %v6132_v36 }
  0xd9   :  { %1159 = vmatprep.subr.bf16.mxu1 %v6052_v7 }
  0xda   :  { %1361 = vmatpush1.bf16.msra.mxu0 %v4828_v38 }
  0xdb   :  { %1362 = vmatprep.subr.bf16.mxu0 %v4830_v18  ;;  %v136_v18 = vld [vmem:[%s7704_s3] sm:$0xf] }
  0xdc   :  { %1160 = vmatpush1.bf16.msra.mxu1 %v6056_v11 }
  0xdd   :  { %1161 = vmatprep.subr.bf16.mxu1 %v6064_v13 }
  0xde   :  { %1363 = vmatpush1.bf16.msra.mxu0 %v6120_v30 }
  0xe0   :  { %1162 = vmatpush1.bf16.msra.mxu1 %v6068_v15 }
  0xe1   :  { %1393 = vmatprep.subr.bf16.mxu1 %v6076_v17 }
  0xe3   :  { %1180 = vmatmul.mubr.bf16.vlgmr.msra.gmra.mrb[44].mxu1 %v7711_v0 }
  0xe4   :  { %1394 = vmatpush1.bf16.msra.mxu1 %v4799_v19  ;;  %1425 = vmatprep.mubr.bf16.mxu1 %v7711_v0  ;;  %v4832_v19 = vld [vmem:[#allocation9 + $0xcc] ss:$16 sps:$4 sm:$0xff]   ;;  %v6124_v0 = vld [vmem:[#allocation9 + $0xe4] ss:$16 sps:$4 sm:$0xff]  }
  0xe5   :  { %1395 = vmatprep.subr.bf16.mxu1 %v6084_v21  ;;  %8014 = vst [vmem:[#allocation38_spill] sm:$0xff] %v6124_v0  ;;  %1364 = vmatprep.subr.bf16.mxu0 %v6124_v0 }
  0xe8   :  { %1396 = vmatpush1.bf16.msra.mxu1 %v6088_v23 }
  0xe9   :  { %1397 = vmatprep.subr.bf16.mxu1 %v6098_v25 }
  0xec   :  { %1398 = vmatpush1.bf16.msra.mxu1 %v6102_v27 }
  0xed   :  { %1399 = vmatprep.subr.bf16.mxu1 %v6110_v29 }
  0xf0   :  { %1400 = vmatpush1.bf16.msra.mxu1 %v4817_v31  ;;  %v6122_v31 = vld [vmem:[#allocation9 + $0xc8] ss:$16 sps:$4 sm:$0xff]  }
  0xf1   :  { %1401 = vmatprep.subr.bf16.mxu1 %v6116_v33  ;;  %8013 = vst [vmem:[#allocation37_spill] sm:$0xff] %v6122_v31 }
  0xf4   :  { %1402 = vmatpush1.bf16.msra.mxu1 %v4823_v35  ;;  %v6130_v35 = vld [vmem:[#allocation9 + $0xe0] ss:$16 sps:$4 sm:$0xff]  }
  0xf5   :  { %1403 = vmatprep.subr.bf16.mxu1 %v4826_v37  ;;  %8016 = vst [vmem:[#allocation40_spill] sm:$0xff] %v6130_v35  ;;  %v138_v37 = vlaneseq  ;;  %1365 = vmatpush1.bf16.msra.mxu0 %v6130_v35 }
  0xf6   :  { %1519 = vmatprep.subr.bf16.mxu0 %v5920_v8 }
  0xf7   :  { %v6140_v38 = vshrl.u32 %v138_v37, 7 }
  0xf8   :  { %1404 = vmatpush1.bf16.msra.mxu1 %v4829_v41 }
  0xf9   :  { %1405 = vmatprep.subr.bf16.mxu1 %v4832_v19  ;;  %8018 = vst [vmem:[#allocation42_spill] sm:$0xff] %v6140_v38  ;;  %v7722_v41 = vsub.s32 0, %v6140_v38  ;;  %v7724_v19 = vsub.s32 1, %v6140_v38 }
  0xfc   :  { %1406 = vmatpush1.bf16.msra.mxu1 %v6122_v31 }
  0xfd   :  { %1407 = vmatprep.subr.bf16.mxu1 %v6126_v34  ;;  %v6149_v34 = vrot.slane %v136_v18, %v7722_v41 }
 0x100   :  { %1408 = vmatpush1.bf16.msra.mxu1 %v6132_v36  ;;  %v6153_v36 = vrot.slane %v136_v18, %v7724_v19 }
 0x101   :  { %1562 = vmatprep.subr.bf16.mxu1 %v5922_v9 }
 0x146   :  { %v337_v8 = vpop.f32.mrb[0].mxu1  ;;  %v277_v9 = vpop.f32.mrb[0].mxu0 }
 0x147   :  { %v338_v37 = vadd.f32 %v337_v8, %v6149_v34  ;;  %v339_v35 = vpop.f32.mrb[1].mxu1  ;;  %v278_v0 = vadd.f32 %v277_v9, %v6149_v34  ;;  %v279_v31 = vpop.f32.mrb[1].mxu0 }
 0x148   :  { %v340_v30 = vadd.f32 %v339_v35, %v6153_v36  ;;  %v341_v33 = vpop.f32.mrb[2].mxu1  ;;  %v280_v32 = vadd.f32 %v279_v31, %v6153_v36  ;;  %v281_v29 = vpop.f32.mrb[2].mxu0 }
 0x149   :  { %v342_v41 = vadd.f32 %v341_v33, %v6149_v34  ;;  %v343_v28 = vpop.f32.mrb[3].mxu1  ;;  %v282_v19 = vadd.f32 %v281_v29, %v6149_v34  ;;  %v283_v27 = vpop.f32.mrb[3].mxu0 }
 0x14a   :  { %v344_v26 = vadd.f32 %v343_v28, %v6153_v36  ;;  %v284_v8 = vadd.f32 %v283_v27, %v6153_v36 }
 0x14b   :  { %v6163_v25 = vpack.c.bf16 %v342_v41, %v338_v37  ;;  %v6165_v9 = vpack.c.bf16 %v282_v19, %v278_v0 }
 0x14c   :  { %v6167_v24 = vpack.c.bf16 %v344_v26, %v340_v30  ;;  %v6169_v35 = vpack.c.bf16 %v284_v8, %v280_v32  ;;  %v7736_v32 = vsub.s32 2, %v6140_v38  ;;  %v7737_v8 = vsub.s32 3, %v6140_v38 }
 0x14d   :  { %8019 = vst [vmem:[#allocation43_spill] sm:$0xff] %v6163_v25 }
 0x14e   :  { %8020 = vst [vmem:[#allocation44_spill] sm:$0xff] %v6167_v24  ;;  %v347_v31 = vpop.f32.mrb[4].mxu1  ;;  %v287_v23 = vpop.f32.mrb[4].mxu0 }
 0x14f   :  { %v348_v33 = vadd.f32 %v347_v31, %v6149_v34  ;;  %v349_v22 = vpop.f32.mrb[5].mxu1  ;;  %v288_v29 = vadd.f32 %v287_v23, %v6149_v34  ;;  %v289_v21 = vpop.f32.mrb[5].mxu0 }
 0x150   :  { %v350_v28 = vadd.f32 %v349_v22, %v6153_v36  ;;  %v351_v20 = vpop.f32.mrb[6].mxu1  ;;  %v290_v27 = vadd.f32 %v289_v21, %v6153_v36  ;;  %v291_v41 = vpop.f32.mrb[6].mxu0 }
 0x151   :  { %v352_v0 = vadd.f32 %v351_v20, %v6149_v34  ;;  %v353_v26 = vpop.f32.mrb[7].mxu1  ;;  %v292_v30 = vadd.f32 %v291_v41, %v6149_v34  ;;  %v293_v19 = vpop.f32.mrb[7].mxu0  ;;  %v6191_v20 = vrot.slane %v136_v18, %v7736_v32 }
 0x152   :  { %v354_v37 = vadd.f32 %v353_v26, %v6153_v36  ;;  %v294_v23 = vadd.f32 %v293_v19, %v6153_v36  ;;  %v6195_v26 = vrot.slane %v136_v18, %v7737_v8 }
 0x153   :  { %v6181_v31 = vpack.c.bf16 %v352_v0, %v348_v33  ;;  %v6183_v22 = vpack.c.bf16 %v292_v30, %v288_v29 }
 0x154   :  { %v6185_v21 = vpack.c.bf16 %v354_v37, %v350_v28  ;;  %v6187_v24 = vpack.c.bf16 %v294_v23, %v290_v27 }
 0x155   :  { %8021 = vst [vmem:[#allocation45_spill] sm:$0xff] %v6181_v31  ;;  %8022 = vst [vmem:[#allocation46_spill] sm:$0xff] %v6183_v22 }
 0x156   :  { %8023 = vst [vmem:[#allocation47_spill] sm:$0xff] %v6185_v21  ;;  %8024 = vst [vmem:[#allocation48_spill] sm:$0xff] %v6187_v24  ;;  %v390_v41 = vpop.f32.mrb[8].mxu1  ;;  %v297_v25 = vpop.f32.mrb[8].mxu0 }
 0x157   :  { %v392_v17 = vpop.f32.mrb[9].mxu1  ;;  %v298_v33 = vadd.f32 %v297_v25, %v6149_v34  ;;  %v299_v0 = vpop.f32.mrb[9].mxu0  ;;  %v391_v27 = vadd.f32 %v390_v41, %v6191_v20 }
 0x158   :  { %v394_v29 = vpop.f32.mrb[10].mxu1  ;;  %v300_v28 = vadd.f32 %v299_v0, %v6153_v36  ;;  %v301_v30 = vpop.f32.mrb[10].mxu0  ;;  %v393_v18 = vadd.f32 %v392_v17, %v6195_v26 }
 0x159   :  { %v395_v19 = vadd.f32 %v394_v29, %v6191_v20  ;;  %v396_v37 = vpop.f32.mrb[11].mxu1  ;;  %v302_v23 = vadd.f32 %v301_v30, %v6149_v34  ;;  %v303_v32 = vpop.f32.mrb[11].mxu0 }
 0x15a   :  { %v397_v8 = vadd.f32 %v396_v37, %v6195_v26  ;;  %v304_v21 = vadd.f32 %v303_v32, %v6153_v36 }
 0x15b   :  { %v6205_v25 = vpack.c.bf16 %v395_v19, %v391_v27  ;;  %v6207_v31 = vpack.c.bf16 %v302_v23, %v298_v33 }
 0x15c   :  { %v6209_v0 = vpack.c.bf16 %v397_v8, %v393_v18  ;;  %v6211_v24 = vpack.c.bf16 %v304_v21, %v300_v28 }
 0x15d   :  { %8025 = vst [vmem:[#allocation49_spill] sm:$0xff] %v6207_v31 }
 0x15e   :  { %8026 = vst [vmem:[#allocation50_spill] sm:$0xff] %v6211_v24  ;;  %v400_v41 = vpop.f32.mrb[12].mxu1  ;;  %v307_v29 = vpop.f32.mrb[12].mxu0 }
 0x15f   :  { %v401_v22 = vadd.f32 %v400_v41, %v6191_v20  ;;  %v402_v30 = vpop.f32.mrb[13].mxu1  ;;  %v308_v38 = vadd.f32 %v307_v29, %v6149_v34  ;;  %v309_v17 = vpop.f32.mrb[13].mxu0 }
 0x160   :  { %v403_v37 = vadd.f32 %v402_v30, %v6195_v26  ;;  %v404_v16 = vpop.f32.mrb[14].mxu1  ;;  %v310_v32 = vadd.f32 %v309_v17, %v6153_v36  ;;  %v311_v27 = vpop.f32.mrb[14].mxu0 }
 0x161   :  { %v405_v33 = vadd.f32 %v404_v16, %v6191_v20  ;;  %v406_v8 = vpop.f32.mrb[15].mxu1  ;;  %v312_v21 = vadd.f32 %v311_v27, %v6149_v34  ;;  %v313_v28 = vpop.f32.mrb[15].mxu0 }
 0x162   :  { %v407_v19 = vadd.f32 %v406_v8, %v6195_v26  ;;  %v314_v23 = vadd.f32 %v313_v28, %v6153_v36 }
 0x163   :  { %v6221_v18 = vpack.c.bf16 %v405_v33, %v401_v22  ;;  %v6223_v41 = vpack.c.bf16 %v312_v21, %v308_v38 }
 0x164   :  { %v6225_v29 = vpack.c.bf16 %v407_v19, %v403_v37  ;;  %v6227_v30 = vpack.c.bf16 %v314_v23, %v310_v32 }
 0x165   :  { %8027 = vst [vmem:[#allocation51_spill] sm:$0xff] %v6221_v18  ;;  %8028 = vst [vmem:[#allocation52_spill] sm:$0xff] %v6223_v41 }
 0x166   :  { %8029 = vst [vmem:[#allocation53_spill] sm:$0xff] %v6225_v29  ;;  %8030 = vst [vmem:[#allocation54_spill] sm:$0xff] %v6227_v30  ;;  %v410_v17 = vpop.f32.mrb[16].mxu1  ;;  %v317_v24 = vpop.f32.mrb[16].mxu0 }
 0x167   :  { %v411_v16 = vadd.f32 %v410_v17, %v6191_v20  ;;  %v412_v31 = vpop.f32.mrb[17].mxu1  ;;  %v318_v27 = vadd.f32 %v317_v24, %v6149_v34  ;;  %v319_v15 = vpop.f32.mrb[17].mxu0 }
 0x168   :  { %v413_v8 = vadd.f32 %v412_v31, %v6195_v26  ;;  %v414_v14 = vpop.f32.mrb[18].mxu1  ;;  %v320_v22 = vadd.f32 %v319_v15, %v6153_v36  ;;  %v321_v33 = vpop.f32.mrb[18].mxu0 }
 0x169   :  { %v415_v38 = vadd.f32 %v414_v14, %v6191_v20  ;;  %v416_v37 = vpop.f32.mrb[19].mxu1  ;;  %v322_v32 = vadd.f32 %v321_v33, %v6149_v34  ;;  %v323_v21 = vpop.f32.mrb[19].mxu0 }
 0x16a   :  { %v417_v28 = vadd.f32 %v416_v37, %v6195_v26  ;;  %v324_v19 = vadd.f32 %v323_v21, %v6153_v36 }
 0x16b   :  { %v6237_v23 = vpack.c.bf16 %v415_v38, %v411_v16  ;;  %v6239_v24 = vpack.c.bf16 %v322_v32, %v318_v27 }
 0x16c   :  { %v6241_v17 = vpack.c.bf16 %v417_v28, %v413_v8  ;;  %v6243_v31 = vpack.c.bf16 %v324_v19, %v320_v22 }
 0x16d   :  { %8031 = vst [vmem:[#allocation55_spill] sm:$0xff] %v6237_v23  ;;  %8032 = vst [vmem:[#allocation56_spill] sm:$0xff] %v6239_v24  ;;  %v880_v24 = vunpack.c.l.bf16 %v6169_v35  ;;  %v6385_v23 = vld [vmem:[#allocation8 + $0xe0] ss:$16 sps:$4 sm:$0xff]  }
 0x16e   :  { %8033 = vst [vmem:[#allocation57_spill] sm:$0xff] %v6241_v17  ;;  %8034 = vst [vmem:[#allocation58_spill] sm:$0xff] %v6243_v31  ;;  %v420_v15 = vpop.f32.mrb[20].mxu1  ;;  %v327_v30 = vpop.f32.mrb[20].mxu0 }
 0x16f   :  { %v421_v14 = vadd.f32 %v420_v15, %v6191_v20  ;;  %v422_v41 = vpop.f32.mrb[21].mxu1  ;;  %v328_v33 = vadd.f32 %v327_v30, %v6149_v34  ;;  %v329_v29 = vpop.f32.mrb[21].mxu0 }
 0x170   :  { %v423_v37 = vadd.f32 %v422_v41, %v6195_v26  ;;  %v424_v18 = vpop.f32.mrb[22].mxu1  ;;  %v330_v16 = vadd.f32 %v329_v29, %v6153_v36  ;;  %v331_v38 = vpop.f32.mrb[22].mxu0  ;;  %v879_v29 = vunpack.c.l.bf16 %v6165_v9 }
 0x171   :  { %v425_v27 = vadd.f32 %v424_v18, %v6191_v20  ;;  %v426_v8 = vpop.f32.mrb[23].mxu1  ;;  %v332_v22 = vadd.f32 %v331_v38, %v6149_v34  ;;  %v333_v32 = vpop.f32.mrb[23].mxu0 }
 0x172   :  { %v427_v21 = vadd.f32 %v426_v8, %v6195_v26  ;;  %v334_v28 = vadd.f32 %v333_v32, %v6153_v36  ;;  %v883_v36 = vunpack.c.h.bf16 %v6165_v9 }
 0x173   :  { %v6253_v19 = vpack.c.bf16 %v425_v27, %v421_v14  ;;  %v6255_v30 = vpack.c.bf16 %v332_v22, %v328_v33 }
 0x174   :  { %v6257_v15 = vpack.c.bf16 %v427_v21, %v423_v37  ;;  %v6259_v41 = vpack.c.bf16 %v334_v28, %v330_v16  ;;  %v884_v16 = vunpack.c.h.bf16 %v6169_v35 }
 0x175   :  { %8035 = vst [vmem:[#allocation59_spill] sm:$0xff] %v6253_v19  ;;  %8036 = vst [vmem:[#allocation60_spill] sm:$0xff] %v6255_v30  ;;  %v6381_v19 = vld [vmem:[#allocation8 + $0xe4] ss:$16 sps:$4 sm:$0xff]  }
 0x176   :  { %8037 = vst [vmem:[#allocation61_spill] sm:$0xff] %v6257_v15  ;;  %8038 = vst [vmem:[#allocation62_spill] sm:$0xff] %v6259_v41  ;;  %v430_v31 = vpop.f32.mrb[24].mxu1  ;;  %v827_v18 = vpop.f32.mrb[24].mxu0 }
 0x177   :  { %v431_v34 = vadd.f32 %v430_v31, %v6191_v20  ;;  %v887_v38 = vadd.f32 %v879_v29, %v827_v18  ;;  %v432_v8 = vpop.f32.mrb[25].mxu1  ;;  %v829_v17 = vpop.f32.mrb[25].mxu0 }
 0x178   :  { %v433_v14 = vadd.f32 %v432_v8, %v6195_v26  ;;  %v888_v33 = vadd.f32 %v880_v24, %v829_v17  ;;  %v434_v37 = vpop.f32.mrb[26].mxu1  ;;  %v831_v27 = vpop.f32.mrb[26].mxu0 }
 0x179   :  { %v435_v22 = vadd.f32 %v434_v37, %v6191_v20  ;;  %v891_v32 = vadd.f32 %v883_v36, %v831_v27  ;;  %v436_v21 = vpop.f32.mrb[27].mxu1  ;;  %v833_v28 = vpop.f32.mrb[27].mxu0  ;;  %v4404_v35 = vmul.f32 -1.442695, %v887_v38 }
 0x17a   :  { %v437_v41 = vadd.f32 %v436_v21, %v6195_v26  ;;  %v892_v31 = vadd.f32 %v884_v16, %v833_v28  ;;  %v4406_v27 = vmul.f32 -1.442695, %v888_v33 }
 0x17b   :  { %v6269_v29 = vpack.c.bf16 %v435_v22, %v431_v34  ;;  %4850 = vpow2.f32 %v4404_v35 }
 0x17c   :  { %v6271_v18 = vpack.c.bf16 %v437_v41, %v433_v14  ;;  %v4407_v21 = vmul.f32 -1.442695, %v892_v31  ;;  %v4405_v41 = vmul.f32 -1.442695, %v891_v32  ;;  %4852 = vpow2.f32 %v4406_v27 }
 0x17d   :  { %8039 = vst [vmem:[#allocation63_spill] sm:$0xff] %v6269_v29  ;;  %v6377_v29 = vld [vmem:[#allocation8 + $0xc0] ss:$16 sps:$4 sm:$0xff]  }
 0x17e   :  { %8040 = vst [vmem:[#allocation64_spill] sm:$0xff] %v6271_v18  ;;  %v440_v9 = vpop.f32.mrb[28].mxu1  ;;  %4854 = vpow2.f32 %v4407_v21  ;;  %v6373_v18 = vld [vmem:[#allocation8 + $0xc4] ss:$16 sps:$4 sm:$0xff]  }
 0x17f   :  { %v441_v8 = vadd.f32 %v440_v9, %v6191_v20  ;;  %v442_v24 = vpop.f32.mrb[29].mxu1  ;;  %4856 = vpow2.f32 %v4405_v41 }
 0x180   :  { %v443_v17 = vadd.f32 %v442_v24, %v6195_v26  ;;  %v444_v30 = vpop.f32.mrb[30].mxu1 }
 0x181   :  { %v445_v37 = vadd.f32 %v444_v30, %v6191_v20  ;;  %v446_v36 = vpop.f32.mrb[31].mxu1 }
 0x182   :  { %v447_v15 = vadd.f32 %v446_v36, %v6195_v26 }
 0x183   :  { %v6277_v16 = vpack.c.bf16 %v445_v37, %v441_v8 }
 0x184   :  { %v6279_v34 = vpack.c.bf16 %v447_v15, %v443_v17 }
 0x185   :  { %8041 = vst [vmem:[#allocation65_spill] sm:$0xff] %v6277_v16  ;;  %v4851_v24 = vpop.eup %4850  ;;  %v6369_v16 = vld [vmem:[#allocation8 + $0xa0] ss:$16 sps:$4 sm:$0xff]  }
 0x186   :  { %8042 = vst [vmem:[#allocation66_spill] sm:$0xff] %v6279_v34  ;;  %v450_v14 = vpop.f32.mrb[32].mxu1  ;;  %v4853_v37 = vpop.eup %4852  ;;  %v6366_v34 = vld [vmem:[#allocation8 + $0xac] ss:$16 sps:$4 sm:$0xff]  }
 0x187   :  { %v451_v22 = vadd.f32 %v450_v14, %v6191_v20  ;;  %v452_v28 = vpop.f32.mrb[33].mxu1 }
 0x188   :  { %v453_v38 = vadd.f32 %v452_v28, %v6195_v26  ;;  %v454_v30 = vpop.f32.mrb[34].mxu1  ;;  %v4855_v21 = vpop.eup %4854  ;;  %v901_v28 = vadd.f32 1.0, %v4851_v24  ;;  %v885_v24 = vunpack.c.h.bf16 %v6205_v25 }
 0x189   :  { %v455_v33 = vadd.f32 %v454_v30, %v6191_v20  ;;  %v456_v9 = vpop.f32.mrb[35].mxu1 }
 0x18a   :  { %v457_v31 = vadd.f32 %v456_v9, %v6195_v26  ;;  %v914_v9 = vadd.f32 1.0, %v4855_v21  ;;  %4858 = vrcp.f32 %v901_v28 }
 0x18b   :  { %v6285_v8 = vpack.c.bf16 %v455_v33, %v451_v22  ;;  %v4857_v22 = vpop.eup %4856  ;;  %v913_v33 = vadd.f32 1.0, %v4853_v37 }
 0x18c   :  { %v6287_v15 = vpack.c.bf16 %v457_v31, %v453_v38 }
 0x18d   :  { %8043 = vst [vmem:[#allocation67_spill] sm:$0xff] %v6285_v8  ;;  %v882_v8 = vunpack.c.l.bf16 %v6209_v0  ;;  %4860 = vrcp.f32 %v913_v33 }
 0x18e   :  { %8044 = vst [vmem:[#allocation68_spill] sm:$0xff] %v6287_v15  ;;  %v460_v32 = vpop.f32.mrb[36].mxu1  ;;  %v902_v15 = vadd.f32 1.0, %v4857_v22  ;;  %4862 = vrcp.f32 %v914_v9 }
 0x18f   :  { %v461_v17 = vadd.f32 %v460_v32, %v6191_v20  ;;  %v462_v35 = vpop.f32.mrb[37].mxu1  ;;  %v881_v32 = vunpack.c.l.bf16 %v6205_v25 }
 0x190   :  { %v463_v36 = vadd.f32 %v462_v35, %v6195_v26  ;;  %v464_v27 = vpop.f32.mrb[38].mxu1 }
 0x191   :  { %v465_v41 = vadd.f32 %v464_v27, %v6191_v20  ;;  %v466_v14 = vpop.f32.mrb[39].mxu1 }
 0x192   :  { %v467_v30 = vadd.f32 %v466_v14, %v6195_v26 }
 0x193   :  { %v6293_v38 = vpack.c.bf16 %v465_v41, %v461_v17  ;;  %v886_v17 = vunpack.c.h.bf16 %v6209_v0 }
 0x194   :  { %v6295_v31 = vpack.c.bf16 %v467_v30, %v463_v36  ;;  %v4859_v30 = vpop.eup %4858 }
 0x195   :  { %8045 = vst [vmem:[#allocation69_spill] sm:$0xff] %v6293_v38  ;;  %v6363_v38 = vld [vmem:[#allocation8 + $0xa4] ss:$16 sps:$4 sm:$0xff]  }
 0x196   :  { %8046 = vst [vmem:[#allocation70_spill] sm:$0xff] %v6295_v31  ;;  %v870_v35 = vpop.f32.mrb[40].mxu1  ;;  %v6360_v31 = vld [vmem:[#allocation8 + $0x88] ss:$16 sps:$4 sm:$0xff]  }
 0x197   :  { %v889_v20 = vadd.f32 %v881_v32, %v870_v35  ;;  %v872_v27 = vpop.f32.mrb[41].mxu1  ;;  %v4861_v22 = vpop.eup %4860 }
 0x198   :  { %v890_v26 = vadd.f32 %v882_v8, %v872_v27  ;;  %v874_v37 = vpop.f32.mrb[42].mxu1  ;;  %v4863_v33 = vpop.eup %4862  ;;  %v933_v9 = vmul.f32 0.0, %v4861_v22 }
 0x199   :  { %4864 = vtanh.f32 %v889_v20  ;;  %v893_v36 = vadd.f32 %v885_v24, %v874_v37  ;;  %v876_v21 = vpop.f32.mrb[43].mxu1  ;;  %v934_v0 = vmul.f32 0.0, %v4863_v33  ;;  %v6307_v33 = vld [vmem:[#allocation8] ss:$16 sps:$4 sm:$0xff]  }
 0x19a   :  { %4866 = vrcp.f32 %v902_v15  ;;  %v4408_v41 = vmul.f32 -1.442695, %v890_v26  ;;  %v894_v14 = vadd.f32 %v886_v17, %v876_v21 }
 0x19b   :  { %4868 = vtanh.f32 %v893_v36 }
 0x19c   :  { %4870 = vpow2.f32 %v4408_v41  ;;  %v4409_v28 = vmul.f32 -1.442695, %v894_v14 }
 0x19e   :  { %4872 = vpow2.f32 %v4409_v28 }
 0x1a3   :  { %v4865_v32 = vpop.eup %4864 }
 0x1a4   :  { %v4867_v25 = vpop.eup %4866  ;;  %v935_v8 = vmul.f32 %v4865_v32, %v4859_v30  ;;  %v6310_v32 = vld [vmem:[#allocation8 + $0x8] ss:$16 sps:$4 sm:$0xff]  }
 0x1a5   :  { %v4869_v35 = vpop.eup %4868 }
 0x1a6   :  { %v4871_v27 = vpop.eup %4870  ;;  %v6301_v20 = vadd.f32 %v935_v8, %v933_v9  ;;  %v936_v24 = vmul.f32 %v4869_v35, %v4867_v25  ;;  %v6313_v25 = vld [vmem:[#allocation8 + $0x24] ss:$16 sps:$4 sm:$0xff]   ;;  %v6316_v9 = vld [vmem:[#allocation8 + $0x2c] ss:$16 sps:$4 sm:$0xff]   ;;  %v8047_v8 = vmov 0  }
 0x1a7   :  { %v927_v15 = vadd.f32 1.0, %v4871_v27  ;;  %v6321_v35 = vld [vmem:[#allocation8 + $0x20] ss:$16 sps:$4 sm:$0xff]   ;;  %v6324_v27 = vld [vmem:[#allocation8 + $0x28] ss:$16 sps:$4 sm:$0xff]  }
 0x1a8   :  { %v4873_v26 = vpop.eup %4872  ;;  %4874 = vtanh.f32 %v6301_v20  ;;  %v6304_v37 = vadd.f32 %v936_v24, %v934_v0  ;;  %v6327_v0 = vld [vmem:[#allocation8 + $0x44] ss:$16 sps:$4 sm:$0xff]   ;;  %v6330_v24 = vld [vmem:[#allocation8 + $0x4c] ss:$16 sps:$4 sm:$0xff]  }
 0x1a9   :  { %4876 = vrcp.f32 %v927_v15  ;;  %v928_v17 = vadd.f32 1.0, %v4873_v26  ;;  %v6333_v15 = vld [vmem:[#allocation8 + $0x40] ss:$16 sps:$4 sm:$0xff]   ;;  %v6336_v26 = vld [vmem:[#allocation8 + $0x48] ss:$16 sps:$4 sm:$0xff]  }
 0x1aa   :  { %4878 = vtanh.f32 %v6304_v37 }
 0x1ab   :  { %4880 = vrcp.f32 %v928_v17  ;;  %v6339_v17 = vld [vmem:[#allocation8 + $0x64] ss:$16 sps:$4 sm:$0xff]  }
 0x1b2   :  { %v4875_v36 = vpop.eup %4874 }
 0x1b3   :  { %v4877_v21 = vpop.eup %4876 }
 0x1b4   :  { %v4879_v41 = vpop.eup %4878  ;;  %v941_v28 = vmul.f32 %v4877_v21, %v4875_v36  ;;  %v6342_v36 = vld [vmem:[#allocation8 + $0x6c] ss:$16 sps:$4 sm:$0xff]   ;;  %v6345_v21 = vld [vmem:[#allocation8 + $0x60] ss:$16 sps:$4 sm:$0xff]  }
 0x1b5   :  { %v4881_v14 = vpop.eup %4880 }
 0x1b6   :  { %v942_v30 = vmul.f32 %v4881_v14, %v4879_v41  ;;  %v6348_v41 = vld [vmem:[#allocation8 + $0x68] ss:$16 sps:$4 sm:$0xff]   ;;  %v6351_v14 = vld [vmem:[#allocation8 + $0x84] ss:$16 sps:$4 sm:$0xff]  }
 0x1b8   :  { %v943_v22 = vpack.c.bf16 %v942_v30, %v941_v28  ;;  %v6354_v28 = vld [vmem:[#allocation8 + $0x8c] ss:$16 sps:$4 sm:$0xff]   ;;  %v6357_v30 = vld [vmem:[#allocation8 + $0x80] ss:$16 sps:$4 sm:$0xff]  }
 0x1ba   :  { %1383 = vmatmul.mubr.bf16.vlgmr.msra.gmra.mrb[28].mxu0 %v943_v22  ;;  %1426 = vmatmul.mubr.bf16.vlgmr.msra.gmra.mrb[44].mxu1 %v943_v22 }
 0x1bb   :  { %1520 = vmatpush1.bf16.msra.mxu0 %v6307_v33  ;;  %1563 = vmatpush1.bf16.msra.mxu1 %v6310_v32 }
 0x1bc   :  { %1521 = vmatprep.subr.bf16.mxu0 %v6313_v25  ;;  %1564 = vmatprep.subr.bf16.mxu1 %v6316_v9 }
 0x1bd   :  { %1551 = vmatprep.mubr.bf16.mxu0 %v8047_v8  ;;  %1594 = vmatprep.mubr.bf16.mxu1 %v8047_v8 }
 0x1bf   :  { %1522 = vmatpush1.bf16.msra.mxu0 %v6321_v35  ;;  %1565 = vmatpush1.bf16.msra.mxu1 %v6324_v27 }
 0x1c0   :  { %1523 = vmatprep.subr.bf16.mxu0 %v6327_v0  ;;  %1566 = vmatprep.subr.bf16.mxu1 %v6330_v24 }
 0x1c3   :  { %1524 = vmatpush1.bf16.msra.mxu0 %v6333_v15  ;;  %1567 = vmatpush1.bf16.msra.mxu1 %v6336_v26 }
 0x1c4   :  { %1525 = vmatprep.subr.bf16.mxu0 %v6339_v17  ;;  %1568 = vmatprep.subr.bf16.mxu1 %v6342_v36 }
 0x1c7   :  { %1526 = vmatpush1.bf16.msra.mxu0 %v6345_v21  ;;  %1569 = vmatpush1.bf16.msra.mxu1 %v6348_v41 }
 0x1c8   :  { %1527 = vmatprep.subr.bf16.mxu0 %v6351_v14  ;;  %1570 = vmatprep.subr.bf16.mxu1 %v6354_v28 }
 0x1cb   :  { %1528 = vmatpush1.bf16.msra.mxu0 %v6357_v30  ;;  %1571 = vmatpush1.bf16.msra.mxu1 %v6360_v31 }
 0x1cc   :  { %1529 = vmatprep.subr.bf16.mxu0 %v6363_v38  ;;  %1572 = vmatprep.subr.bf16.mxu1 %v6366_v34 }
 0x1cf   :  { %1530 = vmatpush1.bf16.msra.mxu0 %v6369_v16  ;;  %1573 = vmatpush1.bf16.msra.mxu1 %v5943_v39  ;;  %v8048_v39 = vld [vmem:[#allocation20_spill] sm:$0xff] }
 0x1d0   :  { %1531 = vmatprep.subr.bf16.mxu0 %v6373_v18  ;;  %1574 = vmatprep.subr.bf16.mxu1 %v5947_v40  ;;  %v8049_v40 = vld [vmem:[#allocation21_spill] sm:$0xff] }
 0x1d3   :  { %1532 = vmatpush1.bf16.msra.mxu0 %v6377_v29  ;;  %1575 = vmatpush1.bf16.msra.mxu1 %v5949_v42  ;;  %v8050_v42 = vld [vmem:[#allocation22_spill] sm:$0xff] }
 0x1d4   :  { %1533 = vmatprep.subr.bf16.mxu0 %v6381_v19  ;;  %1576 = vmatprep.subr.bf16.mxu1 %v5951_v43  ;;  %v8051_v43 = vld [vmem:[#allocation23_spill] sm:$0xff] }
 0x1d7   :  { %1534 = vmatpush1.bf16.msra.mxu0 %v6385_v23  ;;  %1577 = vmatpush1.bf16.msra.mxu1 %v5957_v44  ;;  %v1436_v44 = vld [vmem:[%s7707_s6] sm:$0xf] }
 0x1d8   :  { %1671 = vmatprep.subr.bf16.mxu0 %v5978_v45  ;;  %1714 = vmatprep.subr.bf16.mxu1 %v5980_v46  ;;  %v8052_v45 = vld [vmem:[#allocation42_spill] sm:$0xff] }
 0x1d9   :  { %v8053_v46 = vsub.s32 0, %v8052_v45 }
 0x1da   :  { %1552 = vmatmul.mubr.bf16.vlgmr.msra.gmra.mrb[32].mxu0 %v943_v22  ;;  %1595 = vmatmul.mubr.bf16.vlgmr.msra.gmra.mrb[48].mxu1 %v943_v22 }
 0x1db   :  { %1672 = vmatpush1.bf16.msra.mxu0 %v5982_v47  ;;  %1715 = vmatpush1.bf16.msra.mxu1 %v5984_v48  ;;  %v6430_v47 = vrot.slane %v1436_v44, %v8053_v46  ;;  %v8055_v48 = vsub.s32 1, %v8052_v45 }
 0x1dc   :  { %1673 = vmatprep.subr.bf16.mxu0 %v5990_v49  ;;  %1716 = vmatprep.subr.bf16.mxu1 %v5992_v50 }
 0x1dd   :  { %1703 = vmatprep.mubr.bf16.mxu0 %v8047_v8  ;;  %1746 = vmatprep.mubr.bf16.mxu1 %v8047_v8  ;;  %8054 = vst [vmem:[#allocation20_spill] sm:$0xff] %v6430_v47  ;;  %v6434_v49 = vrot.slane %v1436_v44, %v8055_v48 }
 0x1df   :  { %1674 = vmatpush1.bf16.msra.mxu0 %v5994_v51  ;;  %1717 = vmatpush1.bf16.msra.mxu1 %v5996_v52  ;;  %8056 = vst [vmem:[#allocation21_spill] sm:$0xff] %v6434_v49 }
 0x1e0   :  { %1675 = vmatprep.subr.bf16.mxu0 %v6002_v53  ;;  %1718 = vmatprep.subr.bf16.mxu1 %v6004_v54 }
 0x1e3   :  { %1676 = vmatpush1.bf16.msra.mxu0 %v6006_v55  ;;  %1719 = vmatpush1.bf16.msra.mxu1 %v6008_v56 }
 0x1e4   :  { %1677 = vmatprep.subr.bf16.mxu0 %v6014_v57  ;;  %1720 = vmatprep.subr.bf16.mxu1 %v6016_v58 }
 0x1e7   :  { %1678 = vmatpush1.bf16.msra.mxu0 %v6018_v59  ;;  %1721 = vmatpush1.bf16.msra.mxu1 %v6020_v60 }
 0x1e8   :  { %1679 = vmatprep.subr.bf16.mxu0 %v6026_v61  ;;  %1722 = vmatprep.subr.bf16.mxu1 %v6028_v62 }
 0x1eb   :  { %1680 = vmatpush1.bf16.msra.mxu0 %v6030_v63  ;;  %1723 = vmatpush1.bf16.msra.mxu1 %v6032_v1  ;;  %v8057_v63 = vsub.s32 3, %v8052_v45 }
 0x1ec   :  { %1681 = vmatprep.subr.bf16.mxu0 %v6038_v2  ;;  %1724 = vmatprep.subr.bf16.mxu1 %v6040_v3 }
 0x1ed   :  { %v6441_v1 = vrot.slane %v1436_v44, %v8057_v63  ;;  %v8062_v63 = vld [vmem:[#allocation51_spill] sm:$0xff] }
 0x1ef   :  { %1682 = vmatpush1.bf16.msra.mxu0 %v6042_v4  ;;  %1725 = vmatpush1.bf16.msra.mxu1 %v6044_v5  ;;  %8058 = vst [vmem:[#allocation22_spill] sm:$0xff] %v6441_v1  ;;  %v8059_v5 = vsub.s32 2, %v8052_v45 }
 0x1f0   :  { %1683 = vmatprep.subr.bf16.mxu0 %v6050_v6  ;;  %1726 = vmatprep.subr.bf16.mxu1 %v6052_v7 }
 0x1f1   :  { %v6446_v6 = vrot.slane %v1436_v44, %v8059_v5 }
 0x1f3   :  { %1684 = vmatpush1.bf16.msra.mxu0 %v6054_v10  ;;  %1727 = vmatpush1.bf16.msra.mxu1 %v6056_v11  ;;  %8060 = vst [vmem:[#allocation23_spill] sm:$0xff] %v6446_v6 }
 0x1f4   :  { %1685 = vmatprep.subr.bf16.mxu0 %v6062_v12  ;;  %1728 = vmatprep.subr.bf16.mxu1 %v6064_v13 }
 0x1f7   :  { %1686 = vmatpush1.bf16.msra.mxu0 %v8048_v39  ;;  %1729 = vmatpush1.bf16.msra.mxu1 %v8049_v40 }
 0x1f8   :  { %1757 = vmatprep.subr.bf16.mxu0 %v8050_v42  ;;  %1800 = vmatprep.subr.bf16.mxu1 %v8051_v43 }
 0x28d   :  { %v1384_v50 = vpop.f32.mrb[28].mxu0  ;;  %v1427_v51 = vpop.f32.mrb[44].mxu1 }
 0x28e   :  { %v1458_v52 = vadd.f32 %v6430_v47, %v1384_v50  ;;  %v1386_v53 = vpop.f32.mrb[29].mxu0  ;;  %v1429_v54 = vpop.f32.mrb[45].mxu1  ;;  %v1460_v11 = vadd.f32 %v6446_v6, %v1427_v51 }
 0x28f   :  { %v1459_v55 = vadd.f32 %v6434_v49, %v1386_v53  ;;  %v1388_v56 = vpop.f32.mrb[30].mxu0  ;;  %v1431_v57 = vpop.f32.mrb[46].mxu1  ;;  %v1461_v7 = vadd.f32 %v6441_v1, %v1429_v54 }
 0x290   :  { %v4474_v58 = vmul.f32 -1.442695, %v1458_v52  ;;  %v1462_v59 = vadd.f32 %v6430_v47, %v1388_v56  ;;  %v1390_v60 = vpop.f32.mrb[31].mxu0  ;;  %v1433_v61 = vpop.f32.mrb[47].mxu1  ;;  %v1464_v42 = vadd.f32 %v6446_v6, %v1431_v57 }
 0x291   :  { %v4476_v62 = vmul.f32 -1.442695, %v1459_v55  ;;  %v1463_v2 = vadd.f32 %v6434_v49, %v1390_v60  ;;  %v1465_v10 = vadd.f32 %v6441_v1, %v1433_v61  ;;  %v4478_v12 = vmul.f32 -1.442695, %v1461_v7 }
 0x292   :  { %4882 = vpow2.f32 %v4474_v58  ;;  %v4475_v3 = vmul.f32 -1.442695, %v1462_v59  ;;  %v8061_v59 = vld [vmem:[#allocation46_spill] sm:$0xff] }
 0x293   :  { %4884 = vpow2.f32 %v4476_v62  ;;  %v4477_v4 = vmul.f32 -1.442695, %v1463_v2  ;;  %v4479_v13 = vmul.f32 -1.442695, %v1465_v10  ;;  %v1605_v60 = vunpack.c.l.bf16 %v8061_v59 }
 0x294   :  { %4886 = vpow2.f32 %v4475_v3  ;;  %v1607_v2 = vunpack.c.l.bf16 %v8062_v63  ;;  %v8063_v3 = vld [vmem:[#allocation48_spill] sm:$0xff]  ;;  %v1609_v5 = vunpack.c.h.bf16 %v8061_v59 }
 0x295   :  { %4888 = vpow2.f32 %v4477_v4  ;;  %v1606_v4 = vunpack.c.l.bf16 %v8063_v3 }
 0x296   :  { %4890 = vtanh.f32 %v1460_v11 }
 0x297   :  { %4892 = vpow2.f32 %v4478_v12 }
 0x298   :  { %4894 = vpow2.f32 %v4479_v13  ;;  %v8064_v13 = vld [vmem:[#allocation53_spill] sm:$0xff] }
 0x29c   :  { %v4883_v22 = vpop.eup %4882 }
 0x29d   :  { %v4885_v39 = vpop.eup %4884  ;;  %v1472_v40 = vadd.f32 1.0, %v4883_v22  ;;  %v1608_v22 = vunpack.c.l.bf16 %v8064_v13 }
 0x29e   :  { %v1484_v43 = vadd.f32 1.0, %v4885_v39  ;;  %v4887_v44 = vpop.eup %4886  ;;  %v1610_v39 = vunpack.c.h.bf16 %v8063_v3 }
 0x29f   :  { %4896 = vrcp.f32 %v1472_v40  ;;  %v1473_v45 = vadd.f32 1.0, %v4887_v44  ;;  %v4889_v46 = vpop.eup %4888 }
 0x2a0   :  { %4898 = vrcp.f32 %v1484_v43  ;;  %v1485_v48 = vadd.f32 1.0, %v4889_v46  ;;  %v4891_v50 = vpop.eup %4890  ;;  %v1611_v46 = vunpack.c.h.bf16 %v8062_v63 }
 0x2a1   :  { %4900 = vtanh.f32 %v1464_v42  ;;  %v4893_v51 = vpop.eup %4892 }
 0x2a2   :  { %4902 = vrcp.f32 %v1473_v45  ;;  %v4895_v52 = vpop.eup %4894  ;;  %v1498_v57 = vadd.f32 1.0, %v4893_v51 }
 0x2a3   :  { %4904 = vrcp.f32 %v1485_v48  ;;  %v1499_v62 = vadd.f32 1.0, %v4895_v52  ;;  %v1612_v48 = vunpack.c.h.bf16 %v8064_v13 }
 0x2a4   :  { %4906 = vrcp.f32 %v1498_v57 }
 0x2a5   :  { %4908 = vrcp.f32 %v1499_v62 }
 0x2a9   :  { %v4897_v53 = vpop.eup %4896 }
 0x2aa   :  { %v4899_v54 = vpop.eup %4898  ;;  %v1506_v55 = vmul.f32 %v4897_v53, %v4891_v50 }
 0x2ab   :  { %v4901_v56 = vpop.eup %4900  ;;  %v1504_v58 = vmul.f32 0.0, %v4899_v54 }
 0x2ac   :  { %v4903_v61 = vpop.eup %4902 }
 0x2ad   :  { %v6456_v7 = vadd.f32 %v1506_v55, %v1504_v58  ;;  %v1507_v10 = vmul.f32 %v4903_v61, %v4901_v56  ;;  %v1553_v11 = vpop.f32.mrb[32].mxu0  ;;  %v1596_v12 = vpop.f32.mrb[48].mxu1 }
 0x2ae   :  { %v4905_v40 = vpop.eup %4904  ;;  %v1613_v42 = vadd.f32 %v1605_v60, %v1553_v11  ;;  %v1615_v43 = vadd.f32 %v1607_v2, %v1596_v12  ;;  %v1555_v44 = vpop.f32.mrb[33].mxu0 }
 0x2af   :  { %v1598_v45 = vpop.f32.mrb[49].mxu1  ;;  %v1505_v50 = vmul.f32 0.0, %v4905_v40  ;;  %v1614_v51 = vadd.f32 %v1606_v4, %v1555_v44  ;;  %v1557_v53 = vpop.f32.mrb[34].mxu0  ;;  %4910 = vtanh.f32 %v6456_v7 }
 0x2b0   :  { %v1616_v52 = vadd.f32 %v1608_v22, %v1598_v45  ;;  %v1600_v54 = vpop.f32.mrb[50].mxu1  ;;  %v4480_v55 = vmul.f32 -1.442695, %v1613_v42  ;;  %v1617_v56 = vadd.f32 %v1609_v5, %v1557_v53  ;;  %v1559_v59 = vpop.f32.mrb[35].mxu0  ;;  %v6466_v53 = vld [vmem:[#allocation9] ss:$16 sps:$4 sm:$0xff]  }
 0x2b1   :  { %v1619_v58 = vadd.f32 %v1611_v46, %v1600_v54  ;;  %v1602_v61 = vpop.f32.mrb[51].mxu1  ;;  %v6463_v60 = vadd.f32 %v1507_v10, %v1505_v50  ;;  %v4482_v2 = vmul.f32 -1.442695, %v1614_v51  ;;  %v1618_v63 = vadd.f32 %v1610_v39, %v1559_v59  ;;  %v4907_v62 = vpop.eup %4906  ;;  %v8065_v54 = vld [vmem:[#allocation24_spill] sm:$0xff]  ;;  %v8068_v59 = vld [vmem:[#allocation27_spill] sm:$0xff] }
 0x2b2   :  { %4912 = vpow2.f32 %v4480_v55  ;;  %v4481_v3 = vmul.f32 -1.442695, %v1617_v56  ;;  %v1620_v57 = vadd.f32 %v1612_v48, %v1602_v61  ;;  %v4909_v5 = vpop.eup %4908  ;;  %v4484_v11 = vmul.f32 -1.442695, %v1616_v52  ;;  %v8066_v55 = vld [vmem:[#allocation25_spill] sm:$0xff] }
 0x2b3   :  { %4914 = vtanh.f32 %v6463_v60  ;;  %v4483_v4 = vmul.f32 -1.442695, %v1618_v63  ;;  %v8070_v63 = vld [vmem:[#allocation29_spill] sm:$0xff] }
 0x2b4   :  { %4916 = vpow2.f32 %v4482_v2  ;;  %v4485_v39 = vmul.f32 -1.442695, %v1620_v57  ;;  %v8069_v2 = vld [vmem:[#allocation28_spill] sm:$0xff] }
 0x2b5   :  { %4918 = vpow2.f32 %v4481_v3 }
 0x2b6   :  { %4920 = vpow2.f32 %v4483_v4 }
 0x2b7   :  { %4922 = vtanh.f32 %v1615_v43  ;;  %v6469_v43 = vld [vmem:[#allocation9 + $0x8] ss:$16 sps:$4 sm:$0xff]  }
 0x2b8   :  { %4924 = vpow2.f32 %v4484_v11  ;;  %v8072_v11 = vld [vmem:[#allocation31_spill] sm:$0xff] }
 0x2b9   :  { %v4911_v12 = vpop.eup %4910 }
 0x2ba   :  { %v1512_v42 = vmul.f32 %v4911_v12, %v4907_v62 }
 0x2bc   :  { %v4913_v13 = vpop.eup %4912 }
 0x2bd   :  { %v4915_v22 = vpop.eup %4914  ;;  %v1627_v40 = vadd.f32 1.0, %v4913_v13 }
 0x2be   :  { %v4917_v10 = vpop.eup %4916  ;;  %v1513_v44 = vmul.f32 %v4915_v22, %v4909_v5  ;;  %v8071_v5 = vld [vmem:[#allocation30_spill] sm:$0xff]  ;;  %v8073_v22 = vld [vmem:[#allocation32_spill] sm:$0xff] }
 0x2bf   :  { %4926 = vrcp.f32 %v1627_v40  ;;  %v1639_v45 = vadd.f32 1.0, %v4917_v10  ;;  %v4919_v46 = vpop.eup %4918  ;;  %v8074_v40 = vld [vmem:[#allocation33_spill] sm:$0xff] }
 0x2c0   :  { %4928 = vtanh.f32 %v1619_v58  ;;  %v1670_v48 = vpack.c.bf16 %v1513_v44, %v1512_v42  ;;  %v1628_v50 = vadd.f32 1.0, %v4919_v46  ;;  %v4921_v51 = vpop.eup %4920  ;;  %v8067_v58 = vld [vmem:[#allocation26_spill] sm:$0xff] }
 0x2c1   :  { %4930 = vrcp.f32 %v1639_v45  ;;  %v1640_v52 = vadd.f32 1.0, %v4921_v51  ;;  %v4923_v56 = vpop.eup %4922  ;;  %v8075_v51 = vld [vmem:[#allocation34_spill] sm:$0xff] }
 0x2c2   :  { %4932 = vpow2.f32 %v4485_v39  ;;  %1704 = vmatmul.mubr.bf16.vlgmr.msra.gmra.mrb[36].mxu0 %v1670_v48  ;;  %1747 = vmatmul.mubr.bf16.vlgmr.msra.gmra.mrb[52].mxu1 %v1670_v48  ;;  %v4925_v61 = vpop.eup %4924  ;;  %v6487_v48 = vld [vmem:[#allocation9 + $0x60] ss:$16 sps:$4 sm:$0xff]  }
 0x2c3   :  { %4934 = vrcp.f32 %v1628_v50  ;;  %1758 = vmatpush1.bf16.msra.mxu0 %v6466_v53  ;;  %1801 = vmatpush1.bf16.msra.mxu1 %v6469_v43  ;;  %v1653_v39 = vadd.f32 1.0, %v4925_v61  ;;  %v6490_v50 = vld [vmem:[#allocation9 + $0x68] ss:$16 sps:$4 sm:$0xff]  }
 0x2c4   :  { %1759 = vmatprep.subr.bf16.mxu0 %v8065_v54  ;;  %1802 = vmatprep.subr.bf16.mxu1 %v8066_v55  ;;  %4936 = vrcp.f32 %v1640_v52  ;;  %v8076_v52 = vld [vmem:[#allocation35_spill] sm:$0xff]  ;;  %v6499_v55 = vld [vmem:[#allocation9 + $0x80] ss:$16 sps:$4 sm:$0xff]  }
 0x2c5   :  { %1789 = vmatprep.mubr.bf16.mxu0 %v8047_v8  ;;  %1832 = vmatprep.mubr.bf16.mxu1 %v8047_v8  ;;  %4938 = vrcp.f32 %v1653_v39  ;;  %v6515_v61 = vld [vmem:[#allocation9 + $0xa8] ss:$16 sps:$4 sm:$0xff]  }
 0x2c7   :  { %1760 = vmatpush1.bf16.msra.mxu0 %v8067_v58  ;;  %1803 = vmatpush1.bf16.msra.mxu1 %v8068_v59  ;;  %v6509_v58 = vld [vmem:[#allocation9 + $0xac] ss:$16 sps:$4 sm:$0xff]   ;;  %v6512_v59 = vld [vmem:[#allocation9 + $0xa0] ss:$16 sps:$4 sm:$0xff]  }
 0x2c8   :  { %1761 = vmatprep.subr.bf16.mxu0 %v8069_v2  ;;  %1804 = vmatprep.subr.bf16.mxu1 %v8070_v63  ;;  %v6518_v2 = vld [vmem:[#allocation9 + $0xc4] ss:$16 sps:$4 sm:$0xff]   ;;  %v6521_v63 = vld [vmem:[#allocation9 + $0xcc] ss:$16 sps:$4 sm:$0xff]  }
 0x2c9   :  { %v4927_v3 = vpop.eup %4926 }
 0x2ca   :  { %v4929_v57 = vpop.eup %4928  ;;  %v1661_v4 = vmul.f32 %v4927_v3, %v4923_v56  ;;  %v6502_v56 = vld [vmem:[#allocation9 + $0x88] ss:$16 sps:$4 sm:$0xff]  }
 0x2cb   :  { %v4931_v62 = vpop.eup %4930  ;;  %1762 = vmatpush1.bf16.msra.mxu0 %v8071_v5  ;;  %1805 = vmatpush1.bf16.msra.mxu1 %v8072_v11  ;;  %v8079_v5 = vld [vmem:[#allocation38_spill] sm:$0xff]  ;;  %v8080_v11 = vld [vmem:[#allocation39_spill] sm:$0xff] }
 0x2cc   :  { %v4933_v12 = vpop.eup %4932  ;;  %v1659_v13 = vmul.f32 %v4931_v62, %v6301_v20  ;;  %1763 = vmatprep.subr.bf16.mxu0 %v8073_v22  ;;  %1806 = vmatprep.subr.bf16.mxu1 %v8074_v40  ;;  %v8081_v22 = vld [vmem:[#allocation40_spill] sm:$0xff]  ;;  %v8082_v40 = vld [vmem:[#allocation41_spill] sm:$0xff] }
 0x2cd   :  { %v4935_v10 = vpop.eup %4934  ;;  %v1654_v46 = vadd.f32 1.0, %v4933_v12 }
 0x2ce   :  { %v6485_v42 = vadd.f32 %v1661_v4, %v1659_v13  ;;  %v1662_v44 = vmul.f32 %v4935_v10, %v4929_v57  ;;  %v4937_v45 = vpop.eup %4936  ;;  %v8077_v57 = vld [vmem:[#allocation36_spill] sm:$0xff]  ;;  %v8078_v4 = vld [vmem:[#allocation37_spill] sm:$0xff] }
 0x2cf   :  { %1764 = vmatpush1.bf16.msra.mxu0 %v6487_v48  ;;  %1807 = vmatpush1.bf16.msra.mxu1 %v6490_v50  ;;  %v1660_v20 = vmul.f32 %v4937_v45, %v6304_v37  ;;  %v6506_v37 = vld [vmem:[#allocation9 + $0xa4] ss:$16 sps:$4 sm:$0xff]   ;;  %v4939_v3 = vpop.eup %4938  ;;  %v6533_v45 = vld [vmem:[#allocation8 + $0xc] ss:$16 sps:$4 sm:$0xff]  }
 0x2d0   :  { %1765 = vmatprep.subr.bf16.mxu0 %v8075_v51  ;;  %1808 = vmatprep.subr.bf16.mxu1 %v8076_v52  ;;  %4940 = vtanh.f32 %v6485_v42  ;;  %8084 = vst [vmem:[#allocation46_spill] sm:$0xff] %v6533_v45  ;;  %v6643_v51 = vld [vmem:[#allocation11 + $0xac] ss:$16 sps:$4 sm:$0xff]   ;;  %v6646_v52 = vld [vmem:[#allocation11 + $0xa0] ss:$16 sps:$4 sm:$0xff]  }
 0x2d1   :  { %v6497_v54 = vadd.f32 %v1662_v44, %v1660_v20  ;;  %4942 = vrcp.f32 %v1654_v46  ;;  %v6530_v44 = vld [vmem:[#allocation8 + $0x4] ss:$16 sps:$4 sm:$0xff]   ;;  %8111 = vst [vmem:[#allocation76_spill] sm:$0xff] %v6643_v51  ;;  %8112 = vst [vmem:[#allocation77_spill] sm:$0xff] %v6646_v52 }
 0x2d2   :  { %8083 = vst [vmem:[#allocation42_spill] sm:$0xff] %v6530_v44  ;;  %v6640_v20 = vld [vmem:[#allocation11 + $0xa4] ss:$16 sps:$4 sm:$0xff]  }
 0x2d3   :  { %1766 = vmatpush1.bf16.msra.mxu0 %v6499_v55  ;;  %1809 = vmatpush1.bf16.msra.mxu1 %v6502_v56  ;;  %4944 = vtanh.f32 %v6497_v54  ;;  %8110 = vst [vmem:[#allocation75_spill] sm:$0xff] %v6640_v20 }
 0x2d4   :  { %1767 = vmatprep.subr.bf16.mxu0 %v6506_v37  ;;  %1810 = vmatprep.subr.bf16.mxu1 %v6509_v58 }
 0x2d7   :  { %1768 = vmatpush1.bf16.msra.mxu0 %v6512_v59  ;;  %1811 = vmatpush1.bf16.msra.mxu1 %v6515_v61 }
 0x2d8   :  { %1769 = vmatprep.subr.bf16.mxu0 %v6518_v2  ;;  %1812 = vmatprep.subr.bf16.mxu1 %v6521_v63 }
 0x2da   :  { %v4941_v62 = vpop.eup %4940 }
 0x2db   :  { %1770 = vmatpush1.bf16.msra.mxu0 %v8077_v57  ;;  %1813 = vmatpush1.bf16.msra.mxu1 %v8078_v4  ;;  %v4943_v12 = vpop.eup %4942  ;;  %v1667_v10 = vmul.f32 %v4941_v62, %v4939_v3  ;;  %v6649_v3 = vld [vmem:[#allocation11 + $0xa8] ss:$16 sps:$4 sm:$0xff]   ;;  %v6652_v57 = vld [vmem:[#allocation11 + $0xc4] ss:$16 sps:$4 sm:$0xff]   ;;  %v6655_v4 = vld [vmem:[#allocation11 + $0xcc] ss:$16 sps:$4 sm:$0xff]  }
 0x2dc   :  { %1771 = vmatprep.subr.bf16.mxu0 %v8079_v5  ;;  %1814 = vmatprep.subr.bf16.mxu1 %v8080_v11  ;;  %8113 = vst [vmem:[#allocation78_spill] sm:$0xff] %v6649_v3  ;;  %8114 = vst [vmem:[#allocation79_spill] sm:$0xff] %v6652_v57  ;;  %v6658_v62 = vld [vmem:[#allocation11 + $0xc0] ss:$16 sps:$4 sm:$0xff]   ;;  %v6661_v5 = vld [vmem:[#allocation11 + $0xc8] ss:$16 sps:$4 sm:$0xff]  }
 0x2dd   :  { %v4945_v13 = vpop.eup %4944  ;;  %8115 = vst [vmem:[#allocation80_spill] sm:$0xff] %v6655_v4  ;;  %8116 = vst [vmem:[#allocation81_spill] sm:$0xff] %v6658_v62  ;;  %v6664_v11 = vld [vmem:[#allocation11 + $0xe4] ss:$16 sps:$4 sm:$0xff]  }
 0x2de   :  { %v1668_v39 = vmul.f32 %v4945_v13, %v4943_v12  ;;  %8117 = vst [vmem:[#allocation82_spill] sm:$0xff] %v6661_v5  ;;  %8118 = vst [vmem:[#allocation83_spill] sm:$0xff] %v6664_v11  ;;  %v6667_v12 = vld [vmem:[#allocation11 + $0xec] ss:$16 sps:$4 sm:$0xff]   ;;  %v6670_v13 = vld [vmem:[#allocation11 + $0xe0] ss:$16 sps:$4 sm:$0xff]  }
 0x2df   :  { %1772 = vmatpush1.bf16.msra.mxu0 %v8081_v22  ;;  %1815 = vmatpush1.bf16.msra.mxu1 %v8082_v40  ;;  %8119 = vst [vmem:[#allocation84_spill] sm:$0xff] %v6667_v12  ;;  %8120 = vst [vmem:[#allocation85_spill] sm:$0xff] %v6670_v13  ;;  %v6673_v22 = vld [vmem:[#allocation11 + $0xe8] ss:$16 sps:$4 sm:$0xff]   ;;  %v6676_v40 = vld [vmem:[#allocation9 + $0x4] ss:$16 sps:$4 sm:$0xff]  }
 0x2e0   :  { %1904 = vmatprep.subr.bf16.mxu0 %v6530_v44  ;;  %1947 = vmatprep.subr.bf16.mxu1 %v6533_v45  ;;  %v1669_v46 = vpack.c.bf16 %v1668_v39, %v1667_v10  ;;  %8121 = vst [vmem:[#allocation86_spill] sm:$0xff] %v6673_v22  ;;  %8122 = vst [vmem:[#allocation87_spill] sm:$0xff] %v6676_v40  ;;  %v6679_v10 = vld [vmem:[#allocation9 + $0xc] ss:$16 sps:$4 sm:$0xff]  }
 0x2e1   :  { %8123 = vst [vmem:[#allocation88_spill] sm:$0xff] %v6679_v10 }
 0x2e2   :  { %1790 = vmatmul.mubr.bf16.vlgmr.msra.gmra.mrb[36].mxu0 %v1669_v46  ;;  %1833 = vmatmul.mubr.bf16.vlgmr.msra.gmra.mrb[52].mxu1 %v1669_v46 }
 0x2e3   :  { %1905 = vmatpush1.bf16.msra.mxu0 %v6307_v33  ;;  %1948 = vmatpush1.bf16.msra.mxu1 %v6310_v32  ;;  %v6559_v33 = vld [vmem:[#allocation8 + $0xa8] ss:$16 sps:$4 sm:$0xff]   ;;  %v6563_v32 = vld [vmem:[#allocation8 + $0xcc] ss:$16 sps:$4 sm:$0xff]  }
 0x2e4   :  { %1906 = vmatprep.subr.bf16.mxu0 %v6313_v25  ;;  %1949 = vmatprep.subr.bf16.mxu1 %v6316_v9  ;;  %8085 = vst [vmem:[#allocation51_spill] sm:$0xff] %v6559_v33  ;;  %8086 = vst [vmem:[#allocation48_spill] sm:$0xff] %v6563_v32  ;;  %v6567_v25 = vld [vmem:[#allocation8 + $0xc8] ss:$16 sps:$4 sm:$0xff]   ;;  %v6598_v9 = vld [vmem:[#allocation11 + $0x20] ss:$16 sps:$4 sm:$0xff]  }
 0x2e5   :  { %1936 = vmatprep.mubr.bf16.mxu0 %v8047_v8  ;;  %1979 = vmatprep.mubr.bf16.mxu1 %v8047_v8  ;;  %8087 = vst [vmem:[#allocation53_spill] sm:$0xff] %v6567_v25  ;;  %8096 = vst [vmem:[#allocation32_spill] sm:$0xff] %v6598_v9 }
 0x2e7   :  { %1907 = vmatpush1.bf16.msra.mxu0 %v6321_v35  ;;  %1950 = vmatpush1.bf16.msra.mxu1 %v6324_v27  ;;  %v6601_v35 = vld [vmem:[#allocation11 + $0x28] ss:$16 sps:$4 sm:$0xff]   ;;  %v6604_v27 = vld [vmem:[#allocation11 + $0x44] ss:$16 sps:$4 sm:$0xff]  }
 0x2e8   :  { %1908 = vmatprep.subr.bf16.mxu0 %v6327_v0  ;;  %1951 = vmatprep.subr.bf16.mxu1 %v6330_v24  ;;  %8097 = vst [vmem:[#allocation33_spill] sm:$0xff] %v6601_v35  ;;  %8098 = vst [vmem:[#allocation34_spill] sm:$0xff] %v6604_v27  ;;  %v6607_v0 = vld [vmem:[#allocation11 + $0x4c] ss:$16 sps:$4 sm:$0xff]   ;;  %v6610_v24 = vld [vmem:[#allocation11 + $0x40] ss:$16 sps:$4 sm:$0xff]  }
 0x2e9   :  { %8099 = vst [vmem:[#allocation35_spill] sm:$0xff] %v6607_v0  ;;  %8100 = vst [vmem:[#allocation36_spill] sm:$0xff] %v6610_v24 }
 0x2eb   :  { %1909 = vmatpush1.bf16.msra.mxu0 %v6333_v15  ;;  %1952 = vmatpush1.bf16.msra.mxu1 %v6336_v26  ;;  %v6613_v15 = vld [vmem:[#allocation11 + $0x48] ss:$16 sps:$4 sm:$0xff]   ;;  %v6616_v26 = vld [vmem:[#allocation11 + $0x64] ss:$16 sps:$4 sm:$0xff]  }
 0x2ec   :  { %1910 = vmatprep.subr.bf16.mxu0 %v6339_v17  ;;  %1953 = vmatprep.subr.bf16.mxu1 %v6342_v36  ;;  %8101 = vst [vmem:[#allocation37_spill] sm:$0xff] %v6613_v15  ;;  %8102 = vst [vmem:[#allocation38_spill] sm:$0xff] %v6616_v26  ;;  %v6619_v17 = vld [vmem:[#allocation11 + $0x6c] ss:$16 sps:$4 sm:$0xff]   ;;  %v6622_v36 = vld [vmem:[#allocation11 + $0x60] ss:$16 sps:$4 sm:$0xff]  }
 0x2ed   :  { %8103 = vst [vmem:[#allocation39_spill] sm:$0xff] %v6619_v17  ;;  %8104 = vst [vmem:[#allocation40_spill] sm:$0xff] %v6622_v36 }
 0x2ef   :  { %1911 = vmatpush1.bf16.msra.mxu0 %v6345_v21  ;;  %1954 = vmatpush1.bf16.msra.mxu1 %v6348_v41  ;;  %v6625_v21 = vld [vmem:[#allocation11 + $0x68] ss:$16 sps:$4 sm:$0xff]   ;;  %v6628_v41 = vld [vmem:[#allocation11 + $0x84] ss:$16 sps:$4 sm:$0xff]  }
 0x2f0   :  { %1912 = vmatprep.subr.bf16.mxu0 %v6351_v14  ;;  %1955 = vmatprep.subr.bf16.mxu1 %v6354_v28  ;;  %8105 = vst [vmem:[#allocation41_spill] sm:$0xff] %v6625_v21  ;;  %8106 = vst [vmem:[#allocation71_spill] sm:$0xff] %v6628_v41  ;;  %v6631_v14 = vld [vmem:[#allocation11 + $0x8c] ss:$16 sps:$4 sm:$0xff]   ;;  %v6634_v28 = vld [vmem:[#allocation11 + $0x80] ss:$16 sps:$4 sm:$0xff]  }
 0x2f1   :  { %8107 = vst [vmem:[#allocation72_spill] sm:$0xff] %v6631_v14  ;;  %8108 = vst [vmem:[#allocation73_spill] sm:$0xff] %v6634_v28 }
 0x2f3   :  { %1913 = vmatpush1.bf16.msra.mxu0 %v6357_v30  ;;  %1956 = vmatpush1.bf16.msra.mxu1 %v6360_v31  ;;  %v6593_v31 = vld [vmem:[#allocation11 + $0x2c] ss:$16 sps:$4 sm:$0xff]   ;;  %v6637_v30 = vld [vmem:[#allocation11 + $0x88] ss:$16 sps:$4 sm:$0xff]  }
 0x2f4   :  { %1914 = vmatprep.subr.bf16.mxu0 %v6363_v38  ;;  %1957 = vmatprep.subr.bf16.mxu1 %v6366_v34  ;;  %v6571_v34 = vld [vmem:[#allocation8 + $0xec] ss:$16 sps:$4 sm:$0xff]   ;;  %v6587_v38 = vld [vmem:[#allocation11 + $0x8] ss:$16 sps:$4 sm:$0xff]   ;;  %8095 = vst [vmem:[#allocation31_spill] sm:$0xff] %v6593_v31  ;;  %8109 = vst [vmem:[#allocation74_spill] sm:$0xff] %v6637_v30 }
 0x2f5   :  { %8088 = vst [vmem:[#allocation24_spill] sm:$0xff] %v6571_v34  ;;  %8093 = vst [vmem:[#allocation29_spill] sm:$0xff] %v6587_v38 }
 0x2f7   :  { %1915 = vmatpush1.bf16.msra.mxu0 %v6369_v16  ;;  %1958 = vmatpush1.bf16.msra.mxu1 %v6559_v33  ;;  %v6575_v16 = vld [vmem:[#allocation8 + $0xe8] ss:$16 sps:$4 sm:$0xff]  }
 0x2f8   :  { %1916 = vmatprep.subr.bf16.mxu0 %v6373_v18  ;;  %1959 = vmatprep.subr.bf16.mxu1 %v6563_v32  ;;  %8089 = vst [vmem:[#allocation25_spill] sm:$0xff] %v6575_v16  ;;  %v6578_v18 = vld [vmem:[#allocation11 + $0x4] ss:$16 sps:$4 sm:$0xff]  }
 0x2f9   :  { %8090 = vst [vmem:[#allocation26_spill] sm:$0xff] %v6578_v18 }
 0x2fb   :  { %1917 = vmatpush1.bf16.msra.mxu0 %v6377_v29  ;;  %1960 = vmatpush1.bf16.msra.mxu1 %v6567_v25  ;;  %v6581_v29 = vld [vmem:[#allocation11 + $0xc] ss:$16 sps:$4 sm:$0xff]  }
 0x2fc   :  { %1918 = vmatprep.subr.bf16.mxu0 %v6381_v19  ;;  %1961 = vmatprep.subr.bf16.mxu1 %v6571_v34  ;;  %8091 = vst [vmem:[#allocation27_spill] sm:$0xff] %v6581_v29  ;;  %v6584_v19 = vld [vmem:[#allocation11] ss:$16 sps:$4 sm:$0xff]  }
 0x2fd   :  { %8092 = vst [vmem:[#allocation28_spill] sm:$0xff] %v6584_v19 }
 0x2ff   :  { %1919 = vmatpush1.bf16.msra.mxu0 %v6385_v23  ;;  %1962 = vmatpush1.bf16.msra.mxu1 %v6575_v16  ;;  %v6590_v23 = vld [vmem:[#allocation11 + $0x24] ss:$16 sps:$4 sm:$0xff]  }
 0x300   :  { %2056 = vmatprep.subr.bf16.mxu0 %v6578_v18  ;;  %2099 = vmatprep.subr.bf16.mxu1 %v6581_v29  ;;  %8094 = vst [vmem:[#allocation30_spill] sm:$0xff] %v6590_v23 }
 0x302   :  { %1937 = vmatmul.mubr.bf16.vlgmr.msra.gmra.mrb[40].mxu0 %v1669_v46  ;;  %1980 = vmatmul.mubr.bf16.vlgmr.msra.gmra.mrb[56].mxu1 %v1669_v46 }
 0x303   :  { %2057 = vmatpush1.bf16.msra.mxu0 %v6584_v19  ;;  %2100 = vmatpush1.bf16.msra.mxu1 %v6587_v38 }
 0x304   :  { %2058 = vmatprep.subr.bf16.mxu0 %v6590_v23  ;;  %2101 = vmatprep.subr.bf16.mxu1 %v6593_v31 }
 0x305   :  { %2088 = vmatprep.mubr.bf16.mxu0 %v8047_v8  ;;  %2131 = vmatprep.mubr.bf16.mxu1 %v8047_v8 }
 0x307   :  { %2059 = vmatpush1.bf16.msra.mxu0 %v6598_v9  ;;  %2102 = vmatpush1.bf16.msra.mxu1 %v6601_v35 }
 0x308   :  { %2060 = vmatprep.subr.bf16.mxu0 %v6604_v27  ;;  %2103 = vmatprep.subr.bf16.mxu1 %v6607_v0 }
 0x30b   :  { %2061 = vmatpush1.bf16.msra.mxu0 %v6610_v24  ;;  %2104 = vmatpush1.bf16.msra.mxu1 %v6613_v15 }
 0x30c   :  { %2062 = vmatprep.subr.bf16.mxu0 %v6616_v26  ;;  %2105 = vmatprep.subr.bf16.mxu1 %v6619_v17 }
 0x30f   :  { %2063 = vmatpush1.bf16.msra.mxu0 %v6622_v36  ;;  %2106 = vmatpush1.bf16.msra.mxu1 %v6625_v21 }
 0x310   :  { %2064 = vmatprep.subr.bf16.mxu0 %v6628_v41  ;;  %2107 = vmatprep.subr.bf16.mxu1 %v6631_v14 }
 0x313   :  { %2065 = vmatpush1.bf16.msra.mxu0 %v6634_v28  ;;  %2108 = vmatpush1.bf16.msra.mxu1 %v6637_v30 }
 0x314   :  { %2066 = vmatprep.subr.bf16.mxu0 %v6640_v20  ;;  %2109 = vmatprep.subr.bf16.mxu1 %v6643_v51 }
 0x317   :  { %2067 = vmatpush1.bf16.msra.mxu0 %v6646_v52  ;;  %2110 = vmatpush1.bf16.msra.mxu1 %v6649_v3 }
 0x318   :  { %2068 = vmatprep.subr.bf16.mxu0 %v6652_v57  ;;  %2111 = vmatprep.subr.bf16.mxu1 %v6655_v4 }
 0x31b   :  { %2069 = vmatpush1.bf16.msra.mxu0 %v6658_v62  ;;  %2112 = vmatpush1.bf16.msra.mxu1 %v6661_v5 }
 0x31c   :  { %2070 = vmatprep.subr.bf16.mxu0 %v6664_v11  ;;  %2113 = vmatprep.subr.bf16.mxu1 %v6667_v12 }
 0x31f   :  { %2071 = vmatpush1.bf16.msra.mxu0 %v6670_v13  ;;  %2114 = vmatpush1.bf16.msra.mxu1 %v6673_v22 }
 0x320   :  { %2142 = vmatprep.subr.bf16.mxu0 %v6676_v40  ;;  %2185 = vmatprep.subr.bf16.mxu1 %v6679_v10 }
 0x3b5   :  { %v1791_v39 = vpop.f32.mrb[36].mxu0  ;;  %v1834_v46 = vpop.f32.mrb[52].mxu1 }
 0x3b6   :  { %v1843_v12 = vadd.f32 %v1791_v39, %v6430_v47  ;;  %v1793_v11 = vpop.f32.mrb[37].mxu0  ;;  %v1836_v5 = vpop.f32.mrb[53].mxu1 }
 0x3b7   :  { %v1844_v13 = vadd.f32 %v1793_v11, %v6434_v49  ;;  %v1795_v62 = vpop.f32.mrb[38].mxu0  ;;  %v1838_v4 = vpop.f32.mrb[54].mxu1  ;;  %v1846_v39 = vadd.f32 %v1836_v5, %v6441_v1  ;;  %v1845_v11 = vadd.f32 %v1834_v46, %v6446_v6 }
 0x3b8   :  { %v4486_v57 = vmul.f32 -1.442695, %v1843_v12  ;;  %v1847_v22 = vadd.f32 %v1795_v62, %v6430_v47  ;;  %v1797_v3 = vpop.f32.mrb[39].mxu0  ;;  %v1840_v52 = vpop.f32.mrb[55].mxu1 }
 0x3b9   :  { %v4488_v40 = vmul.f32 -1.442695, %v1844_v13  ;;  %v1848_v51 = vadd.f32 %v1797_v3, %v6434_v49  ;;  %v1850_v30 = vadd.f32 %v1840_v52, %v6441_v1  ;;  %v4490_v12 = vmul.f32 -1.442695, %v1846_v39 }
 0x3ba   :  { %4946 = vpow2.f32 %v4486_v57  ;;  %v4487_v10 = vmul.f32 -1.442695, %v1847_v22  ;;  %v1849_v3 = vadd.f32 %v1838_v4, %v6446_v6 }
 0x3bb   :  { %4948 = vpow2.f32 %v4488_v40  ;;  %v4489_v20 = vmul.f32 -1.442695, %v1848_v51  ;;  %v4491_v28 = vmul.f32 -1.442695, %v1850_v30 }
 0x3bc   :  { %4950 = vpow2.f32 %v4487_v10 }
 0x3bd   :  { %4952 = vpow2.f32 %v4489_v20 }
 0x3be   :  { %4954 = vtanh.f32 %v1845_v11 }
 0x3bf   :  { %4956 = vpow2.f32 %v4490_v12 }
 0x3c0   :  { %4958 = vpow2.f32 %v4491_v28  ;;  %v8124_v28 = vld [vmem:[#allocation49_spill] sm:$0xff] }
 0x3c1   :  { %v1990_v12 = vunpack.c.l.bf16 %v8124_v28 }
 0x3c4   :  { %v4947_v62 = vpop.eup %4946 }
 0x3c5   :  { %v4949_v47 = vpop.eup %4948  ;;  %v1857_v13 = vadd.f32 1.0, %v4947_v62 }
 0x3c6   :  { %v1869_v57 = vadd.f32 1.0, %v4949_v47  ;;  %v4951_v51 = vpop.eup %4950 }
 0x3c7   :  { %4960 = vrcp.f32 %v1857_v13  ;;  %v1858_v5 = vadd.f32 1.0, %v4951_v51  ;;  %v4953_v22 = vpop.eup %4952 }
 0x3c8   :  { %4962 = vrcp.f32 %v1869_v57  ;;  %v1870_v20 = vadd.f32 1.0, %v4953_v22  ;;  %v4955_v52 = vpop.eup %4954  ;;  %v8125_v57 = vld [vmem:[#allocation55_spill] sm:$0xff]  ;;  %v1994_v22 = vunpack.c.h.bf16 %v8124_v28 }
 0x3c9   :  { %4964 = vtanh.f32 %v1849_v3  ;;  %v4957_v30 = vpop.eup %4956  ;;  %v1992_v51 = vunpack.c.l.bf16 %v8125_v57  ;;  %v8126_v3 = vld [vmem:[#allocation50_spill] sm:$0xff]  ;;  %v1996_v21 = vunpack.c.h.bf16 %v8125_v57 }
 0x3ca   :  { %4966 = vrcp.f32 %v1858_v5  ;;  %v4959_v40 = vpop.eup %4958  ;;  %v1883_v47 = vadd.f32 1.0, %v4957_v30  ;;  %v1991_v5 = vunpack.c.l.bf16 %v8126_v3 }
 0x3cb   :  { %4968 = vrcp.f32 %v1870_v20  ;;  %v1884_v13 = vadd.f32 1.0, %v4959_v40 }
 0x3cc   :  { %4970 = vrcp.f32 %v1883_v47 }
 0x3cd   :  { %4972 = vrcp.f32 %v1884_v13 }
 0x3d1   :  { %v4961_v10 = vpop.eup %4960 }
 0x3d2   :  { %v4963_v46 = vpop.eup %4962  ;;  %v1891_v39 = vmul.f32 %v4961_v10, %v4955_v52  ;;  %v8127_v52 = vld [vmem:[#allocation57_spill] sm:$0xff] }
 0x3d3   :  { %v4965_v11 = vpop.eup %4964  ;;  %v1889_v4 = vmul.f32 %v4963_v46, %v6456_v7  ;;  %v1993_v10 = vunpack.c.l.bf16 %v8127_v52  ;;  %v1995_v7 = vunpack.c.h.bf16 %v8126_v3  ;;  %v1997_v36 = vunpack.c.h.bf16 %v8127_v52 }
 0x3d4   :  { %v4967_v62 = vpop.eup %4966 }
 0x3d5   :  { %v6695_v20 = vadd.f32 %v1891_v39, %v1889_v4  ;;  %v1892_v6 = vmul.f32 %v4967_v62, %v4965_v11  ;;  %v1938_v1 = vpop.f32.mrb[40].mxu0  ;;  %v1981_v49 = vpop.f32.mrb[56].mxu1 }
 0x3d6   :  { %v4969_v30 = vpop.eup %4968  ;;  %v1998_v46 = vadd.f32 %v1990_v12, %v1938_v1  ;;  %v2000_v14 = vadd.f32 %v1992_v51, %v1981_v49  ;;  %v1940_v41 = vpop.f32.mrb[41].mxu0 }
 0x3d7   :  { %v1983_v40 = vpop.f32.mrb[57].mxu1  ;;  %v1890_v39 = vmul.f32 %v4969_v30, %v6463_v60  ;;  %v1999_v4 = vadd.f32 %v1991_v5, %v1940_v41  ;;  %v1942_v28 = vpop.f32.mrb[42].mxu0  ;;  %4974 = vtanh.f32 %v6695_v20 }
 0x3d8   :  { %v2001_v11 = vadd.f32 %v1993_v10, %v1983_v40  ;;  %v1985_v62 = vpop.f32.mrb[58].mxu1  ;;  %v4492_v17 = vmul.f32 -1.442695, %v1998_v46  ;;  %v2002_v26 = vadd.f32 %v1994_v22, %v1942_v28  ;;  %v1944_v15 = vpop.f32.mrb[43].mxu0  ;;  %v6716_v28 = vld [vmem:[#allocation9 + $0x20] ss:$16 sps:$4 sm:$0xff]  }
 0x3d9   :  { %v2004_v3 = vadd.f32 %v1996_v21, %v1985_v62  ;;  %v1987_v1 = vpop.f32.mrb[59].mxu1  ;;  %v6703_v49 = vadd.f32 %v1892_v6, %v1890_v39  ;;  %v4494_v12 = vmul.f32 -1.442695, %v1999_v4  ;;  %v2003_v57 = vadd.f32 %v1995_v7, %v1944_v15  ;;  %v4971_v41 = vpop.eup %4970  ;;  %v6711_v4 = vld [vmem:[#allocation9 + $0x2c] ss:$16 sps:$4 sm:$0xff]  }
 0x3da   :  { %4976 = vpow2.f32 %v4492_v17  ;;  %v4493_v47 = vmul.f32 -1.442695, %v2002_v26  ;;  %v2005_v51 = vadd.f32 %v1997_v36, %v1987_v1  ;;  %v4973_v13 = vpop.eup %4972  ;;  %v4496_v21 = vmul.f32 -1.442695, %v2001_v11  ;;  %v6719_v62 = vld [vmem:[#allocation9 + $0x28] ss:$16 sps:$4 sm:$0xff]  }
 0x3db   :  { %4978 = vtanh.f32 %v6703_v49  ;;  %v4495_v60 = vmul.f32 -1.442695, %v2003_v57  ;;  %v6722_v1 = vld [vmem:[#allocation9 + $0x44] ss:$16 sps:$4 sm:$0xff]  }
 0x3dc   :  { %4980 = vpow2.f32 %v4494_v12  ;;  %v4497_v15 = vmul.f32 -1.442695, %v2005_v51  ;;  %v6725_v12 = vld [vmem:[#allocation9 + $0x4c] ss:$16 sps:$4 sm:$0xff]  }
 0x3dd   :  { %4982 = vpow2.f32 %v4493_v47 }
 0x3de   :  { %4984 = vpow2.f32 %v4495_v60 }
 0x3df   :  { %4986 = vtanh.f32 %v2000_v14  ;;  %v6708_v14 = vld [vmem:[#allocation9 + $0x24] ss:$16 sps:$4 sm:$0xff]  }
 0x3e0   :  { %4988 = vpow2.f32 %v4496_v21 }
 0x3e1   :  { %v4975_v5 = vpop.eup %4974 }
 0x3e2   :  { %v1897_v17 = vmul.f32 %v4975_v5, %v4971_v41  ;;  %v6728_v41 = vld [vmem:[#allocation9 + $0x40] ss:$16 sps:$4 sm:$0xff]  }
 0x3e4   :  { %v4977_v22 = vpop.eup %4976 }
 0x3e5   :  { %v4979_v52 = vpop.eup %4978  ;;  %v2012_v10 = vadd.f32 1.0, %v4977_v22  ;;  %v6735_v22 = vld [vmem:[#allocation9 + $0x64] ss:$16 sps:$4 sm:$0xff]  }
 0x3e6   :  { %v4981_v6 = vpop.eup %4980  ;;  %v1898_v26 = vmul.f32 %v4979_v52, %v4973_v13  ;;  %v6731_v13 = vld [vmem:[#allocation9 + $0x48] ss:$16 sps:$4 sm:$0xff]   ;;  %v6738_v52 = vld [vmem:[#allocation9 + $0x6c] ss:$16 sps:$4 sm:$0xff]  }
 0x3e7   :  { %4990 = vrcp.f32 %v2012_v10  ;;  %v2024_v36 = vadd.f32 1.0, %v4981_v6  ;;  %v4983_v7 = vpop.eup %4982 }
 0x3e8   :  { %4992 = vtanh.f32 %v2004_v3  ;;  %v2055_v30 = vpack.c.bf16 %v1898_v26, %v1897_v17  ;;  %v2013_v46 = vadd.f32 1.0, %v4983_v7  ;;  %v4985_v40 = vpop.eup %4984  ;;  %v6746_v7 = vld [vmem:[#allocation9 + $0x84] ss:$16 sps:$4 sm:$0xff]  }
 0x3e9   :  { %4994 = vrcp.f32 %v2024_v36  ;;  %v2025_v39 = vadd.f32 1.0, %v4985_v40  ;;  %v4987_v11 = vpop.eup %4986  ;;  %v6764_v40 = vld [vmem:[#allocation9 + $0xc0] ss:$16 sps:$4 sm:$0xff]  }
 0x3ea   :  { %4996 = vpow2.f32 %v4497_v15  ;;  %2089 = vmatmul.mubr.bf16.vlgmr.msra.gmra.mrb[44].mxu0 %v2055_v30  ;;  %2132 = vmatmul.mubr.bf16.vlgmr.msra.gmra.mrb[60].mxu1 %v2055_v30  ;;  %v4989_v3 = vpop.eup %4988  ;;  %v6749_v30 = vld [vmem:[#allocation9 + $0x8c] ss:$16 sps:$4 sm:$0xff]  }
 0x3eb   :  { %4998 = vrcp.f32 %v2013_v46  ;;  %2143 = vmatpush1.bf16.msra.mxu0 %v6466_v53  ;;  %2186 = vmatpush1.bf16.msra.mxu1 %v6469_v43  ;;  %v2038_v6 = vadd.f32 1.0, %v4989_v3  ;;  %v6770_v3 = vld [vmem:[#allocation9 + $0xe4] ss:$16 sps:$4 sm:$0xff]  }
 0x3ec   :  { %2144 = vmatprep.subr.bf16.mxu0 %v6708_v14  ;;  %2187 = vmatprep.subr.bf16.mxu1 %v6711_v4  ;;  %5000 = vrcp.f32 %v2025_v39  ;;  %v6767_v39 = vld [vmem:[#allocation9 + $0xc8] ss:$16 sps:$4 sm:$0xff]  }
 0x3ed   :  { %2174 = vmatprep.mubr.bf16.mxu0 %v8047_v8  ;;  %2217 = vmatprep.mubr.bf16.mxu1 %v8047_v8  ;;  %5002 = vrcp.f32 %v2038_v6 }
 0x3ef   :  { %2145 = vmatpush1.bf16.msra.mxu0 %v6716_v28  ;;  %2188 = vmatpush1.bf16.msra.mxu1 %v6719_v62 }
 0x3f0   :  { %2146 = vmatprep.subr.bf16.mxu0 %v6722_v1  ;;  %2189 = vmatprep.subr.bf16.mxu1 %v6725_v12 }
 0x3f1   :  { %v4991_v57 = vpop.eup %4990 }
 0x3f2   :  { %v4993_v47 = vpop.eup %4992  ;;  %v2046_v51 = vmul.f32 %v4991_v57, %v4987_v11  ;;  %v6773_v57 = vld [vmem:[#allocation9 + $0xec] ss:$16 sps:$4 sm:$0xff]  }
 0x3f3   :  { %v4995_v60 = vpop.eup %4994  ;;  %2147 = vmatpush1.bf16.msra.mxu0 %v6728_v41  ;;  %2190 = vmatpush1.bf16.msra.mxu1 %v6731_v13 }
 0x3f4   :  { %v4997_v21 = vpop.eup %4996  ;;  %v2044_v5 = vmul.f32 %v4995_v60, %v6485_v42  ;;  %2148 = vmatprep.subr.bf16.mxu0 %v6735_v22  ;;  %2191 = vmatprep.subr.bf16.mxu1 %v6738_v52  ;;  %v6776_v60 = vld [vmem:[#allocation9 + $0xe0] ss:$16 sps:$4 sm:$0xff]  }
 0x3f5   :  { %v4999_v10 = vpop.eup %4998  ;;  %v2039_v36 = vadd.f32 1.0, %v4997_v21  ;;  %v6779_v21 = vld [vmem:[#allocation9 + $0xe8] ss:$16 sps:$4 sm:$0xff]  }
 0x3f6   :  { %v6741_v15 = vadd.f32 %v2046_v51, %v2044_v5  ;;  %v2047_v17 = vmul.f32 %v4999_v10, %v4993_v47  ;;  %v5001_v26 = vpop.eup %5000 }
 0x3f7   :  { %2149 = vmatpush1.bf16.msra.mxu0 %v6487_v48  ;;  %2192 = vmatpush1.bf16.msra.mxu1 %v6490_v50  ;;  %v2045_v42 = vmul.f32 %v5001_v26, %v6497_v54  ;;  %v5003_v54 = vpop.eup %5002  ;;  %v6787_v26 = vld [vmem:[#allocation8 + $0x8] ss:$16 sps:$4 sm:$0xff]  }
 0x3f8   :  { %2150 = vmatprep.subr.bf16.mxu0 %v6746_v7  ;;  %2193 = vmatprep.subr.bf16.mxu1 %v6749_v30  ;;  %5004 = vtanh.f32 %v6741_v15  ;;  %8129 = vst [vmem:[#allocation55_spill] sm:$0xff] %v6787_v26 }
 0x3f9   :  { %v6753_v46 = vadd.f32 %v2047_v17, %v2045_v42  ;;  %5006 = vrcp.f32 %v2039_v36  ;;  %v6784_v17 = vld [vmem:[#allocation8] ss:$16 sps:$4 sm:$0xff]   ;;  %v6790_v36 = vld [vmem:[#allocation8 + $0x24] ss:$16 sps:$4 sm:$0xff]   ;;  %v6793_v42 = vld [vmem:[#allocation8 + $0x2c] ss:$16 sps:$4 sm:$0xff]  }
 0x3fa   :  { %8128 = vst [vmem:[#allocation49_spill] sm:$0xff] %v6784_v17  ;;  %8130 = vst [vmem:[#allocation50_spill] sm:$0xff] %v6790_v36 }
 0x3fb   :  { %2151 = vmatpush1.bf16.msra.mxu0 %v6499_v55  ;;  %2194 = vmatpush1.bf16.msra.mxu1 %v6502_v56  ;;  %5008 = vtanh.f32 %v6753_v46  ;;  %8131 = vst [vmem:[#allocation57_spill] sm:$0xff] %v6793_v42 }
 0x3fc   :  { %2152 = vmatprep.subr.bf16.mxu0 %v6506_v37  ;;  %2195 = vmatprep.subr.bf16.mxu1 %v6509_v58 }
 0x3ff   :  { %2153 = vmatpush1.bf16.msra.mxu0 %v6512_v59  ;;  %2196 = vmatpush1.bf16.msra.mxu1 %v6515_v61 }
 0x400   :  { %2154 = vmatprep.subr.bf16.mxu0 %v6518_v2  ;;  %2197 = vmatprep.subr.bf16.mxu1 %v6521_v63 }
 0x402   :  { %v5005_v11 = vpop.eup %5004 }
 0x403   :  { %2155 = vmatpush1.bf16.msra.mxu0 %v6764_v40  ;;  %2198 = vmatpush1.bf16.msra.mxu1 %v6767_v39  ;;  %v5007_v47 = vpop.eup %5006  ;;  %v2052_v5 = vmul.f32 %v5005_v11, %v5003_v54  ;;  %v6798_v54 = vld [vmem:[#allocation8 + $0x20] ss:$16 sps:$4 sm:$0xff]   ;;  %v6801_v11 = vld [vmem:[#allocation8 + $0x28] ss:$16 sps:$4 sm:$0xff]  }
 0x404   :  { %2156 = vmatprep.subr.bf16.mxu0 %v6770_v3  ;;  %2199 = vmatprep.subr.bf16.mxu1 %v6773_v57  ;;  %8132 = vst [vmem:[#allocation89_spill] sm:$0xff] %v6798_v54  ;;  %8133 = vst [vmem:[#allocation90_spill] sm:$0xff] %v6801_v11 }
 0x405   :  { %v5009_v51 = vpop.eup %5008 }
 0x406   :  { %v2053_v10 = vmul.f32 %v5009_v51, %v5007_v47  ;;  %v6804_v47 = vld [vmem:[#allocation8 + $0x44] ss:$16 sps:$4 sm:$0xff]   ;;  %v6807_v51 = vld [vmem:[#allocation8 + $0x4c] ss:$16 sps:$4 sm:$0xff]  }
 0x407   :  { %2157 = vmatpush1.bf16.msra.mxu0 %v6776_v60  ;;  %2200 = vmatpush1.bf16.msra.mxu1 %v6779_v21  ;;  %8134 = vst [vmem:[#allocation91_spill] sm:$0xff] %v6804_v47  ;;  %8135 = vst [vmem:[#allocation92_spill] sm:$0xff] %v6807_v51 }
 0x408   :  { %2289 = vmatprep.subr.bf16.mxu0 %v6530_v44  ;;  %2332 = vmatprep.subr.bf16.mxu1 %v6533_v45  ;;  %v2054_v6 = vpack.c.bf16 %v2053_v10, %v2052_v5  ;;  %v6810_v5 = vld [vmem:[#allocation8 + $0x40] ss:$16 sps:$4 sm:$0xff]   ;;  %v6813_v10 = vld [vmem:[#allocation8 + $0x48] ss:$16 sps:$4 sm:$0xff]  }
 0x409   :  { %8136 = vst [vmem:[#allocation93_spill] sm:$0xff] %v6810_v5  ;;  %8137 = vst [vmem:[#allocation94_spill] sm:$0xff] %v6813_v10 }
 0x40a   :  { %2175 = vmatmul.mubr.bf16.vlgmr.msra.gmra.mrb[44].mxu0 %v2054_v6  ;;  %2218 = vmatmul.mubr.bf16.vlgmr.msra.gmra.mrb[60].mxu1 %v2054_v6 }
 0x40b   :  { %2290 = vmatpush1.bf16.msra.mxu0 %v6784_v17  ;;  %2333 = vmatpush1.bf16.msra.mxu1 %v6787_v26 }
 0x40c   :  { %2291 = vmatprep.subr.bf16.mxu0 %v6790_v36  ;;  %2334 = vmatprep.subr.bf16.mxu1 %v6793_v42 }
 0x40d   :  { %2321 = vmatprep.mubr.bf16.mxu0 %v8047_v8  ;;  %2364 = vmatprep.mubr.bf16.mxu1 %v8047_v8 }
 0x40f   :  { %2292 = vmatpush1.bf16.msra.mxu0 %v6798_v54  ;;  %2335 = vmatpush1.bf16.msra.mxu1 %v6801_v11  ;;  %v6816_v54 = vld [vmem:[#allocation8 + $0x64] ss:$16 sps:$4 sm:$0xff]   ;;  %v6819_v11 = vld [vmem:[#allocation8 + $0x6c] ss:$16 sps:$4 sm:$0xff]  }
 0x410   :  { %2293 = vmatprep.subr.bf16.mxu0 %v6804_v47  ;;  %2336 = vmatprep.subr.bf16.mxu1 %v6807_v51  ;;  %8138 = vst [vmem:[#allocation95_spill] sm:$0xff] %v6816_v54  ;;  %8139 = vst [vmem:[#allocation96_spill] sm:$0xff] %v6819_v11  ;;  %v6822_v47 = vld [vmem:[#allocation8 + $0x60] ss:$16 sps:$4 sm:$0xff]   ;;  %v6825_v51 = vld [vmem:[#allocation8 + $0x68] ss:$16 sps:$4 sm:$0xff]  }
 0x411   :  { %8140 = vst [vmem:[#allocation97_spill] sm:$0xff] %v6822_v47  ;;  %8141 = vst [vmem:[#allocation98_spill] sm:$0xff] %v6825_v51 }
 0x413   :  { %2294 = vmatpush1.bf16.msra.mxu0 %v6810_v5  ;;  %2337 = vmatpush1.bf16.msra.mxu1 %v6813_v10  ;;  %v6828_v5 = vld [vmem:[#allocation8 + $0x84] ss:$16 sps:$4 sm:$0xff]   ;;  %v6831_v10 = vld [vmem:[#allocation8 + $0x8c] ss:$16 sps:$4 sm:$0xff]  }
 0x414   :  { %2295 = vmatprep.subr.bf16.mxu0 %v6816_v54  ;;  %2338 = vmatprep.subr.bf16.mxu1 %v6819_v11  ;;  %8142 = vst [vmem:[#allocation99_spill] sm:$0xff] %v6828_v5  ;;  %8143 = vst [vmem:[#allocation100_spill] sm:$0xff] %v6831_v10  ;;  %v6834_v54 = vld [vmem:[#allocation8 + $0x80] ss:$16 sps:$4 sm:$0xff]   ;;  %v6837_v11 = vld [vmem:[#allocation8 + $0x88] ss:$16 sps:$4 sm:$0xff]  }
 0x415   :  { %8144 = vst [vmem:[#allocation101_spill] sm:$0xff] %v6834_v54  ;;  %8145 = vst [vmem:[#allocation102_spill] sm:$0xff] %v6837_v11 }
 0x417   :  { %2296 = vmatpush1.bf16.msra.mxu0 %v6822_v47  ;;  %2339 = vmatpush1.bf16.msra.mxu1 %v6825_v51  ;;  %v6840_v47 = vld [vmem:[#allocation8 + $0xa4] ss:$16 sps:$4 sm:$0xff]   ;;  %v6843_v51 = vld [vmem:[#allocation8 + $0xac] ss:$16 sps:$4 sm:$0xff]  }
 0x418   :  { %2297 = vmatprep.subr.bf16.mxu0 %v6828_v5  ;;  %2340 = vmatprep.subr.bf16.mxu1 %v6831_v10  ;;  %8146 = vst [vmem:[#allocation103_spill] sm:$0xff] %v6840_v47  ;;  %8147 = vst [vmem:[#allocation104_spill] sm:$0xff] %v6843_v51  ;;  %v6846_v5 = vld [vmem:[#allocation8 + $0xa0] ss:$16 sps:$4 sm:$0xff]   ;;  %v6850_v10 = vld [vmem:[#allocation8 + $0xc4] ss:$16 sps:$4 sm:$0xff]  }
 0x419   :  { %8148 = vst [vmem:[#allocation105_spill] sm:$0xff] %v6846_v5  ;;  %8149 = vst [vmem:[#allocation106_spill] sm:$0xff] %v6850_v10 }
 0x41b   :  { %2298 = vmatpush1.bf16.msra.mxu0 %v6834_v54  ;;  %2341 = vmatpush1.bf16.msra.mxu1 %v6837_v11  ;;  %v6854_v11 = vld [vmem:[#allocation8 + $0xc0] ss:$16 sps:$4 sm:$0xff]  }
 0x41c   :  { %2299 = vmatprep.subr.bf16.mxu0 %v6840_v47  ;;  %2342 = vmatprep.subr.bf16.mxu1 %v6843_v51  ;;  %8150 = vst [vmem:[#allocation107_spill] sm:$0xff] %v6854_v11  ;;  %v6858_v47 = vld [vmem:[#allocation8 + $0xe4] ss:$16 sps:$4 sm:$0xff]  }
 0x41d   :  { %8151 = vst [vmem:[#allocation108_spill] sm:$0xff] %v6858_v47 }
 0x41f   :  { %2300 = vmatpush1.bf16.msra.mxu0 %v6846_v5  ;;  %2343 = vmatpush1.bf16.msra.mxu1 %v6559_v33  ;;  %v6862_v5 = vld [vmem:[#allocation8 + $0xe0] ss:$16 sps:$4 sm:$0xff]  }
 0x420   :  { %2301 = vmatprep.subr.bf16.mxu0 %v6850_v10  ;;  %2344 = vmatprep.subr.bf16.mxu1 %v6563_v32  ;;  %8152 = vst [vmem:[#allocation109_spill] sm:$0xff] %v6862_v5  ;;  %v8178_v32 = vld [vmem:[#allocation22_spill] sm:$0xff] }
 0x423   :  { %2302 = vmatpush1.bf16.msra.mxu0 %v6854_v11  ;;  %2345 = vmatpush1.bf16.msra.mxu1 %v6567_v25 }
 0x424   :  { %2303 = vmatprep.subr.bf16.mxu0 %v6858_v47  ;;  %2346 = vmatprep.subr.bf16.mxu1 %v6571_v34 }
 0x427   :  { %2304 = vmatpush1.bf16.msra.mxu0 %v6862_v5  ;;  %2347 = vmatpush1.bf16.msra.mxu1 %v6575_v16  ;;  %v8177_v5 = vld [vmem:[#allocation21_spill] sm:$0xff] }
 0x428   :  { %2441 = vmatprep.subr.bf16.mxu0 %v6578_v18  ;;  %2484 = vmatprep.subr.bf16.mxu1 %v6581_v29  ;;  %v8158_v29 = vld [vmem:[#allocation71_spill] sm:$0xff]  ;;  %v8176_v18 = vld [vmem:[#allocation20_spill] sm:$0xff] }
 0x42a   :  { %2322 = vmatmul.mubr.bf16.vlgmr.msra.gmra.mrb[48].mxu0 %v2054_v6  ;;  %2365 = vmatmul.mubr.bf16.vlgmr.msra.gmra.mrb[64].mxu1 %v2054_v6  ;;  %v8153_v6 = vld [vmem:[#allocation37_spill] sm:$0xff] }
 0x42b   :  { %2442 = vmatpush1.bf16.msra.mxu0 %v6584_v19  ;;  %2485 = vmatpush1.bf16.msra.mxu1 %v6587_v38  ;;  %v8154_v38 = vld [vmem:[#allocation38_spill] sm:$0xff]  ;;  %v8157_v19 = vld [vmem:[#allocation41_spill] sm:$0xff] }
 0x42c   :  { %2443 = vmatprep.subr.bf16.mxu0 %v6590_v23  ;;  %2486 = vmatprep.subr.bf16.mxu1 %v6593_v31  ;;  %v8155_v23 = vld [vmem:[#allocation39_spill] sm:$0xff]  ;;  %v8156_v31 = vld [vmem:[#allocation40_spill] sm:$0xff] }
 0x42d   :  { %2473 = vmatprep.mubr.bf16.mxu0 %v8047_v8  ;;  %2516 = vmatprep.mubr.bf16.mxu1 %v8047_v8 }
 0x42f   :  { %2444 = vmatpush1.bf16.msra.mxu0 %v6598_v9  ;;  %2487 = vmatpush1.bf16.msra.mxu1 %v6601_v35  ;;  %v8159_v9 = vld [vmem:[#allocation72_spill] sm:$0xff]  ;;  %v8160_v35 = vld [vmem:[#allocation73_spill] sm:$0xff] }
 0x430   :  { %2445 = vmatprep.subr.bf16.mxu0 %v6604_v27  ;;  %2488 = vmatprep.subr.bf16.mxu1 %v6607_v0  ;;  %v8161_v27 = vld [vmem:[#allocation74_spill] sm:$0xff]  ;;  %v8162_v0 = vld [vmem:[#allocation75_spill] sm:$0xff] }
 0x433   :  { %2446 = vmatpush1.bf16.msra.mxu0 %v6610_v24  ;;  %2489 = vmatpush1.bf16.msra.mxu1 %v8153_v6  ;;  %v8163_v24 = vld [vmem:[#allocation76_spill] sm:$0xff]  ;;  %v8164_v6 = vld [vmem:[#allocation77_spill] sm:$0xff] }
 0x434   :  { %2447 = vmatprep.subr.bf16.mxu0 %v8154_v38  ;;  %2490 = vmatprep.subr.bf16.mxu1 %v8155_v23  ;;  %v8165_v38 = vld [vmem:[#allocation78_spill] sm:$0xff]  ;;  %v8166_v23 = vld [vmem:[#allocation79_spill] sm:$0xff] }
 0x437   :  { %2448 = vmatpush1.bf16.msra.mxu0 %v8156_v31  ;;  %2491 = vmatpush1.bf16.msra.mxu1 %v8157_v19  ;;  %v8167_v31 = vld [vmem:[#allocation80_spill] sm:$0xff]  ;;  %v8168_v19 = vld [vmem:[#allocation81_spill] sm:$0xff] }
 0x438   :  { %2449 = vmatprep.subr.bf16.mxu0 %v8158_v29  ;;  %2492 = vmatprep.subr.bf16.mxu1 %v8159_v9  ;;  %v8169_v29 = vld [vmem:[#allocation82_spill] sm:$0xff]  ;;  %v8170_v9 = vld [vmem:[#allocation83_spill] sm:$0xff] }
 0x43b   :  { %2450 = vmatpush1.bf16.msra.mxu0 %v8160_v35  ;;  %2493 = vmatpush1.bf16.msra.mxu1 %v8161_v27  ;;  %v8171_v35 = vld [vmem:[#allocation84_spill] sm:$0xff]  ;;  %v8172_v27 = vld [vmem:[#allocation85_spill] sm:$0xff] }
 0x43c   :  { %2451 = vmatprep.subr.bf16.mxu0 %v8162_v0  ;;  %2494 = vmatprep.subr.bf16.mxu1 %v8163_v24  ;;  %v8173_v0 = vld [vmem:[#allocation86_spill] sm:$0xff]  ;;  %v8174_v24 = vld [vmem:[#allocation87_spill] sm:$0xff] }
 0x43f   :  { %2452 = vmatpush1.bf16.msra.mxu0 %v8164_v6  ;;  %2495 = vmatpush1.bf16.msra.mxu1 %v8165_v38  ;;  %v8175_v6 = vld [vmem:[#allocation88_spill] sm:$0xff] }
 0x440   :  { %2453 = vmatprep.subr.bf16.mxu0 %v8166_v23  ;;  %2496 = vmatprep.subr.bf16.mxu1 %v8167_v31 }
 0x443   :  { %2454 = vmatpush1.bf16.msra.mxu0 %v8168_v19  ;;  %2497 = vmatpush1.bf16.msra.mxu1 %v8169_v29 }
 0x444   :  { %2455 = vmatprep.subr.bf16.mxu0 %v8170_v9  ;;  %2498 = vmatprep.subr.bf16.mxu1 %v8171_v35 }
 0x447   :  { %2456 = vmatpush1.bf16.msra.mxu0 %v8172_v27  ;;  %2499 = vmatpush1.bf16.msra.mxu1 %v8173_v0 }
 0x448   :  { %2527 = vmatprep.subr.bf16.mxu0 %v8174_v24  ;;  %2570 = vmatprep.subr.bf16.mxu1 %v8175_v6 }
 0x4dd   :  { %v2176_v38 = vpop.f32.mrb[44].mxu0  ;;  %v2219_v23 = vpop.f32.mrb[60].mxu1 }
 0x4de   :  { %v2228_v31 = vadd.f32 %v2176_v38, %v8176_v18  ;;  %v2178_v16 = vpop.f32.mrb[45].mxu0  ;;  %v2221_v19 = vpop.f32.mrb[61].mxu1 }
 0x4df   :  { %v2229_v29 = vadd.f32 %v2178_v16, %v8177_v5  ;;  %v2180_v34 = vpop.f32.mrb[46].mxu0  ;;  %v2223_v9 = vpop.f32.mrb[62].mxu1  ;;  %v2231_v38 = vadd.f32 %v2221_v19, %v8178_v32  ;;  %v8179_v16 = vld [vmem:[#allocation23_spill] sm:$0xff] }
 0x4e0   :  { %v4498_v47 = vmul.f32 -1.442695, %v2228_v31  ;;  %v2232_v35 = vadd.f32 %v2180_v34, %v8176_v18  ;;  %v2182_v27 = vpop.f32.mrb[47].mxu0  ;;  %v2225_v25 = vpop.f32.mrb[63].mxu1  ;;  %v2230_v33 = vadd.f32 %v2219_v23, %v8179_v16 }
 0x4e1   :  { %v4500_v0 = vmul.f32 -1.442695, %v2229_v29  ;;  %v2233_v24 = vadd.f32 %v2182_v27, %v8177_v5  ;;  %v2235_v10 = vadd.f32 %v2225_v25, %v8178_v32  ;;  %v4502_v31 = vmul.f32 -1.442695, %v2231_v38 }
 0x4e2   :  { %5010 = vpow2.f32 %v4498_v47  ;;  %v4499_v6 = vmul.f32 -1.442695, %v2232_v35  ;;  %v2234_v27 = vadd.f32 %v2223_v9, %v8179_v16 }
 0x4e3   :  { %5012 = vpow2.f32 %v4500_v0  ;;  %v4501_v11 = vmul.f32 -1.442695, %v2233_v24  ;;  %v4503_v51 = vmul.f32 -1.442695, %v2235_v10 }
 0x4e4   :  { %5014 = vpow2.f32 %v4499_v6 }
 0x4e5   :  { %5016 = vpow2.f32 %v4501_v11 }
 0x4e6   :  { %5018 = vtanh.f32 %v2230_v33 }
 0x4e7   :  { %5020 = vpow2.f32 %v4502_v31 }
 0x4e8   :  { %5022 = vpow2.f32 %v4503_v51  ;;  %v8180_v51 = vld [vmem:[#allocation52_spill] sm:$0xff] }
 0x4e9   :  { %v2375_v31 = vunpack.c.l.bf16 %v8180_v51 }
 0x4ec   :  { %v5011_v34 = vpop.eup %5010 }
 0x4ed   :  { %v5013_v18 = vpop.eup %5012  ;;  %v2242_v29 = vadd.f32 1.0, %v5011_v34 }
 0x4ee   :  { %v2254_v35 = vadd.f32 1.0, %v5013_v18  ;;  %v5015_v0 = vpop.eup %5014 }
 0x4ef   :  { %5024 = vrcp.f32 %v2242_v29  ;;  %v2243_v19 = vadd.f32 1.0, %v5015_v0  ;;  %v5017_v24 = vpop.eup %5016 }
 0x4f0   :  { %5026 = vrcp.f32 %v2254_v35  ;;  %v2255_v25 = vadd.f32 1.0, %v5017_v24  ;;  %v5019_v23 = vpop.eup %5018  ;;  %v8181_v35 = vld [vmem:[#allocation59_spill] sm:$0xff]  ;;  %v2379_v24 = vunpack.c.h.bf16 %v8180_v51 }
 0x4f1   :  { %5028 = vtanh.f32 %v2234_v27  ;;  %v5021_v11 = vpop.eup %5020  ;;  %v2377_v0 = vunpack.c.l.bf16 %v8181_v35  ;;  %v8182_v27 = vld [vmem:[#allocation54_spill] sm:$0xff]  ;;  %v2381_v36 = vunpack.c.h.bf16 %v8181_v35 }
 0x4f2   :  { %5030 = vrcp.f32 %v2243_v19  ;;  %v5023_v47 = vpop.eup %5022  ;;  %v2268_v18 = vadd.f32 1.0, %v5021_v11  ;;  %v2376_v19 = vunpack.c.l.bf16 %v8182_v27 }
 0x4f3   :  { %5032 = vrcp.f32 %v2255_v25  ;;  %v2269_v29 = vadd.f32 1.0, %v5023_v47 }
 0x4f4   :  { %5034 = vrcp.f32 %v2268_v18 }
 0x4f5   :  { %5036 = vrcp.f32 %v2269_v29 }
 0x4f9   :  { %v5025_v33 = vpop.eup %5024 }
 0x4fa   :  { %v5027_v10 = vpop.eup %5026  ;;  %v2276_v6 = vmul.f32 %v5025_v33, %v5019_v23  ;;  %v8183_v23 = vld [vmem:[#allocation61_spill] sm:$0xff] }
 0x4fb   :  { %v5029_v38 = vpop.eup %5028  ;;  %v2274_v9 = vmul.f32 %v5027_v10, %v6695_v20  ;;  %v2378_v33 = vunpack.c.l.bf16 %v8183_v23  ;;  %v2380_v20 = vunpack.c.h.bf16 %v8182_v27  ;;  %v2382_v26 = vunpack.c.h.bf16 %v8183_v23 }
 0x4fc   :  { %v5031_v34 = vpop.eup %5030 }
 0x4fd   :  { %v6915_v25 = vadd.f32 %v2276_v6, %v2274_v9  ;;  %v2277_v16 = vmul.f32 %v5031_v34, %v5029_v38  ;;  %v2323_v32 = vpop.f32.mrb[48].mxu0  ;;  %v2366_v5 = vpop.f32.mrb[64].mxu1 }
 0x4fe   :  { %v5033_v11 = vpop.eup %5032  ;;  %v2383_v10 = vadd.f32 %v2375_v31, %v2323_v32  ;;  %v2385_v54 = vadd.f32 %v2377_v0, %v2366_v5  ;;  %v2325_v42 = vpop.f32.mrb[49].mxu0 }
 0x4ff   :  { %v2368_v47 = vpop.f32.mrb[65].mxu1  ;;  %v2275_v6 = vmul.f32 %v5033_v11, %v6703_v49  ;;  %v2384_v9 = vadd.f32 %v2376_v19, %v2325_v42  ;;  %v2327_v51 = vpop.f32.mrb[50].mxu0  ;;  %5038 = vtanh.f32 %v6915_v25 }
 0x500   :  { %v2386_v38 = vadd.f32 %v2378_v33, %v2368_v47  ;;  %v2370_v34 = vpop.f32.mrb[66].mxu1  ;;  %v4504_v17 = vmul.f32 -1.442695, %v2383_v10  ;;  %v2387_v45 = vadd.f32 %v2379_v24, %v2327_v51  ;;  %v2329_v44 = vpop.f32.mrb[51].mxu0 }
 0x501   :  { %v2389_v27 = vadd.f32 %v2381_v36, %v2370_v34  ;;  %v2372_v32 = vpop.f32.mrb[67].mxu1  ;;  %v6923_v5 = vadd.f32 %v2277_v16, %v2275_v6  ;;  %v4506_v31 = vmul.f32 -1.442695, %v2384_v9  ;;  %v2388_v35 = vadd.f32 %v2380_v20, %v2329_v44  ;;  %v5035_v42 = vpop.eup %5034 }
 0x502   :  { %5040 = vpow2.f32 %v4504_v17  ;;  %v4505_v18 = vmul.f32 -1.442695, %v2387_v45  ;;  %v2390_v0 = vadd.f32 %v2382_v26, %v2372_v32  ;;  %v5037_v29 = vpop.eup %5036  ;;  %v4508_v36 = vmul.f32 -1.442695, %v2386_v38 }
 0x503   :  { %5042 = vtanh.f32 %v6923_v5  ;;  %v4507_v49 = vmul.f32 -1.442695, %v2388_v35 }
 0x504   :  { %5044 = vpow2.f32 %v4506_v31  ;;  %v4509_v44 = vmul.f32 -1.442695, %v2390_v0 }
 0x505   :  { %5046 = vpow2.f32 %v4505_v18 }
 0x506   :  { %5048 = vpow2.f32 %v4507_v49 }
 0x507   :  { %5050 = vtanh.f32 %v2385_v54 }
 0x508   :  { %5052 = vpow2.f32 %v4508_v36  ;;  %v8189_v36 = vld [vmem:[#allocation57_spill] sm:$0xff] }
 0x509   :  { %v5039_v19 = vpop.eup %5038 }
 0x50a   :  { %v2282_v17 = vmul.f32 %v5039_v19, %v5035_v42  ;;  %v8190_v19 = vld [vmem:[#allocation89_spill] sm:$0xff] }
 0x50c   :  { %v5041_v24 = vpop.eup %5040 }
 0x50d   :  { %v5043_v23 = vpop.eup %5042  ;;  %v2397_v33 = vadd.f32 1.0, %v5041_v24  ;;  %v8191_v24 = vld [vmem:[#allocation90_spill] sm:$0xff] }
 0x50e   :  { %v5045_v16 = vpop.eup %5044  ;;  %v2283_v45 = vmul.f32 %v5043_v23, %v5037_v29  ;;  %v8188_v29 = vld [vmem:[#allocation50_spill] sm:$0xff]  ;;  %v8192_v23 = vld [vmem:[#allocation91_spill] sm:$0xff] }
 0x50f   :  { %5054 = vrcp.f32 %v2397_v33  ;;  %v2409_v26 = vadd.f32 1.0, %v5045_v16  ;;  %v5047_v20 = vpop.eup %5046  ;;  %v8193_v33 = vld [vmem:[#allocation92_spill] sm:$0xff]  ;;  %v8194_v16 = vld [vmem:[#allocation93_spill] sm:$0xff] }
 0x510   :  { %5056 = vtanh.f32 %v2389_v27  ;;  %v2440_v11 = vpack.c.bf16 %v2283_v45, %v2282_v17  ;;  %v2398_v10 = vadd.f32 1.0, %v5047_v20  ;;  %v5049_v47 = vpop.eup %5048  ;;  %v8196_v17 = vld [vmem:[#allocation95_spill] sm:$0xff]  ;;  %v8197_v45 = vld [vmem:[#allocation96_spill] sm:$0xff]  ;;  %v8199_v20 = vld [vmem:[#allocation98_spill] sm:$0xff] }
 0x511   :  { %5058 = vrcp.f32 %v2409_v26  ;;  %v2410_v6 = vadd.f32 1.0, %v5049_v47  ;;  %v5051_v54 = vpop.eup %5050  ;;  %v8198_v26 = vld [vmem:[#allocation97_spill] sm:$0xff] }
 0x512   :  { %5060 = vpow2.f32 %v4509_v44  ;;  %2474 = vmatmul.mubr.bf16.vlgmr.msra.gmra.mrb[52].mxu0 %v2440_v11  ;;  %2517 = vmatmul.mubr.bf16.vlgmr.msra.gmra.mrb[68].mxu1 %v2440_v11  ;;  %v5053_v9 = vpop.eup %5052  ;;  %v8195_v44 = vld [vmem:[#allocation94_spill] sm:$0xff]  ;;  %v8200_v11 = vld [vmem:[#allocation99_spill] sm:$0xff]  ;;  %v8202_v47 = vld [vmem:[#allocation101_spill] sm:$0xff] }
 0x513   :  { %5062 = vrcp.f32 %v2398_v10  ;;  %2528 = vmatpush1.bf16.msra.mxu0 %v6466_v53  ;;  %2571 = vmatpush1.bf16.msra.mxu1 %v6469_v43  ;;  %v2423_v31 = vadd.f32 1.0, %v5053_v9  ;;  %v8201_v10 = vld [vmem:[#allocation100_spill] sm:$0xff] }
 0x514   :  { %2529 = vmatprep.subr.bf16.mxu0 %v6708_v14  ;;  %2572 = vmatprep.subr.bf16.mxu1 %v6711_v4  ;;  %5064 = vrcp.f32 %v2410_v6  ;;  %v8203_v6 = vld [vmem:[#allocation102_spill] sm:$0xff]  ;;  %v8205_v9 = vld [vmem:[#allocation104_spill] sm:$0xff] }
 0x515   :  { %2559 = vmatprep.mubr.bf16.mxu0 %v8047_v8  ;;  %2602 = vmatprep.mubr.bf16.mxu1 %v8047_v8  ;;  %5066 = vrcp.f32 %v2423_v31  ;;  %v8213_v31 = vld [vmem:[#allocation24_spill] sm:$0xff] }
 0x517   :  { %2530 = vmatpush1.bf16.msra.mxu0 %v6716_v28  ;;  %2573 = vmatpush1.bf16.msra.mxu1 %v6719_v62 }
 0x518   :  { %2531 = vmatprep.subr.bf16.mxu0 %v6722_v1  ;;  %2574 = vmatprep.subr.bf16.mxu1 %v6725_v12 }
 0x519   :  { %v5055_v53 = vpop.eup %5054 }
 0x51a   :  { %v5057_v43 = vpop.eup %5056  ;;  %v2431_v38 = vmul.f32 %v5055_v53, %v5051_v54  ;;  %v8204_v54 = vld [vmem:[#allocation103_spill] sm:$0xff]  ;;  %v8206_v53 = vld [vmem:[#allocation105_spill] sm:$0xff] }
 0x51b   :  { %v5059_v51 = vpop.eup %5058  ;;  %2532 = vmatpush1.bf16.msra.mxu0 %v6728_v41  ;;  %2575 = vmatpush1.bf16.msra.mxu1 %v6731_v13 }
 0x51c   :  { %v5061_v34 = vpop.eup %5060  ;;  %v2429_v27 = vmul.f32 %v5059_v51, %v6741_v15  ;;  %2533 = vmatprep.subr.bf16.mxu0 %v6735_v22  ;;  %2576 = vmatprep.subr.bf16.mxu1 %v6738_v52  ;;  %v8209_v51 = vld [vmem:[#allocation48_spill] sm:$0xff] }
 0x51d   :  { %v5063_v32 = vpop.eup %5062  ;;  %v2424_v49 = vadd.f32 1.0, %v5061_v34  ;;  %v8210_v34 = vld [vmem:[#allocation107_spill] sm:$0xff] }
 0x51e   :  { %v6941_v35 = vadd.f32 %v2431_v38, %v2429_v27  ;;  %v2432_v18 = vmul.f32 %v5063_v32, %v5057_v43  ;;  %v5065_v0 = vpop.eup %5064  ;;  %v8207_v43 = vld [vmem:[#allocation51_spill] sm:$0xff]  ;;  %v8208_v38 = vld [vmem:[#allocation106_spill] sm:$0xff]  ;;  %v8211_v27 = vld [vmem:[#allocation53_spill] sm:$0xff] }
 0x51f   :  { %2534 = vmatpush1.bf16.msra.mxu0 %v6487_v48  ;;  %2577 = vmatpush1.bf16.msra.mxu1 %v6490_v50  ;;  %v2430_v42 = vmul.f32 %v5065_v0, %v6753_v46  ;;  %v5067_v48 = vpop.eup %5066  ;;  %v8187_v46 = vld [vmem:[#allocation55_spill] sm:$0xff]  ;;  %v8212_v32 = vld [vmem:[#allocation108_spill] sm:$0xff]  ;;  %v8215_v0 = vld [vmem:[#allocation25_spill] sm:$0xff] }
 0x520   :  { %2535 = vmatprep.subr.bf16.mxu0 %v6746_v7  ;;  %2578 = vmatprep.subr.bf16.mxu1 %v6749_v30  ;;  %5068 = vtanh.f32 %v6941_v35 }
 0x521   :  { %v6949_v15 = vadd.f32 %v2432_v18, %v2430_v42  ;;  %5070 = vrcp.f32 %v2424_v49  ;;  %v8214_v18 = vld [vmem:[#allocation109_spill] sm:$0xff]  ;;  %v8216_v49 = vld [vmem:[#allocation26_spill] sm:$0xff]  ;;  %v8217_v42 = vld [vmem:[#allocation27_spill] sm:$0xff] }
 0x523   :  { %2536 = vmatpush1.bf16.msra.mxu0 %v6499_v55  ;;  %2579 = vmatpush1.bf16.msra.mxu1 %v6502_v56  ;;  %5072 = vtanh.f32 %v6949_v15 }
 0x524   :  { %2537 = vmatprep.subr.bf16.mxu0 %v6506_v37  ;;  %2580 = vmatprep.subr.bf16.mxu1 %v6509_v58 }
 0x527   :  { %2538 = vmatpush1.bf16.msra.mxu0 %v6512_v59  ;;  %2581 = vmatpush1.bf16.msra.mxu1 %v6515_v61  ;;  %v8184_v59 = vld [vmem:[#allocation42_spill] sm:$0xff] }
 0x528   :  { %2539 = vmatprep.subr.bf16.mxu0 %v6518_v2  ;;  %2582 = vmatprep.subr.bf16.mxu1 %v6521_v63  ;;  %v8185_v61 = vld [vmem:[#allocation46_spill] sm:$0xff]  ;;  %v8186_v63 = vld [vmem:[#allocation49_spill] sm:$0xff] }
 0x52a   :  { %v5069_v50 = vpop.eup %5068 }
 0x52b   :  { %2540 = vmatpush1.bf16.msra.mxu0 %v6764_v40  ;;  %2583 = vmatpush1.bf16.msra.mxu1 %v6767_v39  ;;  %v5071_v55 = vpop.eup %5070  ;;  %v2437_v37 = vmul.f32 %v5069_v50, %v5067_v48  ;;  %v8218_v48 = vld [vmem:[#allocation28_spill] sm:$0xff]  ;;  %v8219_v50 = vld [vmem:[#allocation29_spill] sm:$0xff] }
 0x52c   :  { %2541 = vmatprep.subr.bf16.mxu0 %v6770_v3  ;;  %2584 = vmatprep.subr.bf16.mxu1 %v6773_v57 }
 0x52d   :  { %v5073_v56 = vpop.eup %5072 }
 0x52e   :  { %v2438_v58 = vmul.f32 %v5073_v56, %v5071_v55  ;;  %v8220_v55 = vld [vmem:[#allocation30_spill] sm:$0xff]  ;;  %v8221_v56 = vld [vmem:[#allocation31_spill] sm:$0xff] }
 0x52f   :  { %2542 = vmatpush1.bf16.msra.mxu0 %v6776_v60  ;;  %2585 = vmatpush1.bf16.msra.mxu1 %v6779_v21 }
 0x530   :  { %2674 = vmatprep.subr.bf16.mxu0 %v8184_v59  ;;  %2717 = vmatprep.subr.bf16.mxu1 %v8185_v61  ;;  %v2439_v2 = vpack.c.bf16 %v2438_v58, %v2437_v37  ;;  %v8222_v37 = vld [vmem:[#allocation32_spill] sm:$0xff]  ;;  %v8223_v58 = vld [vmem:[#allocation33_spill] sm:$0xff]  ;;  %v8224_v59 = vld [vmem:[#allocation34_spill] sm:$0xff] }
 0x531   :  { %v8225_v61 = vld [vmem:[#allocation35_spill] sm:$0xff] }
 0x532   :  { %2560 = vmatmul.mubr.bf16.vlgmr.msra.gmra.mrb[52].mxu0 %v2439_v2  ;;  %2603 = vmatmul.mubr.bf16.vlgmr.msra.gmra.mrb[68].mxu1 %v2439_v2 }
 0x533   :  { %2675 = vmatpush1.bf16.msra.mxu0 %v8186_v63  ;;  %2718 = vmatpush1.bf16.msra.mxu1 %v8187_v46 }
 0x534   :  { %2676 = vmatprep.subr.bf16.mxu0 %v8188_v29  ;;  %2719 = vmatprep.subr.bf16.mxu1 %v8189_v36 }
 0x535   :  { %2706 = vmatprep.mubr.bf16.mxu0 %v8047_v8  ;;  %2749 = vmatprep.mubr.bf16.mxu1 %v8047_v8 }
 0x537   :  { %2677 = vmatpush1.bf16.msra.mxu0 %v8190_v19  ;;  %2720 = vmatpush1.bf16.msra.mxu1 %v8191_v24 }
 0x538   :  { %2678 = vmatprep.subr.bf16.mxu0 %v8192_v23  ;;  %2721 = vmatprep.subr.bf16.mxu1 %v8193_v33 }
 0x53b   :  { %2679 = vmatpush1.bf16.msra.mxu0 %v8194_v16  ;;  %2722 = vmatpush1.bf16.msra.mxu1 %v8195_v44 }
 0x53c   :  { %2680 = vmatprep.subr.bf16.mxu0 %v8196_v17  ;;  %2723 = vmatprep.subr.bf16.mxu1 %v8197_v45 }
 0x53f   :  { %2681 = vmatpush1.bf16.msra.mxu0 %v8198_v26  ;;  %2724 = vmatpush1.bf16.msra.mxu1 %v8199_v20 }
 0x540   :  { %2682 = vmatprep.subr.bf16.mxu0 %v8200_v11  ;;  %2725 = vmatprep.subr.bf16.mxu1 %v8201_v10 }
 0x543   :  { %2683 = vmatpush1.bf16.msra.mxu0 %v8202_v47  ;;  %2726 = vmatpush1.bf16.msra.mxu1 %v8203_v6 }
 0x544   :  { %2684 = vmatprep.subr.bf16.mxu0 %v8204_v54  ;;  %2727 = vmatprep.subr.bf16.mxu1 %v8205_v9 }
 0x547   :  { %2685 = vmatpush1.bf16.msra.mxu0 %v8206_v53  ;;  %2728 = vmatpush1.bf16.msra.mxu1 %v8207_v43  ;;  %v8227_v43 = vld [vmem:[#allocation37_spill] sm:$0xff] }
 0x548   :  { %2686 = vmatprep.subr.bf16.mxu0 %v8208_v38  ;;  %2729 = vmatprep.subr.bf16.mxu1 %v8209_v51  ;;  %v8228_v51 = vld [vmem:[#allocation38_spill] sm:$0xff] }
 0x54b   :  { %2687 = vmatpush1.bf16.msra.mxu0 %v8210_v34  ;;  %2730 = vmatpush1.bf16.msra.mxu1 %v8211_v27  ;;  %v8229_v27 = vld [vmem:[#allocation39_spill] sm:$0xff]  ;;  %v8252_v34 = vld [vmem:[#allocation22_spill] sm:$0xff] }
 0x54c   :  { %2688 = vmatprep.subr.bf16.mxu0 %v8212_v32  ;;  %2731 = vmatprep.subr.bf16.mxu1 %v8213_v31  ;;  %v8230_v31 = vld [vmem:[#allocation40_spill] sm:$0xff] }
 0x54f   :  { %2689 = vmatpush1.bf16.msra.mxu0 %v8214_v18  ;;  %2732 = vmatpush1.bf16.msra.mxu1 %v8215_v0  ;;  %v8231_v0 = vld [vmem:[#allocation41_spill] sm:$0xff] }
 0x550   :  { %2826 = vmatprep.subr.bf16.mxu0 %v8216_v49  ;;  %2869 = vmatprep.subr.bf16.mxu1 %v8217_v42  ;;  %v8232_v49 = vld [vmem:[#allocation71_spill] sm:$0xff]  ;;  %v8233_v42 = vld [vmem:[#allocation72_spill] sm:$0xff] }
 0x552   :  { %2707 = vmatmul.mubr.bf16.vlgmr.msra.gmra.mrb[56].mxu0 %v2439_v2  ;;  %2750 = vmatmul.mubr.bf16.vlgmr.msra.gmra.mrb[72].mxu1 %v2439_v2  ;;  %v8226_v2 = vld [vmem:[#allocation36_spill] sm:$0xff] }
 0x553   :  { %2827 = vmatpush1.bf16.msra.mxu0 %v8218_v48  ;;  %2870 = vmatpush1.bf16.msra.mxu1 %v8219_v50  ;;  %v8234_v48 = vld [vmem:[#allocation73_spill] sm:$0xff]  ;;  %v8235_v50 = vld [vmem:[#allocation74_spill] sm:$0xff] }
 0x554   :  { %2828 = vmatprep.subr.bf16.mxu0 %v8220_v55  ;;  %2871 = vmatprep.subr.bf16.mxu1 %v8221_v56  ;;  %v8236_v55 = vld [vmem:[#allocation75_spill] sm:$0xff]  ;;  %v8237_v56 = vld [vmem:[#allocation76_spill] sm:$0xff] }
 0x555   :  { %2858 = vmatprep.mubr.bf16.mxu0 %v8047_v8  ;;  %2901 = vmatprep.mubr.bf16.mxu1 %v8047_v8 }
 0x557   :  { %2829 = vmatpush1.bf16.msra.mxu0 %v8222_v37  ;;  %2872 = vmatpush1.bf16.msra.mxu1 %v8223_v58  ;;  %v8238_v37 = vld [vmem:[#allocation77_spill] sm:$0xff]  ;;  %v8239_v58 = vld [vmem:[#allocation78_spill] sm:$0xff] }
 0x558   :  { %2830 = vmatprep.subr.bf16.mxu0 %v8224_v59  ;;  %2873 = vmatprep.subr.bf16.mxu1 %v8225_v61  ;;  %v8240_v59 = vld [vmem:[#allocation79_spill] sm:$0xff]  ;;  %v8241_v61 = vld [vmem:[#allocation80_spill] sm:$0xff] }
 0x55b   :  { %2831 = vmatpush1.bf16.msra.mxu0 %v8226_v2  ;;  %2874 = vmatpush1.bf16.msra.mxu1 %v8227_v43  ;;  %v8242_v2 = vld [vmem:[#allocation81_spill] sm:$0xff]  ;;  %v8243_v43 = vld [vmem:[#allocation82_spill] sm:$0xff] }
 0x55c   :  { %2832 = vmatprep.subr.bf16.mxu0 %v8228_v51  ;;  %2875 = vmatprep.subr.bf16.mxu1 %v8229_v27  ;;  %v8244_v51 = vld [vmem:[#allocation83_spill] sm:$0xff]  ;;  %v8245_v27 = vld [vmem:[#allocation84_spill] sm:$0xff] }
 0x55f   :  { %2833 = vmatpush1.bf16.msra.mxu0 %v8230_v31  ;;  %2876 = vmatpush1.bf16.msra.mxu1 %v8231_v0  ;;  %v8246_v31 = vld [vmem:[#allocation85_spill] sm:$0xff]  ;;  %v8247_v0 = vld [vmem:[#allocation86_spill] sm:$0xff] }
 0x560   :  { %2834 = vmatprep.subr.bf16.mxu0 %v8232_v49  ;;  %2877 = vmatprep.subr.bf16.mxu1 %v8233_v42  ;;  %v8248_v49 = vld [vmem:[#allocation87_spill] sm:$0xff]  ;;  %v8249_v42 = vld [vmem:[#allocation88_spill] sm:$0xff] }
 0x563   :  { %2835 = vmatpush1.bf16.msra.mxu0 %v8234_v48  ;;  %2878 = vmatpush1.bf16.msra.mxu1 %v8235_v50 }
 0x564   :  { %2836 = vmatprep.subr.bf16.mxu0 %v8236_v55  ;;  %2879 = vmatprep.subr.bf16.mxu1 %v8237_v56  ;;  %v8250_v55 = vld [vmem:[#allocation20_spill] sm:$0xff] }
 0x567   :  { %2837 = vmatpush1.bf16.msra.mxu0 %v8238_v37  ;;  %2880 = vmatpush1.bf16.msra.mxu1 %v8239_v58 }
 0x568   :  { %2838 = vmatprep.subr.bf16.mxu0 %v8240_v59  ;;  %2881 = vmatprep.subr.bf16.mxu1 %v8241_v61  ;;  %v8251_v59 = vld [vmem:[#allocation21_spill] sm:$0xff] }
 0x56b   :  { %2839 = vmatpush1.bf16.msra.mxu0 %v8242_v2  ;;  %2882 = vmatpush1.bf16.msra.mxu1 %v8243_v43 }
 0x56c   :  { %2840 = vmatprep.subr.bf16.mxu0 %v8244_v51  ;;  %2883 = vmatprep.subr.bf16.mxu1 %v8245_v27 }
 0x56f   :  { %2841 = vmatpush1.bf16.msra.mxu0 %v8246_v31  ;;  %2884 = vmatpush1.bf16.msra.mxu1 %v8247_v0 }
 0x570   :  { %2912 = vmatprep.subr.bf16.mxu0 %v8248_v49  ;;  %2955 = vmatprep.subr.bf16.mxu1 %v8249_v42 }
 0x605   :  { %v2561_v48 = vpop.f32.mrb[52].mxu0  ;;  %v2604_v50 = vpop.f32.mrb[68].mxu1 }
 0x606   :  { %v2613_v56 = vadd.f32 %v2561_v48, %v8250_v55  ;;  %v2563_v37 = vpop.f32.mrb[53].mxu0  ;;  %v2606_v58 = vpop.f32.mrb[69].mxu1 }
 0x607   :  { %v2614_v61 = vadd.f32 %v2563_v37, %v8251_v59  ;;  %v2565_v2 = vpop.f32.mrb[54].mxu0  ;;  %v2608_v43 = vpop.f32.mrb[70].mxu1  ;;  %v2616_v48 = vadd.f32 %v2606_v58, %v8252_v34  ;;  %v8253_v37 = vld [vmem:[#allocation23_spill] sm:$0xff] }
 0x608   :  { %v4510_v51 = vmul.f32 -1.442695, %v2613_v56  ;;  %v2617_v27 = vadd.f32 %v2565_v2, %v8250_v55  ;;  %v2567_v31 = vpop.f32.mrb[55].mxu0  ;;  %v2610_v18 = vpop.f32.mrb[71].mxu1  ;;  %v2615_v53 = vadd.f32 %v2604_v50, %v8253_v37 }
 0x609   :  { %v4512_v0 = vmul.f32 -1.442695, %v2614_v61  ;;  %v2618_v49 = vadd.f32 %v2567_v31, %v8251_v59  ;;  %v2620_v38 = vadd.f32 %v2610_v18, %v8252_v34  ;;  %v4514_v56 = vmul.f32 -1.442695, %v2616_v48 }
 0x60a   :  { %5074 = vpow2.f32 %v4510_v51  ;;  %v4511_v42 = vmul.f32 -1.442695, %v2617_v27  ;;  %v2619_v51 = vadd.f32 %v2608_v43, %v8253_v37 }
 0x60b   :  { %5076 = vpow2.f32 %v4512_v0  ;;  %v4513_v32 = vmul.f32 -1.442695, %v2618_v49  ;;  %v4515_v9 = vmul.f32 -1.442695, %v2620_v38 }
 0x60c   :  { %5078 = vpow2.f32 %v4511_v42 }
 0x60d   :  { %5080 = vpow2.f32 %v4513_v32 }
 0x60e   :  { %5082 = vtanh.f32 %v2615_v53 }
 0x60f   :  { %5084 = vpow2.f32 %v4514_v56 }
 0x610   :  { %5086 = vpow2.f32 %v4515_v9  ;;  %v8254_v9 = vld [vmem:[#allocation56_spill] sm:$0xff] }
 0x611   :  { %v2760_v56 = vunpack.c.l.bf16 %v8254_v9 }
 0x614   :  { %v5075_v2 = vpop.eup %5074 }
 0x615   :  { %v5077_v55 = vpop.eup %5076  ;;  %v2627_v61 = vadd.f32 1.0, %v5075_v2 }
 0x616   :  { %v2639_v27 = vadd.f32 1.0, %v5077_v55  ;;  %v5079_v31 = vpop.eup %5078 }
 0x617   :  { %5088 = vrcp.f32 %v2627_v61  ;;  %v2628_v58 = vadd.f32 1.0, %v5079_v31  ;;  %v5081_v0 = vpop.eup %5080 }
 0x618   :  { %5090 = vrcp.f32 %v2639_v27  ;;  %v2640_v32 = vadd.f32 1.0, %v5081_v0  ;;  %v5083_v18 = vpop.eup %5082  ;;  %v8255_v27 = vld [vmem:[#allocation63_spill] sm:$0xff]  ;;  %v2764_v0 = vunpack.c.h.bf16 %v8254_v9 }
 0x619   :  { %5092 = vtanh.f32 %v2619_v51  ;;  %v5085_v38 = vpop.eup %5084  ;;  %v2762_v31 = vunpack.c.l.bf16 %v8255_v27  ;;  %v8256_v51 = vld [vmem:[#allocation58_spill] sm:$0xff]  ;;  %v2766_v47 = vunpack.c.h.bf16 %v8255_v27 }
 0x61a   :  { %5094 = vrcp.f32 %v2628_v58  ;;  %v5087_v50 = vpop.eup %5086  ;;  %v2653_v55 = vadd.f32 1.0, %v5085_v38  ;;  %v2761_v58 = vunpack.c.l.bf16 %v8256_v51 }
 0x61b   :  { %5096 = vrcp.f32 %v2640_v32  ;;  %v2654_v61 = vadd.f32 1.0, %v5087_v50 }
 0x61c   :  { %5098 = vrcp.f32 %v2653_v55 }
 0x61d   :  { %5100 = vrcp.f32 %v2654_v61 }
 0x621   :  { %v5089_v53 = vpop.eup %5088 }
 0x622   :  { %v5091_v49 = vpop.eup %5090  ;;  %v2661_v42 = vmul.f32 %v5089_v53, %v5083_v18  ;;  %v8257_v18 = vld [vmem:[#allocation64_spill] sm:$0xff] }
 0x623   :  { %v5093_v48 = vpop.eup %5092  ;;  %v2659_v43 = vmul.f32 %v5091_v49, %v6915_v25  ;;  %v2763_v53 = vunpack.c.l.bf16 %v8257_v18  ;;  %v2765_v25 = vunpack.c.h.bf16 %v8256_v51  ;;  %v2767_v10 = vunpack.c.h.bf16 %v8257_v18 }
 0x624   :  { %v5095_v2 = vpop.eup %5094 }
 0x625   :  { %v7049_v32 = vadd.f32 %v2661_v42, %v2659_v43  ;;  %v2662_v37 = vmul.f32 %v5095_v2, %v5093_v48  ;;  %v2708_v34 = vpop.f32.mrb[56].mxu0  ;;  %v2751_v59 = vpop.f32.mrb[72].mxu1 }
 0x626   :  { %v5097_v38 = vpop.eup %5096  ;;  %v2768_v49 = vadd.f32 %v2760_v56, %v2708_v34  ;;  %v2770_v54 = vadd.f32 %v2762_v31, %v2751_v59  ;;  %v2710_v6 = vpop.f32.mrb[57].mxu0 }
 0x627   :  { %v2753_v50 = vpop.f32.mrb[73].mxu1  ;;  %v2660_v42 = vmul.f32 %v5097_v38, %v6923_v5  ;;  %v2769_v43 = vadd.f32 %v2761_v58, %v2710_v6  ;;  %v2712_v9 = vpop.f32.mrb[58].mxu0  ;;  %5102 = vtanh.f32 %v7049_v32 }
 0x628   :  { %v2771_v48 = vadd.f32 %v2763_v53, %v2753_v50  ;;  %v2755_v2 = vpop.f32.mrb[74].mxu1  ;;  %v4516_v11 = vmul.f32 -1.442695, %v2768_v49  ;;  %v2772_v20 = vadd.f32 %v2764_v0, %v2712_v9  ;;  %v2714_v26 = vpop.f32.mrb[59].mxu0 }
 0x629   :  { %v2774_v51 = vadd.f32 %v2766_v47, %v2755_v2  ;;  %v2757_v34 = vpop.f32.mrb[75].mxu1  ;;  %v7057_v59 = vadd.f32 %v2662_v37, %v2660_v42  ;;  %v4518_v56 = vmul.f32 -1.442695, %v2769_v43  ;;  %v2773_v27 = vadd.f32 %v2765_v25, %v2714_v26  ;;  %v5099_v6 = vpop.eup %5098  ;;  %v7060_v43 = vld [vmem:[#allocation9] ss:$16 sps:$4 sm:$0xff]  }
 0x62a   :  { %5104 = vpow2.f32 %v4516_v11  ;;  %v4517_v55 = vmul.f32 -1.442695, %v2772_v20  ;;  %v2775_v31 = vadd.f32 %v2767_v10, %v2757_v34  ;;  %v5101_v61 = vpop.eup %5100  ;;  %v4520_v47 = vmul.f32 -1.442695, %v2771_v48 }
 0x62b   :  { %5106 = vtanh.f32 %v7057_v59  ;;  %v4519_v5 = vmul.f32 -1.442695, %v2773_v27 }
 0x62c   :  { %5108 = vpow2.f32 %v4518_v56  ;;  %v4521_v26 = vmul.f32 -1.442695, %v2775_v31  ;;  %v7081_v31 = vld [vmem:[#allocation9 + $0x60] ss:$16 sps:$4 sm:$0xff]  }
 0x62d   :  { %5110 = vpow2.f32 %v4517_v55 }
 0x62e   :  { %5112 = vpow2.f32 %v4519_v5  ;;  %v7109_v5 = vld [vmem:[#allocation9 + $0xa8] ss:$16 sps:$4 sm:$0xff]  }
 0x62f   :  { %5114 = vtanh.f32 %v2770_v54  ;;  %v7063_v54 = vld [vmem:[#allocation9 + $0x8] ss:$16 sps:$4 sm:$0xff]  }
 0x630   :  { %5116 = vpow2.f32 %v4520_v47 }
 0x631   :  { %v5103_v58 = vpop.eup %5102 }
 0x632   :  { %v2667_v11 = vmul.f32 %v5103_v58, %v5099_v6  ;;  %v7112_v6 = vld [vmem:[#allocation9 + $0xc4] ss:$16 sps:$4 sm:$0xff]  }
 0x634   :  { %v5105_v0 = vpop.eup %5104 }
 0x635   :  { %v5107_v18 = vpop.eup %5106  ;;  %v2782_v53 = vadd.f32 1.0, %v5105_v0 }
 0x636   :  { %v5109_v37 = vpop.eup %5108  ;;  %v2668_v20 = vmul.f32 %v5107_v18, %v5101_v61  ;;  %v7115_v61 = vld [vmem:[#allocation9 + $0xcc] ss:$16 sps:$4 sm:$0xff]  }
 0x637   :  { %5118 = vrcp.f32 %v2782_v53  ;;  %v2794_v10 = vadd.f32 1.0, %v5109_v37  ;;  %v5111_v25 = vpop.eup %5110 }
 0x638   :  { %5120 = vtanh.f32 %v2774_v51  ;;  %v2825_v38 = vpack.c.bf16 %v2668_v20, %v2667_v11  ;;  %v2783_v49 = vadd.f32 1.0, %v5111_v25  ;;  %v5113_v50 = vpop.eup %5112  ;;  %v8276_v11 = vld [vmem:[#allocation109_spill] sm:$0xff] }
 0x639   :  { %5122 = vrcp.f32 %v2794_v10  ;;  %v2795_v42 = vadd.f32 1.0, %v5113_v50  ;;  %v5115_v48 = vpop.eup %5114  ;;  %v7169_v20 = vld [vmem:[#allocation8 + $0xe8] ss:$16 sps:$4 sm:$0xff]   ;;  %v7172_v10 = vld [vmem:[#allocation11 + $0x4] ss:$16 sps:$4 sm:$0xff]  }
 0x63a   :  { %5124 = vpow2.f32 %v4521_v26  ;;  %2859 = vmatmul.mubr.bf16.vlgmr.msra.gmra.mrb[60].mxu0 %v2825_v38  ;;  %2902 = vmatmul.mubr.bf16.vlgmr.msra.gmra.mrb[76].mxu1 %v2825_v38  ;;  %v5117_v9 = vpop.eup %5116  ;;  %v7124_v26 = vld [vmem:[#allocation8 + $0x4] ss:$16 sps:$4 sm:$0xff]   ;;  %8277 = vst [vmem:[#allocation49_spill] sm:$0xff] %v7169_v20  ;;  %8278 = vst [vmem:[#allocation55_spill] sm:$0xff] %v7172_v10  ;;  %v7175_v25 = vld [vmem:[#allocation11 + $0xc] ss:$16 sps:$4 sm:$0xff]  }
 0x63b   :  { %5126 = vrcp.f32 %v2783_v49  ;;  %2913 = vmatpush1.bf16.msra.mxu0 %v7060_v43  ;;  %2956 = vmatpush1.bf16.msra.mxu1 %v7063_v54  ;;  %8258 = vst [vmem:[#allocation52_spill] sm:$0xff] %v7124_v26  ;;  %8279 = vst [vmem:[#allocation50_spill] sm:$0xff] %v7175_v25  ;;  %v7178_v38 = vld [vmem:[#allocation11] ss:$16 sps:$4 sm:$0xff]   ;;  %v7181_v49 = vld [vmem:[#allocation11 + $0x8] ss:$16 sps:$4 sm:$0xff]  }
 0x63c   :  { %2914 = vmatprep.subr.bf16.mxu0 %v6708_v14  ;;  %2957 = vmatprep.subr.bf16.mxu1 %v6711_v4  ;;  %5128 = vrcp.f32 %v2795_v42  ;;  %8280 = vst [vmem:[#allocation57_spill] sm:$0xff] %v7178_v38  ;;  %8281 = vst [vmem:[#allocation89_spill] sm:$0xff] %v7181_v49  ;;  %v7184_v50 = vld [vmem:[#allocation11 + $0x24] ss:$16 sps:$4 sm:$0xff]   ;;  %v7187_v42 = vld [vmem:[#allocation11 + $0x2c] ss:$16 sps:$4 sm:$0xff]  }
 0x63d   :  { %2944 = vmatprep.mubr.bf16.mxu0 %v8047_v8  ;;  %2987 = vmatprep.mubr.bf16.mxu1 %v8047_v8  ;;  %8282 = vst [vmem:[#allocation90_spill] sm:$0xff] %v7184_v50  ;;  %8283 = vst [vmem:[#allocation91_spill] sm:$0xff] %v7187_v42 }
 0x63f   :  { %2915 = vmatpush1.bf16.msra.mxu0 %v6716_v28  ;;  %2958 = vmatpush1.bf16.msra.mxu1 %v6719_v62  ;;  %v2808_v62 = vadd.f32 1.0, %v5117_v9  ;;  %v7195_v9 = vld [vmem:[#allocation11 + $0x28] ss:$16 sps:$4 sm:$0xff]  }
 0x640   :  { %2916 = vmatprep.subr.bf16.mxu0 %v6722_v1  ;;  %2959 = vmatprep.subr.bf16.mxu1 %v6725_v12  ;;  %8285 = vst [vmem:[#allocation93_spill] sm:$0xff] %v7195_v9 }
 0x641   :  { %v5119_v2 = vpop.eup %5118  ;;  %5130 = vrcp.f32 %v2808_v62  ;;  %v7219_v62 = vld [vmem:[#allocation11 + $0x68] ss:$16 sps:$4 sm:$0xff]  }
 0x642   :  { %v5121_v51 = vpop.eup %5120  ;;  %v2816_v14 = vmul.f32 %v5119_v2, %v5115_v48  ;;  %v7192_v48 = vld [vmem:[#allocation11 + $0x20] ss:$16 sps:$4 sm:$0xff]   ;;  %v7198_v2 = vld [vmem:[#allocation11 + $0x44] ss:$16 sps:$4 sm:$0xff]   ;;  %8293 = vst [vmem:[#allocation25_spill] sm:$0xff] %v7219_v62 }
 0x643   :  { %v5123_v34 = vpop.eup %5122  ;;  %2917 = vmatpush1.bf16.msra.mxu0 %v6728_v41  ;;  %2960 = vmatpush1.bf16.msra.mxu1 %v6731_v13  ;;  %v7084_v41 = vld [vmem:[#allocation9 + $0x68] ss:$16 sps:$4 sm:$0xff]   ;;  %8284 = vst [vmem:[#allocation92_spill] sm:$0xff] %v7192_v48  ;;  %8286 = vst [vmem:[#allocation94_spill] sm:$0xff] %v7198_v2 }
 0x644   :  { %v5125_v4 = vpop.eup %5124  ;;  %v2814_v56 = vmul.f32 %v5123_v34, %v6941_v35  ;;  %2918 = vmatprep.subr.bf16.mxu0 %v6735_v22  ;;  %2961 = vmatprep.subr.bf16.mxu1 %v6738_v52  ;;  %v7093_v52 = vld [vmem:[#allocation9 + $0x80] ss:$16 sps:$4 sm:$0xff]   ;;  %v7096_v35 = vld [vmem:[#allocation9 + $0x88] ss:$16 sps:$4 sm:$0xff]  }
 0x645   :  { %v5127_v28 = vpop.eup %5126  ;;  %v2809_v55 = vadd.f32 1.0, %v5125_v4  ;;  %v7207_v34 = vld [vmem:[#allocation11 + $0x48] ss:$16 sps:$4 sm:$0xff]   ;;  %v7210_v4 = vld [vmem:[#allocation11 + $0x64] ss:$16 sps:$4 sm:$0xff]  }
 0x646   :  { %v7079_v1 = vadd.f32 %v2816_v14, %v2814_v56  ;;  %v2817_v12 = vmul.f32 %v5127_v28, %v5121_v51  ;;  %v5129_v27 = vpop.eup %5128  ;;  %v7201_v51 = vld [vmem:[#allocation11 + $0x4c] ss:$16 sps:$4 sm:$0xff]   ;;  %v7204_v14 = vld [vmem:[#allocation11 + $0x40] ss:$16 sps:$4 sm:$0xff]   ;;  %8289 = vst [vmem:[#allocation51_spill] sm:$0xff] %v7207_v34  ;;  %8290 = vst [vmem:[#allocation48_spill] sm:$0xff] %v7210_v4 }
 0x647   :  { %2919 = vmatpush1.bf16.msra.mxu0 %v7081_v31  ;;  %2962 = vmatpush1.bf16.msra.mxu1 %v7084_v41  ;;  %v2815_v13 = vmul.f32 %v5129_v27, %v6949_v15  ;;  %v7100_v15 = vld [vmem:[#allocation9 + $0xa4] ss:$16 sps:$4 sm:$0xff]   ;;  %8287 = vst [vmem:[#allocation95_spill] sm:$0xff] %v7201_v51  ;;  %8288 = vst [vmem:[#allocation96_spill] sm:$0xff] %v7204_v14  ;;  %v7213_v56 = vld [vmem:[#allocation11 + $0x6c] ss:$16 sps:$4 sm:$0xff]  }
 0x648   :  { %2920 = vmatprep.subr.bf16.mxu0 %v6746_v7  ;;  %2963 = vmatprep.subr.bf16.mxu1 %v6749_v30  ;;  %5132 = vtanh.f32 %v7079_v1  ;;  %v7103_v7 = vld [vmem:[#allocation9 + $0xac] ss:$16 sps:$4 sm:$0xff]   ;;  %v7106_v30 = vld [vmem:[#allocation9 + $0xa0] ss:$16 sps:$4 sm:$0xff]   ;;  %8291 = vst [vmem:[#allocation53_spill] sm:$0xff] %v7213_v56 }
 0x649   :  { %v7091_v22 = vadd.f32 %v2817_v12, %v2815_v13  ;;  %5134 = vrcp.f32 %v2809_v55  ;;  %v7216_v28 = vld [vmem:[#allocation11 + $0x60] ss:$16 sps:$4 sm:$0xff]   ;;  %v7222_v12 = vld [vmem:[#allocation11 + $0x84] ss:$16 sps:$4 sm:$0xff]   ;;  %v7225_v27 = vld [vmem:[#allocation11 + $0x8c] ss:$16 sps:$4 sm:$0xff]  }
 0x64a   :  { %8292 = vst [vmem:[#allocation24_spill] sm:$0xff] %v7216_v28  ;;  %8294 = vst [vmem:[#allocation26_spill] sm:$0xff] %v7222_v12  ;;  %v7228_v55 = vld [vmem:[#allocation11 + $0x80] ss:$16 sps:$4 sm:$0xff]   ;;  %v7231_v13 = vld [vmem:[#allocation11 + $0x88] ss:$16 sps:$4 sm:$0xff]  }
 0x64b   :  { %2921 = vmatpush1.bf16.msra.mxu0 %v7093_v52  ;;  %2964 = vmatpush1.bf16.msra.mxu1 %v7096_v35  ;;  %5136 = vtanh.f32 %v7091_v22  ;;  %v5131_v47 = vpop.eup %5130  ;;  %8295 = vst [vmem:[#allocation27_spill] sm:$0xff] %v7225_v27  ;;  %8296 = vst [vmem:[#allocation28_spill] sm:$0xff] %v7228_v55 }
 0x64c   :  { %2922 = vmatprep.subr.bf16.mxu0 %v7100_v15  ;;  %2965 = vmatprep.subr.bf16.mxu1 %v7103_v7  ;;  %8297 = vst [vmem:[#allocation29_spill] sm:$0xff] %v7231_v13 }
 0x64f   :  { %2923 = vmatpush1.bf16.msra.mxu0 %v7106_v30  ;;  %2966 = vmatpush1.bf16.msra.mxu1 %v7109_v5 }
 0x650   :  { %2924 = vmatprep.subr.bf16.mxu0 %v7112_v6  ;;  %2967 = vmatprep.subr.bf16.mxu1 %v7115_v61 }
 0x652   :  { %v5133_v58 = vpop.eup %5132 }
 0x653   :  { %2925 = vmatpush1.bf16.msra.mxu0 %v6764_v40  ;;  %2968 = vmatpush1.bf16.msra.mxu1 %v6767_v39  ;;  %v5135_v0 = vpop.eup %5134  ;;  %v2822_v53 = vmul.f32 %v5133_v58, %v5131_v47  ;;  %v7127_v40 = vld [vmem:[#allocation8 + $0xc] ss:$16 sps:$4 sm:$0xff]   ;;  %v7234_v47 = vld [vmem:[#allocation11 + $0xa4] ss:$16 sps:$4 sm:$0xff]  }
 0x654   :  { %2926 = vmatprep.subr.bf16.mxu0 %v6770_v3  ;;  %2969 = vmatprep.subr.bf16.mxu1 %v6773_v57  ;;  %8259 = vst [vmem:[#allocation59_spill] sm:$0xff] %v7127_v40  ;;  %v8260_v3 = vld [vmem:[#allocation97_spill] sm:$0xff]  ;;  %v8261_v57 = vld [vmem:[#allocation98_spill] sm:$0xff]  ;;  %8298 = vst [vmem:[#allocation30_spill] sm:$0xff] %v7234_v47 }
 0x655   :  { %v5137_v18 = vpop.eup %5136  ;;  %v7237_v58 = vld [vmem:[#allocation11 + $0xac] ss:$16 sps:$4 sm:$0xff]  }
 0x656   :  { %v2823_v37 = vmul.f32 %v5137_v18, %v5135_v0  ;;  %8299 = vst [vmem:[#allocation31_spill] sm:$0xff] %v7237_v58  ;;  %v7240_v0 = vld [vmem:[#allocation11 + $0xa0] ss:$16 sps:$4 sm:$0xff]   ;;  %v7243_v18 = vld [vmem:[#allocation11 + $0xa8] ss:$16 sps:$4 sm:$0xff]  }
 0x657   :  { %2927 = vmatpush1.bf16.msra.mxu0 %v6776_v60  ;;  %2970 = vmatpush1.bf16.msra.mxu1 %v6779_v21  ;;  %v8262_v60 = vld [vmem:[#allocation99_spill] sm:$0xff]  ;;  %v8263_v21 = vld [vmem:[#allocation100_spill] sm:$0xff]  ;;  %8300 = vst [vmem:[#allocation32_spill] sm:$0xff] %v7240_v0  ;;  %8301 = vst [vmem:[#allocation33_spill] sm:$0xff] %v7243_v18 }
 0x658   :  { %3059 = vmatprep.subr.bf16.mxu0 %v7124_v26  ;;  %3102 = vmatprep.subr.bf16.mxu1 %v7127_v40  ;;  %v2824_v39 = vpack.c.bf16 %v2823_v37, %v2822_v53  ;;  %v7246_v53 = vld [vmem:[#allocation11 + $0xc4] ss:$16 sps:$4 sm:$0xff]   ;;  %v7249_v37 = vld [vmem:[#allocation11 + $0xcc] ss:$16 sps:$4 sm:$0xff]  }
 0x659   :  { %8302 = vst [vmem:[#allocation34_spill] sm:$0xff] %v7246_v53  ;;  %8303 = vst [vmem:[#allocation35_spill] sm:$0xff] %v7249_v37 }
 0x65a   :  { %2945 = vmatmul.mubr.bf16.vlgmr.msra.gmra.mrb[60].mxu0 %v2824_v39  ;;  %2988 = vmatmul.mubr.bf16.vlgmr.msra.gmra.mrb[76].mxu1 %v2824_v39 }
 0x65b   :  { %3060 = vmatpush1.bf16.msra.mxu0 %v8186_v63  ;;  %3103 = vmatpush1.bf16.msra.mxu1 %v8187_v46  ;;  %v8264_v63 = vld [vmem:[#allocation101_spill] sm:$0xff]  ;;  %v8265_v46 = vld [vmem:[#allocation102_spill] sm:$0xff] }
 0x65c   :  { %3061 = vmatprep.subr.bf16.mxu0 %v8188_v29  ;;  %3104 = vmatprep.subr.bf16.mxu1 %v8189_v36  ;;  %v8266_v29 = vld [vmem:[#allocation103_spill] sm:$0xff]  ;;  %v8267_v36 = vld [vmem:[#allocation104_spill] sm:$0xff] }
 0x65d   :  { %3091 = vmatprep.mubr.bf16.mxu0 %v8047_v8  ;;  %3134 = vmatprep.mubr.bf16.mxu1 %v8047_v8 }
 0x65f   :  { %3062 = vmatpush1.bf16.msra.mxu0 %v8190_v19  ;;  %3105 = vmatpush1.bf16.msra.mxu1 %v8191_v24  ;;  %v8268_v19 = vld [vmem:[#allocation105_spill] sm:$0xff] }
 0x660   :  { %3063 = vmatprep.subr.bf16.mxu0 %v8192_v23  ;;  %3106 = vmatprep.subr.bf16.mxu1 %v8193_v33  ;;  %v7153_v24 = vld [vmem:[#allocation8 + $0xa8] ss:$16 sps:$4 sm:$0xff]   ;;  %v8270_v23 = vld [vmem:[#allocation106_spill] sm:$0xff]  ;;  %v7157_v33 = vld [vmem:[#allocation8 + $0xcc] ss:$16 sps:$4 sm:$0xff]  }
 0x661   :  { %8269 = vst [vmem:[#allocation54_spill] sm:$0xff] %v7153_v24  ;;  %8271 = vst [vmem:[#allocation61_spill] sm:$0xff] %v7157_v33 }
 0x663   :  { %3064 = vmatpush1.bf16.msra.mxu0 %v8194_v16  ;;  %3107 = vmatpush1.bf16.msra.mxu1 %v8195_v44  ;;  %v8272_v16 = vld [vmem:[#allocation107_spill] sm:$0xff] }
 0x664   :  { %3065 = vmatprep.subr.bf16.mxu0 %v8196_v17  ;;  %3108 = vmatprep.subr.bf16.mxu1 %v8197_v45  ;;  %v7161_v44 = vld [vmem:[#allocation8 + $0xc8] ss:$16 sps:$4 sm:$0xff]   ;;  %v8274_v17 = vld [vmem:[#allocation108_spill] sm:$0xff]  ;;  %v7165_v45 = vld [vmem:[#allocation8 + $0xec] ss:$16 sps:$4 sm:$0xff]  }
 0x665   :  { %8273 = vst [vmem:[#allocation42_spill] sm:$0xff] %v7161_v44  ;;  %8275 = vst [vmem:[#allocation46_spill] sm:$0xff] %v7165_v45 }
 0x667   :  { %3066 = vmatpush1.bf16.msra.mxu0 %v8260_v3  ;;  %3109 = vmatpush1.bf16.msra.mxu1 %v8261_v57  ;;  %v7255_v3 = vld [vmem:[#allocation11 + $0xc8] ss:$16 sps:$4 sm:$0xff]   ;;  %v7258_v57 = vld [vmem:[#allocation11 + $0xe4] ss:$16 sps:$4 sm:$0xff]  }
 0x668   :  { %3067 = vmatprep.subr.bf16.mxu0 %v8262_v60  ;;  %3110 = vmatprep.subr.bf16.mxu1 %v8263_v21  ;;  %8305 = vst [vmem:[#allocation37_spill] sm:$0xff] %v7255_v3  ;;  %8306 = vst [vmem:[#allocation38_spill] sm:$0xff] %v7258_v57  ;;  %v7261_v60 = vld [vmem:[#allocation11 + $0xec] ss:$16 sps:$4 sm:$0xff]   ;;  %v7264_v21 = vld [vmem:[#allocation11 + $0xe0] ss:$16 sps:$4 sm:$0xff]  }
 0x669   :  { %8307 = vst [vmem:[#allocation39_spill] sm:$0xff] %v7261_v60  ;;  %8308 = vst [vmem:[#allocation40_spill] sm:$0xff] %v7264_v21 }
 0x66b   :  { %3068 = vmatpush1.bf16.msra.mxu0 %v8264_v63  ;;  %3111 = vmatpush1.bf16.msra.mxu1 %v8265_v46  ;;  %v7267_v63 = vld [vmem:[#allocation11 + $0xe8] ss:$16 sps:$4 sm:$0xff]   ;;  %v7270_v46 = vld [vmem:[#allocation9 + $0x4] ss:$16 sps:$4 sm:$0xff]  }
 0x66c   :  { %3069 = vmatprep.subr.bf16.mxu0 %v8266_v29  ;;  %3112 = vmatprep.subr.bf16.mxu1 %v8267_v36  ;;  %8309 = vst [vmem:[#allocation41_spill] sm:$0xff] %v7267_v63  ;;  %8310 = vst [vmem:[#allocation71_spill] sm:$0xff] %v7270_v46  ;;  %v7273_v29 = vld [vmem:[#allocation9 + $0xc] ss:$16 sps:$4 sm:$0xff]  }
 0x66d   :  { %8311 = vst [vmem:[#allocation72_spill] sm:$0xff] %v7273_v29 }
 0x66f   :  { %3070 = vmatpush1.bf16.msra.mxu0 %v8268_v19  ;;  %3113 = vmatpush1.bf16.msra.mxu1 %v7153_v24 }
 0x670   :  { %3071 = vmatprep.subr.bf16.mxu0 %v8270_v23  ;;  %3114 = vmatprep.subr.bf16.mxu1 %v7157_v33  ;;  %v8312_v23 = vld [vmem:[#allocation20_spill] sm:$0xff] }
 0x673   :  { %3072 = vmatpush1.bf16.msra.mxu0 %v8272_v16  ;;  %3115 = vmatpush1.bf16.msra.mxu1 %v7161_v44 }
 0x674   :  { %3073 = vmatprep.subr.bf16.mxu0 %v8274_v17  ;;  %3116 = vmatprep.subr.bf16.mxu1 %v7165_v45 }
 0x677   :  { %3074 = vmatpush1.bf16.msra.mxu0 %v8276_v11  ;;  %3117 = vmatpush1.bf16.msra.mxu1 %v7169_v20 }
 0x678   :  { %3211 = vmatprep.subr.bf16.mxu0 %v7172_v10  ;;  %3254 = vmatprep.subr.bf16.mxu1 %v7175_v25 }
 0x67a   :  { %3092 = vmatmul.mubr.bf16.vlgmr.msra.gmra.mrb[64].mxu0 %v2824_v39  ;;  %3135 = vmatmul.mubr.bf16.vlgmr.msra.gmra.mrb[80].mxu1 %v2824_v39  ;;  %v7252_v39 = vld [vmem:[#allocation11 + $0xc0] ss:$16 sps:$4 sm:$0xff]  }
 0x67b   :  { %3212 = vmatpush1.bf16.msra.mxu0 %v7178_v38  ;;  %3255 = vmatpush1.bf16.msra.mxu1 %v7181_v49  ;;  %8304 = vst [vmem:[#allocation36_spill] sm:$0xff] %v7252_v39 }
 0x67c   :  { %3213 = vmatprep.subr.bf16.mxu0 %v7184_v50  ;;  %3256 = vmatprep.subr.bf16.mxu1 %v7187_v42 }
 0x67d   :  { %3243 = vmatprep.mubr.bf16.mxu0 %v8047_v8  ;;  %3286 = vmatprep.mubr.bf16.mxu1 %v8047_v8 }
 0x67f   :  { %3214 = vmatpush1.bf16.msra.mxu0 %v7192_v48  ;;  %3257 = vmatpush1.bf16.msra.mxu1 %v7195_v9 }
 0x680   :  { %3215 = vmatprep.subr.bf16.mxu0 %v7198_v2  ;;  %3258 = vmatprep.subr.bf16.mxu1 %v7201_v51 }
 0x683   :  { %3216 = vmatpush1.bf16.msra.mxu0 %v7204_v14  ;;  %3259 = vmatpush1.bf16.msra.mxu1 %v7207_v34 }
 0x684   :  { %3217 = vmatprep.subr.bf16.mxu0 %v7210_v4  ;;  %3260 = vmatprep.subr.bf16.mxu1 %v7213_v56 }
 0x687   :  { %3218 = vmatpush1.bf16.msra.mxu0 %v7216_v28  ;;  %3261 = vmatpush1.bf16.msra.mxu1 %v7219_v62 }
 0x688   :  { %3219 = vmatprep.subr.bf16.mxu0 %v7222_v12  ;;  %3262 = vmatprep.subr.bf16.mxu1 %v7225_v27 }
 0x68b   :  { %3220 = vmatpush1.bf16.msra.mxu0 %v7228_v55  ;;  %3263 = vmatpush1.bf16.msra.mxu1 %v7231_v13 }
 0x68c   :  { %3221 = vmatprep.subr.bf16.mxu0 %v7234_v47  ;;  %3264 = vmatprep.subr.bf16.mxu1 %v7237_v58  ;;  %v8314_v58 = vld [vmem:[#allocation22_spill] sm:$0xff] }
 0x68f   :  { %3222 = vmatpush1.bf16.msra.mxu0 %v7240_v0  ;;  %3265 = vmatpush1.bf16.msra.mxu1 %v7243_v18 }
 0x690   :  { %3223 = vmatprep.subr.bf16.mxu0 %v7246_v53  ;;  %3266 = vmatprep.subr.bf16.mxu1 %v7249_v37 }
 0x693   :  { %3224 = vmatpush1.bf16.msra.mxu0 %v7252_v39  ;;  %3267 = vmatpush1.bf16.msra.mxu1 %v7255_v3 }
 0x694   :  { %3225 = vmatprep.subr.bf16.mxu0 %v7258_v57  ;;  %3268 = vmatprep.subr.bf16.mxu1 %v7261_v60  ;;  %v8313_v60 = vld [vmem:[#allocation21_spill] sm:$0xff] }
 0x697   :  { %3226 = vmatpush1.bf16.msra.mxu0 %v7264_v21  ;;  %3269 = vmatpush1.bf16.msra.mxu1 %v7267_v63 }
 0x698   :  { %3297 = vmatprep.subr.bf16.mxu0 %v7270_v46  ;;  %3340 = vmatprep.subr.bf16.mxu1 %v7273_v29 }
 0x72d   :  { %v2946_v36 = vpop.f32.mrb[60].mxu0  ;;  %v2989_v19 = vpop.f32.mrb[76].mxu1 }
 0x72e   :  { %v2998_v16 = vadd.f32 %v2946_v36, %v8312_v23  ;;  %v2948_v17 = vpop.f32.mrb[61].mxu0  ;;  %v2991_v11 = vpop.f32.mrb[77].mxu1 }
 0x72f   :  { %v2999_v21 = vadd.f32 %v2948_v17, %v8313_v60  ;;  %v2950_v57 = vpop.f32.mrb[62].mxu0  ;;  %v2993_v3 = vpop.f32.mrb[78].mxu1  ;;  %v3001_v36 = vadd.f32 %v2991_v11, %v8314_v58  ;;  %v8315_v17 = vld [vmem:[#allocation23_spill] sm:$0xff] }
 0x730   :  { %v4522_v39 = vmul.f32 -1.442695, %v2998_v16  ;;  %v3002_v63 = vadd.f32 %v2950_v57, %v8312_v23  ;;  %v2952_v37 = vpop.f32.mrb[63].mxu0  ;;  %v2995_v53 = vpop.f32.mrb[79].mxu1  ;;  %v3000_v13 = vadd.f32 %v2989_v19, %v8315_v17 }
 0x731   :  { %v4524_v46 = vmul.f32 -1.442695, %v2999_v21  ;;  %v3003_v18 = vadd.f32 %v2952_v37, %v8313_v60  ;;  %v3005_v47 = vadd.f32 %v2995_v53, %v8314_v58  ;;  %v4526_v16 = vmul.f32 -1.442695, %v3001_v36 }
 0x732   :  { %5138 = vpow2.f32 %v4522_v39  ;;  %v4523_v29 = vmul.f32 -1.442695, %v3002_v63  ;;  %v3004_v37 = vadd.f32 %v2993_v3, %v8315_v17 }
 0x733   :  { %5140 = vpow2.f32 %v4524_v46  ;;  %v4525_v0 = vmul.f32 -1.442695, %v3003_v18  ;;  %v4527_v55 = vmul.f32 -1.442695, %v3005_v47 }
 0x734   :  { %5142 = vpow2.f32 %v4523_v29 }
 0x735   :  { %5144 = vpow2.f32 %v4525_v0 }
 0x736   :  { %5146 = vtanh.f32 %v3000_v13 }
 0x737   :  { %5148 = vpow2.f32 %v4526_v16 }
 0x738   :  { %5150 = vpow2.f32 %v4527_v55  ;;  %v8316_v55 = vld [vmem:[#allocation60_spill] sm:$0xff] }
 0x739   :  { %v3145_v16 = vunpack.c.l.bf16 %v8316_v55 }
 0x73c   :  { %v5139_v57 = vpop.eup %5138 }
 0x73d   :  { %v5141_v23 = vpop.eup %5140  ;;  %v3012_v21 = vadd.f32 1.0, %v5139_v57 }
 0x73e   :  { %v3024_v39 = vadd.f32 1.0, %v5141_v23  ;;  %v5143_v18 = vpop.eup %5142 }
 0x73f   :  { %5152 = vrcp.f32 %v3012_v21  ;;  %v3013_v63 = vadd.f32 1.0, %v5143_v18  ;;  %v5145_v46 = vpop.eup %5144 }
 0x740   :  { %5154 = vrcp.f32 %v3024_v39  ;;  %v3025_v0 = vadd.f32 1.0, %v5145_v46  ;;  %v5147_v53 = vpop.eup %5146  ;;  %v8317_v39 = vld [vmem:[#allocation65_spill] sm:$0xff]  ;;  %v3149_v46 = vunpack.c.h.bf16 %v8316_v55 }
 0x741   :  { %5156 = vtanh.f32 %v3004_v37  ;;  %v5149_v47 = vpop.eup %5148  ;;  %v3147_v18 = vunpack.c.l.bf16 %v8317_v39  ;;  %v8318_v37 = vld [vmem:[#allocation62_spill] sm:$0xff]  ;;  %v3151_v62 = vunpack.c.h.bf16 %v8317_v39 }
 0x742   :  { %5158 = vrcp.f32 %v3013_v63  ;;  %v5151_v29 = vpop.eup %5150  ;;  %v3038_v23 = vadd.f32 1.0, %v5149_v47  ;;  %v3146_v63 = vunpack.c.l.bf16 %v8318_v37 }
 0x743   :  { %5160 = vrcp.f32 %v3025_v0  ;;  %v3039_v21 = vadd.f32 1.0, %v5151_v29 }
 0x744   :  { %5162 = vrcp.f32 %v3038_v23 }
 0x745   :  { %5164 = vrcp.f32 %v3039_v21 }
 0x749   :  { %v5153_v13 = vpop.eup %5152 }
 0x74a   :  { %v5155_v19 = vpop.eup %5154  ;;  %v3046_v11 = vmul.f32 %v5153_v13, %v5147_v53  ;;  %v8319_v53 = vld [vmem:[#allocation66_spill] sm:$0xff] }
 0x74b   :  { %v5157_v36 = vpop.eup %5156  ;;  %v3044_v3 = vmul.f32 %v5155_v19, %v7049_v32  ;;  %v3148_v13 = vunpack.c.l.bf16 %v8319_v53  ;;  %v3150_v32 = vunpack.c.h.bf16 %v8318_v37  ;;  %v3152_v28 = vunpack.c.h.bf16 %v8319_v53 }
 0x74c   :  { %v5159_v57 = vpop.eup %5158 }
 0x74d   :  { %v7289_v0 = vadd.f32 %v3046_v11, %v3044_v3  ;;  %v3047_v17 = vmul.f32 %v5159_v57, %v5157_v36  ;;  %v3093_v58 = vpop.f32.mrb[64].mxu0  ;;  %v3136_v60 = vpop.f32.mrb[80].mxu1 }
 0x74e   :  { %v5161_v47 = vpop.eup %5160  ;;  %v3153_v19 = vadd.f32 %v3145_v16, %v3093_v58  ;;  %v3155_v27 = vadd.f32 %v3147_v18, %v3136_v60  ;;  %v3095_v12 = vpop.f32.mrb[65].mxu0 }
 0x74f   :  { %v3138_v29 = vpop.f32.mrb[81].mxu1  ;;  %v3045_v11 = vmul.f32 %v5161_v47, %v7057_v59  ;;  %v3154_v3 = vadd.f32 %v3146_v63, %v3095_v12  ;;  %v3097_v55 = vpop.f32.mrb[66].mxu0  ;;  %5166 = vtanh.f32 %v7289_v0 }
 0x750   :  { %v3156_v36 = vadd.f32 %v3148_v13, %v3138_v29  ;;  %v3140_v57 = vpop.f32.mrb[82].mxu1  ;;  %v4528_v56 = vmul.f32 -1.442695, %v3153_v19  ;;  %v3157_v4 = vadd.f32 %v3149_v46, %v3097_v55  ;;  %v3099_v34 = vpop.f32.mrb[67].mxu0  ;;  %v7310_v55 = vld [vmem:[#allocation9 + $0x20] ss:$16 sps:$4 sm:$0xff]  }
 0x751   :  { %v3159_v37 = vadd.f32 %v3151_v62, %v3140_v57  ;;  %v3142_v58 = vpop.f32.mrb[83].mxu1  ;;  %v7297_v60 = vadd.f32 %v3047_v17, %v3045_v11  ;;  %v4530_v16 = vmul.f32 -1.442695, %v3154_v3  ;;  %v3158_v39 = vadd.f32 %v3150_v32, %v3099_v34  ;;  %v5163_v12 = vpop.eup %5162  ;;  %v7305_v3 = vld [vmem:[#allocation9 + $0x2c] ss:$16 sps:$4 sm:$0xff]  }
 0x752   :  { %5168 = vpow2.f32 %v4528_v56  ;;  %v4529_v23 = vmul.f32 -1.442695, %v3157_v4  ;;  %v3160_v18 = vadd.f32 %v3152_v28, %v3142_v58  ;;  %v5165_v21 = vpop.eup %5164  ;;  %v4532_v62 = vmul.f32 -1.442695, %v3156_v36  ;;  %v7313_v57 = vld [vmem:[#allocation9 + $0x28] ss:$16 sps:$4 sm:$0xff]  }
 0x753   :  { %5170 = vtanh.f32 %v7297_v60  ;;  %v4531_v59 = vmul.f32 -1.442695, %v3158_v39  ;;  %v7316_v58 = vld [vmem:[#allocation9 + $0x44] ss:$16 sps:$4 sm:$0xff]  }
 0x754   :  { %5172 = vpow2.f32 %v4530_v16  ;;  %v4533_v34 = vmul.f32 -1.442695, %v3160_v18  ;;  %v7319_v16 = vld [vmem:[#allocation9 + $0x4c] ss:$16 sps:$4 sm:$0xff]  }
 0x755   :  { %5174 = vpow2.f32 %v4529_v23 }
 0x756   :  { %5176 = vpow2.f32 %v4531_v59 }
 0x757   :  { %5178 = vtanh.f32 %v3155_v27  ;;  %v7302_v27 = vld [vmem:[#allocation9 + $0x24] ss:$16 sps:$4 sm:$0xff]  }
 0x758   :  { %5180 = vpow2.f32 %v4532_v62 }
 0x759   :  { %v5167_v63 = vpop.eup %5166 }
 0x75a   :  { %v3052_v56 = vmul.f32 %v5167_v63, %v5163_v12  ;;  %v7322_v12 = vld [vmem:[#allocation9 + $0x40] ss:$16 sps:$4 sm:$0xff]  }
 0x75c   :  { %v5169_v46 = vpop.eup %5168 }
 0x75d   :  { %v5171_v53 = vpop.eup %5170  ;;  %v3167_v13 = vadd.f32 1.0, %v5169_v46  ;;  %v7329_v46 = vld [vmem:[#allocation9 + $0x64] ss:$16 sps:$4 sm:$0xff]  }
 0x75e   :  { %v5173_v17 = vpop.eup %5172  ;;  %v3053_v4 = vmul.f32 %v5171_v53, %v5165_v21  ;;  %v7325_v21 = vld [vmem:[#allocation9 + $0x48] ss:$16 sps:$4 sm:$0xff]   ;;  %v7332_v53 = vld [vmem:[#allocation9 + $0x6c] ss:$16 sps:$4 sm:$0xff]  }
 0x75f   :  { %5182 = vrcp.f32 %v3167_v13  ;;  %v3179_v28 = vadd.f32 1.0, %v5173_v17  ;;  %v5175_v32 = vpop.eup %5174 }
 0x760   :  { %5184 = vtanh.f32 %v3159_v37  ;;  %v3210_v47 = vpack.c.bf16 %v3053_v4, %v3052_v56  ;;  %v3168_v19 = vadd.f32 1.0, %v5175_v32  ;;  %v5177_v29 = vpop.eup %5176  ;;  %v7340_v32 = vld [vmem:[#allocation9 + $0x84] ss:$16 sps:$4 sm:$0xff]  }
 0x761   :  { %5186 = vrcp.f32 %v3179_v28  ;;  %v3180_v11 = vadd.f32 1.0, %v5177_v29  ;;  %v5179_v36 = vpop.eup %5178  ;;  %v7358_v29 = vld [vmem:[#allocation9 + $0xc0] ss:$16 sps:$4 sm:$0xff]  }
 0x762   :  { %5188 = vpow2.f32 %v4533_v34  ;;  %3244 = vmatmul.mubr.bf16.vlgmr.msra.gmra.mrb[68].mxu0 %v3210_v47  ;;  %3287 = vmatmul.mubr.bf16.vlgmr.msra.gmra.mrb[84].mxu1 %v3210_v47  ;;  %v5181_v37 = vpop.eup %5180  ;;  %v7343_v47 = vld [vmem:[#allocation9 + $0x8c] ss:$16 sps:$4 sm:$0xff]  }
 0x763   :  { %5190 = vrcp.f32 %v3168_v19  ;;  %3298 = vmatpush1.bf16.msra.mxu0 %v7060_v43  ;;  %3341 = vmatpush1.bf16.msra.mxu1 %v7063_v54  ;;  %v3193_v17 = vadd.f32 1.0, %v5181_v37  ;;  %v7364_v37 = vld [vmem:[#allocation9 + $0xe4] ss:$16 sps:$4 sm:$0xff]  }
 0x764   :  { %3299 = vmatprep.subr.bf16.mxu0 %v7302_v27  ;;  %3342 = vmatprep.subr.bf16.mxu1 %v7305_v3  ;;  %5192 = vrcp.f32 %v3180_v11  ;;  %v7361_v11 = vld [vmem:[#allocation9 + $0xc8] ss:$16 sps:$4 sm:$0xff]  }
 0x765   :  { %3329 = vmatprep.mubr.bf16.mxu0 %v8047_v8  ;;  %3372 = vmatprep.mubr.bf16.mxu1 %v8047_v8  ;;  %5194 = vrcp.f32 %v3193_v17 }
 0x767   :  { %3300 = vmatpush1.bf16.msra.mxu0 %v7310_v55  ;;  %3343 = vmatpush1.bf16.msra.mxu1 %v7313_v57 }
 0x768   :  { %3301 = vmatprep.subr.bf16.mxu0 %v7316_v58  ;;  %3344 = vmatprep.subr.bf16.mxu1 %v7319_v16 }
 0x769   :  { %v5183_v39 = vpop.eup %5182 }
 0x76a   :  { %v5185_v23 = vpop.eup %5184  ;;  %v3201_v18 = vmul.f32 %v5183_v39, %v5179_v36  ;;  %v7367_v39 = vld [vmem:[#allocation9 + $0xec] ss:$16 sps:$4 sm:$0xff]  }
 0x76b   :  { %v5187_v59 = vpop.eup %5186  ;;  %3302 = vmatpush1.bf16.msra.mxu0 %v7322_v12  ;;  %3345 = vmatpush1.bf16.msra.mxu1 %v7325_v21 }
 0x76c   :  { %v5189_v62 = vpop.eup %5188  ;;  %v3199_v63 = vmul.f32 %v5187_v59, %v7079_v1  ;;  %3303 = vmatprep.subr.bf16.mxu0 %v7329_v46  ;;  %3346 = vmatprep.subr.bf16.mxu1 %v7332_v53  ;;  %v7370_v59 = vld [vmem:[#allocation9 + $0xe0] ss:$16 sps:$4 sm:$0xff]  }
 0x76d   :  { %v5191_v13 = vpop.eup %5190  ;;  %v3194_v28 = vadd.f32 1.0, %v5189_v62  ;;  %v7373_v62 = vld [vmem:[#allocation9 + $0xe8] ss:$16 sps:$4 sm:$0xff]  }
 0x76e   :  { %v7335_v34 = vadd.f32 %v3201_v18, %v3199_v63  ;;  %v3202_v56 = vmul.f32 %v5191_v13, %v5185_v23  ;;  %v5193_v4 = vpop.eup %5192 }
 0x76f   :  { %3304 = vmatpush1.bf16.msra.mxu0 %v7081_v31  ;;  %3347 = vmatpush1.bf16.msra.mxu1 %v7084_v41  ;;  %v3200_v1 = vmul.f32 %v5193_v4, %v7091_v22  ;;  %v5195_v22 = vpop.eup %5194  ;;  %v7381_v4 = vld [vmem:[#allocation8 + $0x8] ss:$16 sps:$4 sm:$0xff]  }
 0x770   :  { %3305 = vmatprep.subr.bf16.mxu0 %v7340_v32  ;;  %3348 = vmatprep.subr.bf16.mxu1 %v7343_v47  ;;  %5196 = vtanh.f32 %v7335_v34  ;;  %8321 = vst [vmem:[#allocation74_spill] sm:$0xff] %v7381_v4 }
 0x771   :  { %v7347_v19 = vadd.f32 %v3202_v56, %v3200_v1  ;;  %5198 = vrcp.f32 %v3194_v28  ;;  %v7378_v56 = vld [vmem:[#allocation8] ss:$16 sps:$4 sm:$0xff]   ;;  %v7384_v28 = vld [vmem:[#allocation8 + $0x24] ss:$16 sps:$4 sm:$0xff]   ;;  %v7387_v1 = vld [vmem:[#allocation8 + $0x2c] ss:$16 sps:$4 sm:$0xff]  }
 0x772   :  { %8320 = vst [vmem:[#allocation73_spill] sm:$0xff] %v7378_v56  ;;  %8322 = vst [vmem:[#allocation75_spill] sm:$0xff] %v7384_v28 }
 0x773   :  { %3306 = vmatpush1.bf16.msra.mxu0 %v7093_v52  ;;  %3349 = vmatpush1.bf16.msra.mxu1 %v7096_v35  ;;  %5200 = vtanh.f32 %v7347_v19  ;;  %8323 = vst [vmem:[#allocation76_spill] sm:$0xff] %v7387_v1 }
 0x774   :  { %3307 = vmatprep.subr.bf16.mxu0 %v7100_v15  ;;  %3350 = vmatprep.subr.bf16.mxu1 %v7103_v7 }
 0x777   :  { %3308 = vmatpush1.bf16.msra.mxu0 %v7106_v30  ;;  %3351 = vmatpush1.bf16.msra.mxu1 %v7109_v5 }
 0x778   :  { %3309 = vmatprep.subr.bf16.mxu0 %v7112_v6  ;;  %3352 = vmatprep.subr.bf16.mxu1 %v7115_v61 }
 0x77a   :  { %v5197_v36 = vpop.eup %5196 }
 0x77b   :  { %3310 = vmatpush1.bf16.msra.mxu0 %v7358_v29  ;;  %3353 = vmatpush1.bf16.msra.mxu1 %v7361_v11  ;;  %v5199_v23 = vpop.eup %5198  ;;  %v3207_v63 = vmul.f32 %v5197_v36, %v5195_v22  ;;  %v7392_v22 = vld [vmem:[#allocation8 + $0x20] ss:$16 sps:$4 sm:$0xff]   ;;  %v7395_v36 = vld [vmem:[#allocation8 + $0x28] ss:$16 sps:$4 sm:$0xff]  }
 0x77c   :  { %3311 = vmatprep.subr.bf16.mxu0 %v7364_v37  ;;  %3354 = vmatprep.subr.bf16.mxu1 %v7367_v39  ;;  %8324 = vst [vmem:[#allocation77_spill] sm:$0xff] %v7392_v22  ;;  %8325 = vst [vmem:[#allocation78_spill] sm:$0xff] %v7395_v36 }
 0x77d   :  { %v5201_v18 = vpop.eup %5200 }
 0x77e   :  { %v3208_v13 = vmul.f32 %v5201_v18, %v5199_v23  ;;  %v7398_v23 = vld [vmem:[#allocation8 + $0x44] ss:$16 sps:$4 sm:$0xff]   ;;  %v7401_v18 = vld [vmem:[#allocation8 + $0x4c] ss:$16 sps:$4 sm:$0xff]  }
 0x77f   :  { %3312 = vmatpush1.bf16.msra.mxu0 %v7370_v59  ;;  %3355 = vmatpush1.bf16.msra.mxu1 %v7373_v62  ;;  %8326 = vst [vmem:[#allocation79_spill] sm:$0xff] %v7398_v23  ;;  %8327 = vst [vmem:[#allocation80_spill] sm:$0xff] %v7401_v18 }
 0x780   :  { %3444 = vmatprep.subr.bf16.mxu0 %v7124_v26  ;;  %3487 = vmatprep.subr.bf16.mxu1 %v7127_v40  ;;  %v3209_v17 = vpack.c.bf16 %v3208_v13, %v3207_v63  ;;  %v7404_v63 = vld [vmem:[#allocation8 + $0x40] ss:$16 sps:$4 sm:$0xff]   ;;  %v7407_v13 = vld [vmem:[#allocation8 + $0x48] ss:$16 sps:$4 sm:$0xff]  }
 0x781   :  { %8328 = vst [vmem:[#allocation81_spill] sm:$0xff] %v7404_v63  ;;  %8329 = vst [vmem:[#allocation82_spill] sm:$0xff] %v7407_v13 }
 0x782   :  { %3330 = vmatmul.mubr.bf16.vlgmr.msra.gmra.mrb[68].mxu0 %v3209_v17  ;;  %3373 = vmatmul.mubr.bf16.vlgmr.msra.gmra.mrb[84].mxu1 %v3209_v17 }
 0x783   :  { %3445 = vmatpush1.bf16.msra.mxu0 %v7378_v56  ;;  %3488 = vmatpush1.bf16.msra.mxu1 %v7381_v4 }
 0x784   :  { %3446 = vmatprep.subr.bf16.mxu0 %v7384_v28  ;;  %3489 = vmatprep.subr.bf16.mxu1 %v7387_v1 }
 0x785   :  { %3476 = vmatprep.mubr.bf16.mxu0 %v8047_v8  ;;  %3519 = vmatprep.mubr.bf16.mxu1 %v8047_v8 }
 0x787   :  { %3447 = vmatpush1.bf16.msra.mxu0 %v7392_v22  ;;  %3490 = vmatpush1.bf16.msra.mxu1 %v7395_v36  ;;  %v7410_v22 = vld [vmem:[#allocation8 + $0x64] ss:$16 sps:$4 sm:$0xff]   ;;  %v7413_v36 = vld [vmem:[#allocation8 + $0x6c] ss:$16 sps:$4 sm:$0xff]  }
 0x788   :  { %3448 = vmatprep.subr.bf16.mxu0 %v7398_v23  ;;  %3491 = vmatprep.subr.bf16.mxu1 %v7401_v18  ;;  %8330 = vst [vmem:[#allocation83_spill] sm:$0xff] %v7410_v22  ;;  %8331 = vst [vmem:[#allocation84_spill] sm:$0xff] %v7413_v36  ;;  %v7416_v23 = vld [vmem:[#allocation8 + $0x60] ss:$16 sps:$4 sm:$0xff]   ;;  %v7419_v18 = vld [vmem:[#allocation8 + $0x68] ss:$16 sps:$4 sm:$0xff]  }
 0x789   :  { %8332 = vst [vmem:[#allocation85_spill] sm:$0xff] %v7416_v23  ;;  %8333 = vst [vmem:[#allocation86_spill] sm:$0xff] %v7419_v18 }
 0x78b   :  { %3449 = vmatpush1.bf16.msra.mxu0 %v7404_v63  ;;  %3492 = vmatpush1.bf16.msra.mxu1 %v7407_v13  ;;  %v7422_v63 = vld [vmem:[#allocation8 + $0x84] ss:$16 sps:$4 sm:$0xff]   ;;  %v7425_v13 = vld [vmem:[#allocation8 + $0x8c] ss:$16 sps:$4 sm:$0xff]  }
 0x78c   :  { %3450 = vmatprep.subr.bf16.mxu0 %v7410_v22  ;;  %3493 = vmatprep.subr.bf16.mxu1 %v7413_v36  ;;  %8334 = vst [vmem:[#allocation87_spill] sm:$0xff] %v7422_v63  ;;  %8335 = vst [vmem:[#allocation88_spill] sm:$0xff] %v7425_v13  ;;  %v7428_v22 = vld [vmem:[#allocation8 + $0x80] ss:$16 sps:$4 sm:$0xff]   ;;  %v7431_v36 = vld [vmem:[#allocation8 + $0x88] ss:$16 sps:$4 sm:$0xff]  }
 0x78d   :  { %8336 = vst [vmem:[#allocation56_spill] sm:$0xff] %v7428_v22  ;;  %8337 = vst [vmem:[#allocation63_spill] sm:$0xff] %v7431_v36 }
 0x78f   :  { %3451 = vmatpush1.bf16.msra.mxu0 %v7416_v23  ;;  %3494 = vmatpush1.bf16.msra.mxu1 %v7419_v18  ;;  %v7434_v23 = vld [vmem:[#allocation8 + $0xa4] ss:$16 sps:$4 sm:$0xff]   ;;  %v7437_v18 = vld [vmem:[#allocation8 + $0xac] ss:$16 sps:$4 sm:$0xff]  }
 0x790   :  { %3452 = vmatprep.subr.bf16.mxu0 %v7422_v63  ;;  %3495 = vmatprep.subr.bf16.mxu1 %v7425_v13  ;;  %8338 = vst [vmem:[#allocation58_spill] sm:$0xff] %v7434_v23  ;;  %8339 = vst [vmem:[#allocation64_spill] sm:$0xff] %v7437_v18  ;;  %v7440_v63 = vld [vmem:[#allocation8 + $0xa0] ss:$16 sps:$4 sm:$0xff]   ;;  %v7444_v13 = vld [vmem:[#allocation8 + $0xc4] ss:$16 sps:$4 sm:$0xff]  }
 0x791   :  { %8340 = vst [vmem:[#allocation97_spill] sm:$0xff] %v7440_v63  ;;  %8341 = vst [vmem:[#allocation98_spill] sm:$0xff] %v7444_v13 }
 0x793   :  { %3453 = vmatpush1.bf16.msra.mxu0 %v7428_v22  ;;  %3496 = vmatpush1.bf16.msra.mxu1 %v7431_v36  ;;  %v7448_v36 = vld [vmem:[#allocation8 + $0xc0] ss:$16 sps:$4 sm:$0xff]  }
 0x794   :  { %3454 = vmatprep.subr.bf16.mxu0 %v7434_v23  ;;  %3497 = vmatprep.subr.bf16.mxu1 %v7437_v18  ;;  %8342 = vst [vmem:[#allocation99_spill] sm:$0xff] %v7448_v36  ;;  %v7452_v23 = vld [vmem:[#allocation8 + $0xe4] ss:$16 sps:$4 sm:$0xff]  }
 0x795   :  { %8343 = vst [vmem:[#allocation100_spill] sm:$0xff] %v7452_v23 }
 0x797   :  { %3455 = vmatpush1.bf16.msra.mxu0 %v7440_v63  ;;  %3498 = vmatpush1.bf16.msra.mxu1 %v7153_v24  ;;  %v7456_v63 = vld [vmem:[#allocation8 + $0xe0] ss:$16 sps:$4 sm:$0xff]  }
 0x798   :  { %3456 = vmatprep.subr.bf16.mxu0 %v7444_v13  ;;  %3499 = vmatprep.subr.bf16.mxu1 %v7157_v33  ;;  %8344 = vst [vmem:[#allocation101_spill] sm:$0xff] %v7456_v63  ;;  %v8370_v33 = vld [vmem:[#allocation22_spill] sm:$0xff] }
 0x79b   :  { %3457 = vmatpush1.bf16.msra.mxu0 %v7448_v36  ;;  %3500 = vmatpush1.bf16.msra.mxu1 %v7161_v44 }
 0x79c   :  { %3458 = vmatprep.subr.bf16.mxu0 %v7452_v23  ;;  %3501 = vmatprep.subr.bf16.mxu1 %v7165_v45 }
 0x79f   :  { %3459 = vmatpush1.bf16.msra.mxu0 %v7456_v63  ;;  %3502 = vmatpush1.bf16.msra.mxu1 %v7169_v20  ;;  %v8369_v63 = vld [vmem:[#allocation21_spill] sm:$0xff] }
 0x7a0   :  { %3596 = vmatprep.subr.bf16.mxu0 %v7172_v10  ;;  %3639 = vmatprep.subr.bf16.mxu1 %v7175_v25  ;;  %v8350_v25 = vld [vmem:[#allocation26_spill] sm:$0xff]  ;;  %v8368_v10 = vld [vmem:[#allocation20_spill] sm:$0xff] }
 0x7a2   :  { %3477 = vmatmul.mubr.bf16.vlgmr.msra.gmra.mrb[72].mxu0 %v3209_v17  ;;  %3520 = vmatmul.mubr.bf16.vlgmr.msra.gmra.mrb[88].mxu1 %v3209_v17  ;;  %v8345_v17 = vld [vmem:[#allocation51_spill] sm:$0xff] }
 0x7a3   :  { %3597 = vmatpush1.bf16.msra.mxu0 %v7178_v38  ;;  %3640 = vmatpush1.bf16.msra.mxu1 %v7181_v49  ;;  %v8346_v49 = vld [vmem:[#allocation48_spill] sm:$0xff]  ;;  %v8349_v38 = vld [vmem:[#allocation25_spill] sm:$0xff] }
 0x7a4   :  { %3598 = vmatprep.subr.bf16.mxu0 %v7184_v50  ;;  %3641 = vmatprep.subr.bf16.mxu1 %v7187_v42  ;;  %v8347_v50 = vld [vmem:[#allocation53_spill] sm:$0xff]  ;;  %v8348_v42 = vld [vmem:[#allocation24_spill] sm:$0xff] }
 0x7a5   :  { %3628 = vmatprep.mubr.bf16.mxu0 %v8047_v8  ;;  %3671 = vmatprep.mubr.bf16.mxu1 %v8047_v8 }
 0x7a7   :  { %3599 = vmatpush1.bf16.msra.mxu0 %v7192_v48  ;;  %3642 = vmatpush1.bf16.msra.mxu1 %v7195_v9  ;;  %v8351_v48 = vld [vmem:[#allocation27_spill] sm:$0xff]  ;;  %v8352_v9 = vld [vmem:[#allocation28_spill] sm:$0xff] }
 0x7a8   :  { %3600 = vmatprep.subr.bf16.mxu0 %v7198_v2  ;;  %3643 = vmatprep.subr.bf16.mxu1 %v7201_v51  ;;  %v8353_v2 = vld [vmem:[#allocation29_spill] sm:$0xff]  ;;  %v8354_v51 = vld [vmem:[#allocation30_spill] sm:$0xff] }
 0x7ab   :  { %3601 = vmatpush1.bf16.msra.mxu0 %v7204_v14  ;;  %3644 = vmatpush1.bf16.msra.mxu1 %v8345_v17  ;;  %v8355_v14 = vld [vmem:[#allocation31_spill] sm:$0xff]  ;;  %v8356_v17 = vld [vmem:[#allocation32_spill] sm:$0xff] }
 0x7ac   :  { %3602 = vmatprep.subr.bf16.mxu0 %v8346_v49  ;;  %3645 = vmatprep.subr.bf16.mxu1 %v8347_v50  ;;  %v8357_v49 = vld [vmem:[#allocation33_spill] sm:$0xff]  ;;  %v8358_v50 = vld [vmem:[#allocation34_spill] sm:$0xff] }
 0x7af   :  { %3603 = vmatpush1.bf16.msra.mxu0 %v8348_v42  ;;  %3646 = vmatpush1.bf16.msra.mxu1 %v8349_v38  ;;  %v8359_v42 = vld [vmem:[#allocation35_spill] sm:$0xff]  ;;  %v8360_v38 = vld [vmem:[#allocation36_spill] sm:$0xff] }
 0x7b0   :  { %3604 = vmatprep.subr.bf16.mxu0 %v8350_v25  ;;  %3647 = vmatprep.subr.bf16.mxu1 %v8351_v48  ;;  %v8361_v25 = vld [vmem:[#allocation37_spill] sm:$0xff]  ;;  %v8362_v48 = vld [vmem:[#allocation38_spill] sm:$0xff] }
 0x7b3   :  { %3605 = vmatpush1.bf16.msra.mxu0 %v8352_v9  ;;  %3648 = vmatpush1.bf16.msra.mxu1 %v8353_v2  ;;  %v8363_v9 = vld [vmem:[#allocation39_spill] sm:$0xff]  ;;  %v8364_v2 = vld [vmem:[#allocation40_spill] sm:$0xff] }
 0x7b4   :  { %3606 = vmatprep.subr.bf16.mxu0 %v8354_v51  ;;  %3649 = vmatprep.subr.bf16.mxu1 %v8355_v14  ;;  %v8365_v51 = vld [vmem:[#allocation41_spill] sm:$0xff]  ;;  %v8366_v14 = vld [vmem:[#allocation71_spill] sm:$0xff] }
 0x7b7   :  { %3607 = vmatpush1.bf16.msra.mxu0 %v8356_v17  ;;  %3650 = vmatpush1.bf16.msra.mxu1 %v8357_v49  ;;  %v8367_v17 = vld [vmem:[#allocation72_spill] sm:$0xff] }
 0x7b8   :  { %3608 = vmatprep.subr.bf16.mxu0 %v8358_v50  ;;  %3651 = vmatprep.subr.bf16.mxu1 %v8359_v42 }
 0x7bb   :  { %3609 = vmatpush1.bf16.msra.mxu0 %v8360_v38  ;;  %3652 = vmatpush1.bf16.msra.mxu1 %v8361_v25 }
 0x7bc   :  { %3610 = vmatprep.subr.bf16.mxu0 %v8362_v48  ;;  %3653 = vmatprep.subr.bf16.mxu1 %v8363_v9 }
 0x7bf   :  { %3611 = vmatpush1.bf16.msra.mxu0 %v8364_v2  ;;  %3654 = vmatpush1.bf16.msra.mxu1 %v8365_v51 }
 0x7c0   :  { %3682 = vmatprep.subr.bf16.mxu0 %v8366_v14  ;;  %3725 = vmatprep.subr.bf16.mxu1 %v8367_v17 }
 0x855   :  { %v3331_v49 = vpop.f32.mrb[68].mxu0  ;;  %v3374_v50 = vpop.f32.mrb[84].mxu1 }
 0x856   :  { %v3383_v42 = vadd.f32 %v3331_v49, %v8368_v10  ;;  %v3333_v20 = vpop.f32.mrb[69].mxu0  ;;  %v3376_v38 = vpop.f32.mrb[85].mxu1 }
 0x857   :  { %v3384_v25 = vadd.f32 %v3333_v20, %v8369_v63  ;;  %v3335_v45 = vpop.f32.mrb[70].mxu0  ;;  %v3378_v48 = vpop.f32.mrb[86].mxu1  ;;  %v3386_v49 = vadd.f32 %v3376_v38, %v8370_v33  ;;  %v8371_v20 = vld [vmem:[#allocation23_spill] sm:$0xff] }
 0x858   :  { %v4534_v23 = vmul.f32 -1.442695, %v3383_v42  ;;  %v3387_v9 = vadd.f32 %v3335_v45, %v8368_v10  ;;  %v3337_v2 = vpop.f32.mrb[71].mxu0  ;;  %v3380_v44 = vpop.f32.mrb[87].mxu1  ;;  %v3385_v24 = vadd.f32 %v3374_v50, %v8371_v20 }
 0x859   :  { %v4536_v51 = vmul.f32 -1.442695, %v3384_v25  ;;  %v3388_v14 = vadd.f32 %v3337_v2, %v8369_v63  ;;  %v3390_v13 = vadd.f32 %v3380_v44, %v8370_v33  ;;  %v4538_v42 = vmul.f32 -1.442695, %v3386_v49 }
 0x85a   :  { %5202 = vpow2.f32 %v4534_v23  ;;  %v4535_v17 = vmul.f32 -1.442695, %v3387_v9  ;;  %v3389_v2 = vadd.f32 %v3378_v48, %v8371_v20 }
 0x85b   :  { %5204 = vpow2.f32 %v4536_v51  ;;  %v4537_v36 = vmul.f32 -1.442695, %v3388_v14  ;;  %v4539_v18 = vmul.f32 -1.442695, %v3390_v13 }
 0x85c   :  { %5206 = vpow2.f32 %v4535_v17 }
 0x85d   :  { %5208 = vpow2.f32 %v4537_v36 }
 0x85e   :  { %5210 = vtanh.f32 %v3385_v24 }
 0x85f   :  { %5212 = vpow2.f32 %v4538_v42 }
 0x860   :  { %5214 = vpow2.f32 %v4539_v18  ;;  %v8372_v18 = vld [vmem:[#allocation43_spill] sm:$0xff] }
 0x861   :  { %v3530_v42 = vunpack.c.l.bf16 %v8372_v18 }
 0x864   :  { %v5203_v45 = vpop.eup %5202 }
 0x865   :  { %v5205_v10 = vpop.eup %5204  ;;  %v3397_v25 = vadd.f32 1.0, %v5203_v45 }
 0x866   :  { %v3409_v9 = vadd.f32 1.0, %v5205_v10  ;;  %v5207_v51 = vpop.eup %5206 }
 0x867   :  { %5216 = vrcp.f32 %v3397_v25  ;;  %v3398_v38 = vadd.f32 1.0, %v5207_v51  ;;  %v5209_v14 = vpop.eup %5208 }
 0x868   :  { %5218 = vrcp.f32 %v3409_v9  ;;  %v3410_v44 = vadd.f32 1.0, %v5209_v14  ;;  %v5211_v50 = vpop.eup %5210  ;;  %v8373_v9 = vld [vmem:[#allocation67_spill] sm:$0xff]  ;;  %v3534_v14 = vunpack.c.h.bf16 %v8372_v18 }
 0x869   :  { %5220 = vtanh.f32 %v3389_v2  ;;  %v5213_v36 = vpop.eup %5212  ;;  %v3532_v51 = vunpack.c.l.bf16 %v8373_v9  ;;  %v8374_v2 = vld [vmem:[#allocation44_spill] sm:$0xff]  ;;  %v3536_v28 = vunpack.c.h.bf16 %v8373_v9 }
 0x86a   :  { %5222 = vrcp.f32 %v3398_v38  ;;  %v5215_v23 = vpop.eup %5214  ;;  %v3423_v10 = vadd.f32 1.0, %v5213_v36  ;;  %v3531_v38 = vunpack.c.l.bf16 %v8374_v2 }
 0x86b   :  { %5224 = vrcp.f32 %v3410_v44  ;;  %v3424_v25 = vadd.f32 1.0, %v5215_v23 }
 0x86c   :  { %5226 = vrcp.f32 %v3423_v10 }
 0x86d   :  { %5228 = vrcp.f32 %v3424_v25 }
 0x871   :  { %v5217_v24 = vpop.eup %5216 }
 0x872   :  { %v5219_v13 = vpop.eup %5218  ;;  %v3431_v17 = vmul.f32 %v5217_v24, %v5211_v50  ;;  %v8375_v50 = vld [vmem:[#allocation68_spill] sm:$0xff] }
 0x873   :  { %v5221_v49 = vpop.eup %5220  ;;  %v3429_v48 = vmul.f32 %v5219_v13, %v7289_v0  ;;  %v3533_v24 = vunpack.c.l.bf16 %v8375_v50  ;;  %v3535_v0 = vunpack.c.h.bf16 %v8374_v2  ;;  %v3537_v4 = vunpack.c.h.bf16 %v8375_v50 }
 0x874   :  { %v5223_v45 = vpop.eup %5222 }
 0x875   :  { %v7509_v44 = vadd.f32 %v3431_v17, %v3429_v48  ;;  %v3432_v20 = vmul.f32 %v5223_v45, %v5221_v49  ;;  %v3478_v33 = vpop.f32.mrb[72].mxu0  ;;  %v3521_v63 = vpop.f32.mrb[88].mxu1 }
 0x876   :  { %v5225_v36 = vpop.eup %5224  ;;  %v3538_v13 = vadd.f32 %v3530_v42, %v3478_v33  ;;  %v3540_v22 = vadd.f32 %v3532_v51, %v3521_v63  ;;  %v3480_v1 = vpop.f32.mrb[73].mxu0 }
 0x877   :  { %v3523_v23 = vpop.f32.mrb[89].mxu1  ;;  %v3430_v17 = vmul.f32 %v5225_v36, %v7297_v60  ;;  %v3539_v48 = vadd.f32 %v3531_v38, %v3480_v1  ;;  %v3482_v18 = vpop.f32.mrb[74].mxu0  ;;  %5230 = vtanh.f32 %v7509_v44 }
 0x878   :  { %v3541_v49 = vadd.f32 %v3533_v24, %v3523_v23  ;;  %v3525_v45 = vpop.f32.mrb[90].mxu1  ;;  %v4540_v56 = vmul.f32 -1.442695, %v3538_v13  ;;  %v3542_v40 = vadd.f32 %v3534_v14, %v3482_v18  ;;  %v3484_v26 = vpop.f32.mrb[75].mxu0 }
 0x879   :  { %v3544_v2 = vadd.f32 %v3536_v28, %v3525_v45  ;;  %v3527_v33 = vpop.f32.mrb[91].mxu1  ;;  %v7517_v63 = vadd.f32 %v3432_v20, %v3430_v17  ;;  %v4542_v42 = vmul.f32 -1.442695, %v3539_v48  ;;  %v3543_v9 = vadd.f32 %v3535_v0, %v3484_v26  ;;  %v5227_v1 = vpop.eup %5226 }
 0x87a   :  { %5232 = vpow2.f32 %v4540_v56  ;;  %v4541_v10 = vmul.f32 -1.442695, %v3542_v40  ;;  %v3545_v51 = vadd.f32 %v3537_v4, %v3527_v33  ;;  %v5229_v25 = vpop.eup %5228  ;;  %v4544_v28 = vmul.f32 -1.442695, %v3541_v49 }
 0x87b   :  { %5234 = vtanh.f32 %v7517_v63  ;;  %v4543_v60 = vmul.f32 -1.442695, %v3543_v9 }
 0x87c   :  { %5236 = vpow2.f32 %v4542_v42  ;;  %v4545_v26 = vmul.f32 -1.442695, %v3545_v51 }
 0x87d   :  { %5238 = vpow2.f32 %v4541_v10 }
 0x87e   :  { %5240 = vpow2.f32 %v4543_v60 }
 0x87f   :  { %5242 = vtanh.f32 %v3540_v22 }
 0x880   :  { %5244 = vpow2.f32 %v4544_v28  ;;  %v8381_v28 = vld [vmem:[#allocation76_spill] sm:$0xff] }
 0x881   :  { %v5231_v38 = vpop.eup %5230 }
 0x882   :  { %v3437_v56 = vmul.f32 %v5231_v38, %v5227_v1  ;;  %v8382_v38 = vld [vmem:[#allocation77_spill] sm:$0xff] }
 0x884   :  { %v5233_v14 = vpop.eup %5232 }
 0x885   :  { %v5235_v50 = vpop.eup %5234  ;;  %v3552_v24 = vadd.f32 1.0, %v5233_v14  ;;  %v8383_v14 = vld [vmem:[#allocation78_spill] sm:$0xff] }
 0x886   :  { %v5237_v20 = vpop.eup %5236  ;;  %v3438_v40 = vmul.f32 %v5235_v50, %v5229_v25  ;;  %v8380_v25 = vld [vmem:[#allocation75_spill] sm:$0xff] }
 0x887   :  { %5246 = vrcp.f32 %v3552_v24  ;;  %v3564_v4 = vadd.f32 1.0, %v5237_v20  ;;  %v5239_v0 = vpop.eup %5238  ;;  %v8384_v50 = vld [vmem:[#allocation79_spill] sm:$0xff]  ;;  %v8385_v24 = vld [vmem:[#allocation80_spill] sm:$0xff]  ;;  %v8386_v20 = vld [vmem:[#allocation81_spill] sm:$0xff] }
 0x888   :  { %5248 = vtanh.f32 %v3544_v2  ;;  %v3595_v36 = vpack.c.bf16 %v3438_v40, %v3437_v56  ;;  %v3553_v13 = vadd.f32 1.0, %v5239_v0  ;;  %v5241_v23 = vpop.eup %5240  ;;  %v8388_v56 = vld [vmem:[#allocation83_spill] sm:$0xff]  ;;  %v8389_v40 = vld [vmem:[#allocation84_spill] sm:$0xff]  ;;  %v8391_v0 = vld [vmem:[#allocation86_spill] sm:$0xff] }
 0x889   :  { %5250 = vrcp.f32 %v3564_v4  ;;  %v3565_v17 = vadd.f32 1.0, %v5241_v23  ;;  %v5243_v22 = vpop.eup %5242  ;;  %v8390_v4 = vld [vmem:[#allocation85_spill] sm:$0xff]  ;;  %v8394_v23 = vld [vmem:[#allocation56_spill] sm:$0xff] }
 0x88a   :  { %5252 = vpow2.f32 %v4545_v26  ;;  %3629 = vmatmul.mubr.bf16.vlgmr.msra.gmra.mrb[76].mxu0 %v3595_v36  ;;  %3672 = vmatmul.mubr.bf16.vlgmr.msra.gmra.mrb[92].mxu1 %v3595_v36  ;;  %v5245_v48 = vpop.eup %5244  ;;  %v8387_v26 = vld [vmem:[#allocation82_spill] sm:$0xff]  ;;  %v8392_v36 = vld [vmem:[#allocation87_spill] sm:$0xff] }
 0x88b   :  { %5254 = vrcp.f32 %v3553_v13  ;;  %3683 = vmatpush1.bf16.msra.mxu0 %v7060_v43  ;;  %3726 = vmatpush1.bf16.msra.mxu1 %v7063_v54  ;;  %v3578_v42 = vadd.f32 1.0, %v5245_v48  ;;  %v8393_v13 = vld [vmem:[#allocation88_spill] sm:$0xff] }
 0x88c   :  { %3684 = vmatprep.subr.bf16.mxu0 %v7302_v27  ;;  %3727 = vmatprep.subr.bf16.mxu1 %v7305_v3  ;;  %5256 = vrcp.f32 %v3565_v17  ;;  %v8395_v17 = vld [vmem:[#allocation63_spill] sm:$0xff]  ;;  %v8397_v48 = vld [vmem:[#allocation64_spill] sm:$0xff] }
 0x88d   :  { %3714 = vmatprep.mubr.bf16.mxu0 %v8047_v8  ;;  %3757 = vmatprep.mubr.bf16.mxu1 %v8047_v8  ;;  %5258 = vrcp.f32 %v3578_v42  ;;  %v8405_v42 = vld [vmem:[#allocation46_spill] sm:$0xff] }
 0x88f   :  { %3685 = vmatpush1.bf16.msra.mxu0 %v7310_v55  ;;  %3728 = vmatpush1.bf16.msra.mxu1 %v7313_v57 }
 0x890   :  { %3686 = vmatprep.subr.bf16.mxu0 %v7316_v58  ;;  %3729 = vmatprep.subr.bf16.mxu1 %v7319_v16 }
 0x891   :  { %v5247_v43 = vpop.eup %5246 }
 0x892   :  { %v5249_v54 = vpop.eup %5248  ;;  %v3586_v49 = vmul.f32 %v5247_v43, %v5243_v22  ;;  %v8396_v22 = vld [vmem:[#allocation58_spill] sm:$0xff]  ;;  %v8398_v43 = vld [vmem:[#allocation97_spill] sm:$0xff] }
 0x893   :  { %v5251_v18 = vpop.eup %5250  ;;  %3687 = vmatpush1.bf16.msra.mxu0 %v7322_v12  ;;  %3730 = vmatpush1.bf16.msra.mxu1 %v7325_v21 }
 0x894   :  { %v5253_v45 = vpop.eup %5252  ;;  %v3584_v2 = vmul.f32 %v5251_v18, %v7335_v34  ;;  %3688 = vmatprep.subr.bf16.mxu0 %v7329_v46  ;;  %3731 = vmatprep.subr.bf16.mxu1 %v7332_v53  ;;  %v8401_v18 = vld [vmem:[#allocation61_spill] sm:$0xff] }
 0x895   :  { %v5255_v33 = vpop.eup %5254  ;;  %v3579_v60 = vadd.f32 1.0, %v5253_v45  ;;  %v8402_v45 = vld [vmem:[#allocation99_spill] sm:$0xff] }
 0x896   :  { %v7535_v9 = vadd.f32 %v3586_v49, %v3584_v2  ;;  %v3587_v10 = vmul.f32 %v5255_v33, %v5249_v54  ;;  %v5257_v51 = vpop.eup %5256  ;;  %v8399_v54 = vld [vmem:[#allocation54_spill] sm:$0xff]  ;;  %v8404_v33 = vld [vmem:[#allocation100_spill] sm:$0xff] }
 0x897   :  { %3689 = vmatpush1.bf16.msra.mxu0 %v7081_v31  ;;  %3732 = vmatpush1.bf16.msra.mxu1 %v7084_v41  ;;  %v3585_v1 = vmul.f32 %v5257_v51, %v7347_v19  ;;  %v5259_v31 = vpop.eup %5258  ;;  %v8379_v19 = vld [vmem:[#allocation74_spill] sm:$0xff]  ;;  %v8407_v51 = vld [vmem:[#allocation49_spill] sm:$0xff] }
 0x898   :  { %3690 = vmatprep.subr.bf16.mxu0 %v7340_v32  ;;  %3733 = vmatprep.subr.bf16.mxu1 %v7343_v47  ;;  %5260 = vtanh.f32 %v7535_v9  ;;  %v8400_v49 = vld [vmem:[#allocation98_spill] sm:$0xff] }
 0x899   :  { %v7543_v34 = vadd.f32 %v3587_v10, %v3585_v1  ;;  %5262 = vrcp.f32 %v3579_v60  ;;  %v8403_v2 = vld [vmem:[#allocation42_spill] sm:$0xff]  ;;  %v8406_v10 = vld [vmem:[#allocation101_spill] sm:$0xff]  ;;  %v8408_v60 = vld [vmem:[#allocation55_spill] sm:$0xff] }
 0x89a   :  { %v8409_v1 = vld [vmem:[#allocation50_spill] sm:$0xff] }
 0x89b   :  { %3691 = vmatpush1.bf16.msra.mxu0 %v7093_v52  ;;  %3734 = vmatpush1.bf16.msra.mxu1 %v7096_v35  ;;  %5264 = vtanh.f32 %v7543_v34 }
 0x89c   :  { %3692 = vmatprep.subr.bf16.mxu0 %v7100_v15  ;;  %3735 = vmatprep.subr.bf16.mxu1 %v7103_v7 }
 0x89f   :  { %3693 = vmatpush1.bf16.msra.mxu0 %v7106_v30  ;;  %3736 = vmatpush1.bf16.msra.mxu1 %v7109_v5  ;;  %v8376_v30 = vld [vmem:[#allocation52_spill] sm:$0xff]  ;;  %v8377_v5 = vld [vmem:[#allocation59_spill] sm:$0xff] }
 0x8a0   :  { %3694 = vmatprep.subr.bf16.mxu0 %v7112_v6  ;;  %3737 = vmatprep.subr.bf16.mxu1 %v7115_v61  ;;  %v8378_v61 = vld [vmem:[#allocation73_spill] sm:$0xff] }
 0x8a2   :  { %v5261_v41 = vpop.eup %5260 }
 0x8a3   :  { %3695 = vmatpush1.bf16.msra.mxu0 %v7358_v29  ;;  %3738 = vmatpush1.bf16.msra.mxu1 %v7361_v11  ;;  %v5263_v52 = vpop.eup %5262  ;;  %v3592_v15 = vmul.f32 %v5261_v41, %v5259_v31  ;;  %v8410_v31 = vld [vmem:[#allocation57_spill] sm:$0xff] }
 0x8a4   :  { %3696 = vmatprep.subr.bf16.mxu0 %v7364_v37  ;;  %3739 = vmatprep.subr.bf16.mxu1 %v7367_v39  ;;  %v8411_v41 = vld [vmem:[#allocation89_spill] sm:$0xff] }
 0x8a5   :  { %v5265_v35 = vpop.eup %5264 }
 0x8a6   :  { %v3593_v7 = vmul.f32 %v5265_v35, %v5263_v52  ;;  %v8412_v52 = vld [vmem:[#allocation90_spill] sm:$0xff]  ;;  %v8413_v35 = vld [vmem:[#allocation91_spill] sm:$0xff] }
 0x8a7   :  { %3697 = vmatpush1.bf16.msra.mxu0 %v7370_v59  ;;  %3740 = vmatpush1.bf16.msra.mxu1 %v7373_v62 }
 0x8a8   :  { %3829 = vmatprep.subr.bf16.mxu0 %v8376_v30  ;;  %3872 = vmatprep.subr.bf16.mxu1 %v8377_v5  ;;  %v3594_v6 = vpack.c.bf16 %v3593_v7, %v3592_v15  ;;  %v8414_v15 = vld [vmem:[#allocation92_spill] sm:$0xff]  ;;  %v8415_v7 = vld [vmem:[#allocation93_spill] sm:$0xff]  ;;  %v8416_v30 = vld [vmem:[#allocation94_spill] sm:$0xff] }
 0x8a9   :  { %v8417_v5 = vld [vmem:[#allocation95_spill] sm:$0xff] }
 0x8aa   :  { %3715 = vmatmul.mubr.bf16.vlgmr.msra.gmra.mrb[76].mxu0 %v3594_v6  ;;  %3758 = vmatmul.mubr.bf16.vlgmr.msra.gmra.mrb[92].mxu1 %v3594_v6 }
 0x8ab   :  { %3830 = vmatpush1.bf16.msra.mxu0 %v8378_v61  ;;  %3873 = vmatpush1.bf16.msra.mxu1 %v8379_v19  ;;  %v8419_v61 = vld [vmem:[#allocation51_spill] sm:$0xff]  ;;  %v8420_v19 = vld [vmem:[#allocation48_spill] sm:$0xff] }
 0x8ac   :  { %3831 = vmatprep.subr.bf16.mxu0 %v8380_v25  ;;  %3874 = vmatprep.subr.bf16.mxu1 %v8381_v28  ;;  %v8421_v25 = vld [vmem:[#allocation53_spill] sm:$0xff]  ;;  %v8422_v28 = vld [vmem:[#allocation24_spill] sm:$0xff] }
 0x8ad   :  { %3861 = vmatprep.mubr.bf16.mxu0 %v8047_v8  ;;  %3904 = vmatprep.mubr.bf16.mxu1 %v8047_v8 }
 0x8af   :  { %3832 = vmatpush1.bf16.msra.mxu0 %v8382_v38  ;;  %3875 = vmatpush1.bf16.msra.mxu1 %v8383_v14  ;;  %v8423_v38 = vld [vmem:[#allocation25_spill] sm:$0xff]  ;;  %v8424_v14 = vld [vmem:[#allocation26_spill] sm:$0xff] }
 0x8b0   :  { %3833 = vmatprep.subr.bf16.mxu0 %v8384_v50  ;;  %3876 = vmatprep.subr.bf16.mxu1 %v8385_v24  ;;  %v8425_v50 = vld [vmem:[#allocation27_spill] sm:$0xff]  ;;  %v8426_v24 = vld [vmem:[#allocation28_spill] sm:$0xff] }
 0x8b3   :  { %3834 = vmatpush1.bf16.msra.mxu0 %v8386_v20  ;;  %3877 = vmatpush1.bf16.msra.mxu1 %v8387_v26  ;;  %v8427_v20 = vld [vmem:[#allocation29_spill] sm:$0xff]  ;;  %v8428_v26 = vld [vmem:[#allocation30_spill] sm:$0xff] }
 0x8b4   :  { %3835 = vmatprep.subr.bf16.mxu0 %v8388_v56  ;;  %3878 = vmatprep.subr.bf16.mxu1 %v8389_v40  ;;  %v8429_v56 = vld [vmem:[#allocation31_spill] sm:$0xff]  ;;  %v8430_v40 = vld [vmem:[#allocation32_spill] sm:$0xff] }
 0x8b7   :  { %3836 = vmatpush1.bf16.msra.mxu0 %v8390_v4  ;;  %3879 = vmatpush1.bf16.msra.mxu1 %v8391_v0  ;;  %v8431_v4 = vld [vmem:[#allocation33_spill] sm:$0xff]  ;;  %v8432_v0 = vld [vmem:[#allocation34_spill] sm:$0xff] }
 0x8b8   :  { %3837 = vmatprep.subr.bf16.mxu0 %v8392_v36  ;;  %3880 = vmatprep.subr.bf16.mxu1 %v8393_v13  ;;  %v8433_v36 = vld [vmem:[#allocation35_spill] sm:$0xff]  ;;  %v8434_v13 = vld [vmem:[#allocation36_spill] sm:$0xff] }
 0x8bb   :  { %3838 = vmatpush1.bf16.msra.mxu0 %v8394_v23  ;;  %3881 = vmatpush1.bf16.msra.mxu1 %v8395_v17  ;;  %v8435_v23 = vld [vmem:[#allocation37_spill] sm:$0xff]  ;;  %v8436_v17 = vld [vmem:[#allocation38_spill] sm:$0xff] }
 0x8bc   :  { %3839 = vmatprep.subr.bf16.mxu0 %v8396_v22  ;;  %3882 = vmatprep.subr.bf16.mxu1 %v8397_v48  ;;  %v8437_v22 = vld [vmem:[#allocation39_spill] sm:$0xff]  ;;  %v8438_v48 = vld [vmem:[#allocation40_spill] sm:$0xff] }
 0x8bf   :  { %3840 = vmatpush1.bf16.msra.mxu0 %v8398_v43  ;;  %3883 = vmatpush1.bf16.msra.mxu1 %v8399_v54  ;;  %v8439_v43 = vld [vmem:[#allocation41_spill] sm:$0xff]  ;;  %v8440_v54 = vld [vmem:[#allocation71_spill] sm:$0xff] }
 0x8c0   :  { %3841 = vmatprep.subr.bf16.mxu0 %v8400_v49  ;;  %3884 = vmatprep.subr.bf16.mxu1 %v8401_v18  ;;  %v8441_v49 = vld [vmem:[#allocation72_spill] sm:$0xff] }
 0x8c3   :  { %3842 = vmatpush1.bf16.msra.mxu0 %v8402_v45  ;;  %3885 = vmatpush1.bf16.msra.mxu1 %v8403_v2  ;;  %v8442_v2 = vld [vmem:[#allocation20_spill] sm:$0xff] }
 0x8c4   :  { %3843 = vmatprep.subr.bf16.mxu0 %v8404_v33  ;;  %3886 = vmatprep.subr.bf16.mxu1 %v8405_v42 }
 0x8c7   :  { %3844 = vmatpush1.bf16.msra.mxu0 %v8406_v10  ;;  %3887 = vmatpush1.bf16.msra.mxu1 %v8407_v51  ;;  %v8443_v51 = vld [vmem:[#allocation21_spill] sm:$0xff] }
 0x8c8   :  { %3981 = vmatprep.subr.bf16.mxu0 %v8408_v60  ;;  %4024 = vmatprep.subr.bf16.mxu1 %v8409_v1 }
 0x8ca   :  { %3862 = vmatmul.mubr.bf16.vlgmr.msra.gmra.mrb[80].mxu0 %v3594_v6  ;;  %3905 = vmatmul.mubr.bf16.vlgmr.msra.gmra.mrb[96].mxu1 %v3594_v6  ;;  %v8418_v6 = vld [vmem:[#allocation96_spill] sm:$0xff] }
 0x8cb   :  { %3982 = vmatpush1.bf16.msra.mxu0 %v8410_v31  ;;  %4025 = vmatpush1.bf16.msra.mxu1 %v8411_v41 }
 0x8cc   :  { %3983 = vmatprep.subr.bf16.mxu0 %v8412_v52  ;;  %4026 = vmatprep.subr.bf16.mxu1 %v8413_v35 }
 0x8cd   :  { %4013 = vmatprep.mubr.bf16.mxu0 %v8047_v8  ;;  %4056 = vmatprep.mubr.bf16.mxu1 %v8047_v8 }
 0x8cf   :  { %3984 = vmatpush1.bf16.msra.mxu0 %v8414_v15  ;;  %4027 = vmatpush1.bf16.msra.mxu1 %v8415_v7 }
 0x8d0   :  { %3985 = vmatprep.subr.bf16.mxu0 %v8416_v30  ;;  %4028 = vmatprep.subr.bf16.mxu1 %v8417_v5 }
 0x8d3   :  { %3986 = vmatpush1.bf16.msra.mxu0 %v8418_v6  ;;  %4029 = vmatpush1.bf16.msra.mxu1 %v8419_v61  ;;  %v8444_v61 = vld [vmem:[#allocation22_spill] sm:$0xff] }
 0x8d4   :  { %3987 = vmatprep.subr.bf16.mxu0 %v8420_v19  ;;  %4030 = vmatprep.subr.bf16.mxu1 %v8421_v25 }
 0x8d7   :  { %3988 = vmatpush1.bf16.msra.mxu0 %v8422_v28  ;;  %4031 = vmatpush1.bf16.msra.mxu1 %v8423_v38  ;;  %v8445_v28 = vld [vmem:[#allocation23_spill] sm:$0xff] }
 0x8d8   :  { %3989 = vmatprep.subr.bf16.mxu0 %v8424_v14  ;;  %4032 = vmatprep.subr.bf16.mxu1 %v8425_v50 }
 0x8db   :  { %3990 = vmatpush1.bf16.msra.mxu0 %v8426_v24  ;;  %4033 = vmatpush1.bf16.msra.mxu1 %v8427_v20 }
 0x8dc   :  { %3991 = vmatprep.subr.bf16.mxu0 %v8428_v26  ;;  %4034 = vmatprep.subr.bf16.mxu1 %v8429_v56 }
 0x8df   :  { %3992 = vmatpush1.bf16.msra.mxu0 %v8430_v40  ;;  %4035 = vmatpush1.bf16.msra.mxu1 %v8431_v4 }
 0x8e0   :  { %3993 = vmatprep.subr.bf16.mxu0 %v8432_v0  ;;  %4036 = vmatprep.subr.bf16.mxu1 %v8433_v36 }
 0x8e3   :  { %3994 = vmatpush1.bf16.msra.mxu0 %v8434_v13  ;;  %4037 = vmatpush1.bf16.msra.mxu1 %v8435_v23 }
 0x8e4   :  { %3995 = vmatprep.subr.bf16.mxu0 %v8436_v17  ;;  %4038 = vmatprep.subr.bf16.mxu1 %v8437_v22 }
 0x8e7   :  { %3996 = vmatpush1.bf16.msra.mxu0 %v8438_v48  ;;  %4039 = vmatpush1.bf16.msra.mxu1 %v8439_v43 }
 0x8e8   :  { %4067 = vmatprep.subr.bf16.mxu0 %v8440_v54  ;;  %4110 = vmatprep.subr.bf16.mxu1 %v8441_v49 }
 0x97d   :  { %v3716_v18 = vpop.f32.mrb[76].mxu0  ;;  %v3759_v45 = vpop.f32.mrb[92].mxu1 }
 0x97e   :  { %v3768_v33 = vadd.f32 %v3716_v18, %v8442_v2  ;;  %v3718_v42 = vpop.f32.mrb[77].mxu0  ;;  %v3761_v10 = vpop.f32.mrb[93].mxu1  ;;  %v3770_v38 = vadd.f32 %v3759_v45, %v8445_v28 }
 0x97f   :  { %v3769_v60 = vadd.f32 %v3718_v42, %v8443_v51  ;;  %v3720_v1 = vpop.f32.mrb[78].mxu0  ;;  %v3763_v31 = vpop.f32.mrb[94].mxu1  ;;  %v3771_v19 = vadd.f32 %v3761_v10, %v8444_v61 }
 0x980   :  { %v4546_v41 = vmul.f32 -1.442695, %v3768_v33  ;;  %v3772_v52 = vadd.f32 %v3720_v1, %v8442_v2  ;;  %v3722_v35 = vpop.f32.mrb[79].mxu0  ;;  %v3765_v15 = vpop.f32.mrb[95].mxu1  ;;  %v3774_v56 = vadd.f32 %v3763_v31, %v8445_v28  ;;  %v8446_v33 = vld [vmem:[#allocation45_spill] sm:$0xff] }
 0x981   :  { %v4548_v7 = vmul.f32 -1.442695, %v3769_v60  ;;  %v3773_v30 = vadd.f32 %v3722_v35, %v8443_v51  ;;  %v3775_v25 = vadd.f32 %v3765_v15, %v8444_v61  ;;  %v4550_v14 = vmul.f32 -1.442695, %v3771_v19  ;;  %v8447_v1 = vld [vmem:[#allocation69_spill] sm:$0xff] }
 0x982   :  { %5266 = vpow2.f32 %v4546_v41  ;;  %v4547_v5 = vmul.f32 -1.442695, %v3772_v52  ;;  %v3915_v42 = vunpack.c.l.bf16 %v8446_v33  ;;  %v3917_v31 = vunpack.c.l.bf16 %v8447_v1  ;;  %v8448_v41 = vld [vmem:[#allocation47_spill] sm:$0xff] }
 0x983   :  { %5268 = vpow2.f32 %v4548_v7  ;;  %v4549_v6 = vmul.f32 -1.442695, %v3773_v30  ;;  %v4551_v50 = vmul.f32 -1.442695, %v3775_v25  ;;  %v3916_v52 = vunpack.c.l.bf16 %v8448_v41 }
 0x984   :  { %5270 = vpow2.f32 %v4547_v5  ;;  %v3919_v35 = vunpack.c.h.bf16 %v8446_v33 }
 0x985   :  { %5272 = vpow2.f32 %v4549_v6  ;;  %v8449_v6 = vld [vmem:[#allocation70_spill] sm:$0xff] }
 0x986   :  { %5274 = vtanh.f32 %v3770_v38  ;;  %v3918_v19 = vunpack.c.l.bf16 %v8449_v6 }
 0x987   :  { %5276 = vpow2.f32 %v4550_v14 }
 0x988   :  { %5278 = vpow2.f32 %v4551_v50 }
 0x98c   :  { %v5267_v24 = vpop.eup %5266 }
 0x98d   :  { %v5269_v20 = vpop.eup %5268  ;;  %v3782_v26 = vadd.f32 1.0, %v5267_v24 }
 0x98e   :  { %v3794_v40 = vadd.f32 1.0, %v5269_v20  ;;  %v5271_v4 = vpop.eup %5270  ;;  %v3921_v20 = vunpack.c.h.bf16 %v8447_v1 }
 0x98f   :  { %5280 = vrcp.f32 %v3782_v26  ;;  %v3783_v0 = vadd.f32 1.0, %v5271_v4  ;;  %v5273_v36 = vpop.eup %5272  ;;  %v3922_v26 = vunpack.c.h.bf16 %v8449_v6 }
 0x990   :  { %5282 = vrcp.f32 %v3794_v40  ;;  %v3795_v13 = vadd.f32 1.0, %v5273_v36  ;;  %v5275_v23 = vpop.eup %5274 }
 0x991   :  { %5284 = vtanh.f32 %v3774_v56  ;;  %v5277_v17 = vpop.eup %5276 }
 0x992   :  { %5286 = vrcp.f32 %v3783_v0  ;;  %v5279_v22 = vpop.eup %5278  ;;  %v3808_v45 = vadd.f32 1.0, %v5277_v17 }
 0x993   :  { %5288 = vrcp.f32 %v3795_v13  ;;  %v3809_v60 = vadd.f32 1.0, %v5279_v22 }
 0x994   :  { %5290 = vrcp.f32 %v3808_v45 }
 0x995   :  { %5292 = vrcp.f32 %v3809_v60 }
 0x999   :  { %v5281_v48 = vpop.eup %5280 }
 0x99a   :  { %v5283_v43 = vpop.eup %5282  ;;  %v3816_v54 = vmul.f32 %v5281_v48, %v5275_v23 }
 0x99b   :  { %v5285_v49 = vpop.eup %5284  ;;  %v3814_v18 = vmul.f32 %v5283_v43, %v7509_v44  ;;  %v3920_v44 = vunpack.c.h.bf16 %v8448_v41 }
 0x99c   :  { %v5287_v10 = vpop.eup %5286 }
 0x99d   :  { %v7643_v15 = vadd.f32 %v3816_v54, %v3814_v18  ;;  %v3817_v7 = vmul.f32 %v5287_v10, %v5285_v49  ;;  %v3863_v30 = vpop.f32.mrb[80].mxu0  ;;  %v3906_v5 = vpop.f32.mrb[96].mxu1 }
 0x99e   :  { %v5289_v25 = vpop.eup %5288  ;;  %v3923_v38 = vadd.f32 %v3915_v42, %v3863_v30  ;;  %v3925_v14 = vadd.f32 %v3917_v31, %v3906_v5  ;;  %v3865_v50 = vpop.f32.mrb[81].mxu0 }
 0x99f   :  { %v3908_v24 = vpop.f32.mrb[97].mxu1  ;;  %v3815_v56 = vmul.f32 %v5289_v25, %v7517_v63  ;;  %v3924_v40 = vadd.f32 %v3916_v52, %v3865_v50  ;;  %v3867_v0 = vpop.f32.mrb[82].mxu0  ;;  %5294 = vtanh.f32 %v7643_v15  ;;  %v5579_v50 = vld [vmem:[#allocation9] ss:$16 sps:$4 sm:$0xff]  }
 0x9a0   :  { %v3926_v4 = vadd.f32 %v3918_v19, %v3908_v24  ;;  %v3910_v36 = vpop.f32.mrb[98].mxu1  ;;  %v4552_v13 = vmul.f32 -1.442695, %v3923_v38  ;;  %v3927_v23 = vadd.f32 %v3919_v35, %v3867_v0  ;;  %v3869_v22 = vpop.f32.mrb[83].mxu0 }
 0x9a1   :  { %v3929_v17 = vadd.f32 %v3921_v20, %v3910_v36  ;;  %v3912_v48 = vpop.f32.mrb[99].mxu1  ;;  %v7651_v43 = vadd.f32 %v3817_v7, %v3815_v56  ;;  %v4554_v54 = vmul.f32 -1.442695, %v3924_v40  ;;  %v3928_v49 = vadd.f32 %v3920_v44, %v3869_v22  ;;  %v5291_v33 = vpop.eup %5290  ;;  %v5581_v36 = vld [vmem:[#allocation9 + $0x60] ss:$16 sps:$4 sm:$0xff]  }
 0x9a2   :  { %5296 = vpow2.f32 %v4552_v13  ;;  %v4553_v18 = vmul.f32 -1.442695, %v3927_v23  ;;  %v3930_v45 = vadd.f32 %v3922_v26, %v3912_v48  ;;  %v5293_v42 = vpop.eup %5292  ;;  %v4556_v10 = vmul.f32 -1.442695, %v3926_v4  ;;  %v5582_v13 = vld [vmem:[#allocation9 + $0x68] ss:$16 sps:$4 sm:$0xff]  }
 0x9a3   :  { %5298 = vtanh.f32 %v7651_v43  ;;  %v4555_v63 = vmul.f32 -1.442695, %v3928_v49  ;;  %v5586_v23 = vld [vmem:[#allocation9 + $0xac] ss:$16 sps:$4 sm:$0xff]   ;;  %v5588_v22 = vld [vmem:[#allocation9 + $0xa8] ss:$16 sps:$4 sm:$0xff]  }
 0x9a4   :  { %5300 = vpow2.f32 %v4554_v54  ;;  %v4557_v35 = vmul.f32 -1.442695, %v3930_v45 }
 0x9a5   :  { %5302 = vpow2.f32 %v4553_v18 }
 0x9a6   :  { %5304 = vpow2.f32 %v4555_v63 }
 0x9a7   :  { %5306 = vtanh.f32 %v3925_v14  ;;  %v5580_v14 = vld [vmem:[#allocation9 + $0x8] ss:$16 sps:$4 sm:$0xff]  }
 0x9a8   :  { %5308 = vpow2.f32 %v4556_v10  ;;  %v4849_v10 = vld [vmem:[#allocation12 + $0x38] sm:$0xff]  }
 0x9a9   :  { %v5295_v60 = vpop.eup %5294 }
 0x9aa   :  { %v3822_v7 = vmul.f32 %v5295_v60, %v5291_v33  ;;  %v4842_v33 = vld [vmem:[#allocation12] sm:$0xff]  }
 0x9ac   :  { %v5297_v1 = vpop.eup %5296 }
 0x9ad   :  { %v5299_v31 = vpop.eup %5298  ;;  %v3937_v41 = vadd.f32 1.0, %v5297_v1 }
 0x9ae   :  { %v5301_v52 = vpop.eup %5300  ;;  %v3823_v30 = vmul.f32 %v5299_v31, %v5293_v42  ;;  %v5766_v42 = vmov 0.0  }
 0x9af   :  { %5310 = vrcp.f32 %v3937_v41  ;;  %v3949_v5 = vadd.f32 1.0, %v5301_v52  ;;  %v5303_v6 = vpop.eup %5302 }
 0x9b0   :  { %5312 = vtanh.f32 %v3929_v17  ;;  %v3980_v19 = vpack.c.bf16 %v3823_v30, %v3822_v7  ;;  %v3938_v44 = vadd.f32 1.0, %v5303_v6  ;;  %v5305_v25 = vpop.eup %5304  ;;  %v5587_v17 = vld [vmem:[#allocation9 + $0xa0] ss:$16 sps:$4 sm:$0xff]  }
 0x9b1   :  { %5314 = vrcp.f32 %v3949_v5  ;;  %v3950_v38 = vadd.f32 1.0, %v5305_v25  ;;  %v5307_v24 = vpop.eup %5306 }
 0x9b2   :  { %5316 = vpow2.f32 %v4557_v35  ;;  %4014 = vmatmul.mubr.bf16.vlgmr.msra.gmra.mrb[84].mxu0 %v3980_v19  ;;  %4057 = vmatmul.mubr.bf16.vlgmr.msra.gmra.mrb[100].mxu1 %v3980_v19  ;;  %v5309_v20 = vpop.eup %5308 }
 0x9b3   :  { %5318 = vrcp.f32 %v3938_v44  ;;  %4068 = vmatpush1.bf16.msra.mxu0 %v5579_v50  ;;  %4111 = vmatpush1.bf16.msra.mxu1 %v5580_v14 }
 0x9b4   :  { %4069 = vmatprep.subr.bf16.mxu0 %v7302_v27  ;;  %4112 = vmatprep.subr.bf16.mxu1 %v7305_v3  ;;  %5320 = vrcp.f32 %v3950_v38  ;;  %v3963_v3 = vadd.f32 1.0, %v5309_v20 }
 0x9b5   :  { %4099 = vmatprep.mubr.bf16.mxu0 %v8047_v8  ;;  %4142 = vmatprep.mubr.bf16.mxu1 %v8047_v8 }
 0x9b6   :  { %5322 = vrcp.f32 %v3963_v3 }
 0x9b7   :  { %4070 = vmatpush1.bf16.msra.mxu0 %v7310_v55  ;;  %4113 = vmatpush1.bf16.msra.mxu1 %v7313_v57 }
 0x9b8   :  { %4071 = vmatprep.subr.bf16.mxu0 %v7316_v58  ;;  %4114 = vmatprep.subr.bf16.mxu1 %v7319_v16 }
 0x9b9   :  { %v5311_v26 = vpop.eup %5310 }
 0x9ba   :  { %v5313_v56 = vpop.eup %5312  ;;  %v3971_v27 = vmul.f32 %v5311_v26, %v5307_v24 }
 0x9bb   :  { %v5315_v40 = vpop.eup %5314  ;;  %4072 = vmatpush1.bf16.msra.mxu0 %v7322_v12  ;;  %4115 = vmatpush1.bf16.msra.mxu1 %v7325_v21 }
 0x9bc   :  { %v5317_v8 = vpop.eup %5316  ;;  %v3969_v4 = vmul.f32 %v5315_v40, %v7535_v9  ;;  %4073 = vmatprep.subr.bf16.mxu0 %v7329_v46  ;;  %4116 = vmatprep.subr.bf16.mxu1 %v7332_v53  ;;  %v5583_v46 = vld [vmem:[#allocation9 + $0x80] ss:$16 sps:$4 sm:$0xff]   ;;  %v5584_v53 = vld [vmem:[#allocation9 + $0x88] ss:$16 sps:$4 sm:$0xff]   ;;  %v5585_v9 = vld [vmem:[#allocation9 + $0xa4] ss:$16 sps:$4 sm:$0xff]  }
 0x9bd   :  { %v5319_v55 = vpop.eup %5318  ;;  %v3964_v0 = vadd.f32 1.0, %v5317_v8 }
 0x9be   :  { %v3973_v57 = vadd.f32 %v3971_v27, %v3969_v4  ;;  %v3972_v58 = vmul.f32 %v5319_v55, %v5313_v56  ;;  %v5321_v16 = vpop.eup %5320 }
 0x9bf   :  { %4074 = vmatpush1.bf16.msra.mxu0 %v5581_v36  ;;  %4117 = vmatpush1.bf16.msra.mxu1 %v5582_v13  ;;  %v3970_v12 = vmul.f32 %v5321_v16, %v7543_v34  ;;  %v5589_v34 = vld [vmem:[#allocation9 + $0xc4] ss:$16 sps:$4 sm:$0xff]  }
 0x9c0   :  { %5324 = vtanh.f32 %v3973_v57  ;;  %4075 = vmatprep.subr.bf16.mxu0 %v7340_v32  ;;  %4118 = vmatprep.subr.bf16.mxu1 %v7343_v47  ;;  %v5590_v32 = vld [vmem:[#allocation9 + $0xcc] ss:$16 sps:$4 sm:$0xff]   ;;  %v5323_v47 = vpop.eup %5322 }
 0x9c1   :  { %v3974_v21 = vadd.f32 %v3972_v58, %v3970_v12  ;;  %5326 = vrcp.f32 %v3964_v0 }
 0x9c3   :  { %4076 = vmatpush1.bf16.msra.mxu0 %v5583_v46  ;;  %4119 = vmatpush1.bf16.msra.mxu1 %v5584_v53  ;;  %5328 = vtanh.f32 %v3974_v21 }
 0x9c4   :  { %4077 = vmatprep.subr.bf16.mxu0 %v5585_v9  ;;  %4120 = vmatprep.subr.bf16.mxu1 %v5586_v23 }
 0x9c7   :  { %4078 = vmatpush1.bf16.msra.mxu0 %v5587_v17  ;;  %4121 = vmatpush1.bf16.msra.mxu1 %v5588_v22 }
 0x9c8   :  { %4079 = vmatprep.subr.bf16.mxu0 %v5589_v34  ;;  %4122 = vmatprep.subr.bf16.mxu1 %v5590_v32 }
 0x9ca   :  { %v5325_v48 = vpop.eup %5324 }
 0x9cb   :  { %4080 = vmatpush1.bf16.msra.mxu0 %v7358_v29  ;;  %4123 = vmatpush1.bf16.msra.mxu1 %v7361_v11  ;;  %v3977_v54 = vmul.f32 %v5325_v48, %v5323_v47  ;;  %v5327_v49 = vpop.eup %5326  ;;  %v4843_v29 = vld [vmem:[#allocation12 + $0x8] sm:$0xff]   ;;  %v4844_v11 = vld [vmem:[#allocation12 + $0x10] sm:$0xff]  }
 0x9cc   :  { %4081 = vmatprep.subr.bf16.mxu0 %v7364_v37  ;;  %4124 = vmatprep.subr.bf16.mxu1 %v7367_v39  ;;  %v4845_v37 = vld [vmem:[#allocation12 + $0x18] sm:$0xff]   ;;  %v4846_v39 = vld [vmem:[#allocation12 + $0x20] sm:$0xff]  }
 0x9cd   :  { %v5329_v18 = vpop.eup %5328 }
 0x9ce   :  { %v3978_v45 = vmul.f32 %v5329_v18, %v5327_v49 }
 0x9cf   :  { %4082 = vmatpush1.bf16.msra.mxu0 %v7370_v59  ;;  %4125 = vmatpush1.bf16.msra.mxu1 %v7373_v62  ;;  %v4847_v59 = vld [vmem:[#allocation12 + $0x28] sm:$0xff]   ;;  %v4848_v62 = vld [vmem:[#allocation12 + $0x30] sm:$0xff]  }
 0x9d0   :  { %v3979_v63 = vpack.c.bf16 %v3978_v45, %v3977_v54  ;;  %4582 = vmatprep.subr.bf16.mxu0 %v5766_v42 }
 0x9d2   :  { %4100 = vmatmul.mubr.bf16.vlgmr.msra.gmra.mrb[84].mxu0 %v3979_v63  ;;  %4143 = vmatmul.mubr.bf16.vlgmr.msra.gmra.mrb[100].mxu1 %v3979_v63 }
 0x9d3   :  { %4583 = vmatpush3.bf16.msra.mxu0 %v4842_v33  ;;  %4598 = vmatprep.mubr.msk.bf16.mxu0 %vm5767_vm1, %v5766_v42 }
 0x9d4   :  { %4584 = vmatprep.subr.bf16.mxu0 %v5766_v42 }
 0x9d7   :  { %4585 = vmatpush3.bf16.msra.mxu0 %v4843_v29 }
 0x9d8   :  { %4586 = vmatprep.subr.bf16.mxu0 %v5766_v42 }
 0x9db   :  { %4587 = vmatpush3.bf16.msra.mxu0 %v4844_v11 }
 0x9dc   :  { %4588 = vmatprep.subr.bf16.mxu0 %v5766_v42 }
 0x9df   :  { %4589 = vmatpush3.bf16.msra.mxu0 %v4845_v37 }
 0x9e0   :  { %4590 = vmatprep.subr.bf16.mxu0 %v5766_v42 }
 0x9e3   :  { %4591 = vmatpush3.bf16.msra.mxu0 %v4846_v39 }
 0x9e4   :  { %4592 = vmatprep.subr.bf16.mxu0 %v5766_v42 }
 0x9e7   :  { %4593 = vmatpush3.bf16.msra.mxu0 %v4847_v59 }
 0x9e8   :  { %4594 = vmatprep.subr.bf16.mxu0 %v5766_v42 }
 0x9eb   :  { %4595 = vmatpush3.bf16.msra.mxu0 %v4848_v62 }
 0x9ec   :  { %4596 = vmatprep.subr.bf16.mxu0 %v5766_v42 }
 0x9ef   :  { %4597 = vmatpush3.bf16.msra.mxu0 %v4849_v10 }
 0xaa5   :  { %v4101_v60 = vpop.f32.mrb[84].mxu0  ;;  %v4144_v1 = vpop.f32.mrb[100].mxu1 }
 0xaa6   :  { %v4153_v31 = vadd.f32 %v4101_v60, %v8442_v2  ;;  %v4103_v41 = vpop.f32.mrb[85].mxu0  ;;  %v4146_v52 = vpop.f32.mrb[101].mxu1  ;;  %v4155_v20 = vadd.f32 %v4144_v1, %v8445_v28 }
 0xaa7   :  { %v4154_v35 = vadd.f32 %v4103_v41, %v8443_v51  ;;  %v4105_v7 = vpop.f32.mrb[86].mxu0  ;;  %v4148_v30 = vpop.f32.mrb[102].mxu1  ;;  %v4156_v24 = vadd.f32 %v4146_v52, %v8444_v61 }
 0xaa8   :  { %v4558_v5 = vmul.f32 -1.442695, %v4153_v31  ;;  %v4157_v6 = vadd.f32 %v4105_v7, %v8442_v2  ;;  %v4107_v19 = vpop.f32.mrb[87].mxu0  ;;  %v4150_v44 = vpop.f32.mrb[103].mxu1  ;;  %v4159_v2 = vadd.f32 %v4148_v30, %v8445_v28 }
 0xaa9   :  { %v4560_v25 = vmul.f32 -1.442695, %v4154_v35  ;;  %v4158_v38 = vadd.f32 %v4107_v19, %v8443_v51  ;;  %v4562_v26 = vmul.f32 -1.442695, %v4156_v24  ;;  %v4160_v56 = vadd.f32 %v4150_v44, %v8444_v61 }
 0xaaa   :  { %5330 = vpow2.f32 %v4558_v5  ;;  %v4559_v50 = vmul.f32 -1.442695, %v4157_v6 }
 0xaab   :  { %5332 = vpow2.f32 %v4560_v25  ;;  %v4561_v14 = vmul.f32 -1.442695, %v4158_v38  ;;  %v4563_v51 = vmul.f32 -1.442695, %v4160_v56 }
 0xaac   :  { %5334 = vpow2.f32 %v4559_v50 }
 0xaad   :  { %5336 = vpow2.f32 %v4561_v14 }
 0xaae   :  { %5338 = vtanh.f32 %v4155_v20 }
 0xaaf   :  { %5340 = vpow2.f32 %v4562_v26 }
 0xab0   :  { %5342 = vtanh.f32 %v4159_v2 }
 0xab4   :  { %v5331_v27 = vpop.eup %5330 }
 0xab5   :  { %v5333_v40 = vpop.eup %5332  ;;  %v4167_v3 = vadd.f32 1.0, %v5331_v27 }
 0xab6   :  { %v4179_v8 = vadd.f32 1.0, %v5333_v40  ;;  %v5335_v4 = vpop.eup %5334 }
 0xab7   :  { %5344 = vrcp.f32 %v4167_v3  ;;  %v4168_v55 = vadd.f32 1.0, %v5335_v4  ;;  %v5337_v57 = vpop.eup %5336 }
 0xab8   :  { %5346 = vrcp.f32 %v4179_v8  ;;  %v4180_v58 = vadd.f32 1.0, %v5337_v57  ;;  %v5339_v61 = vpop.eup %5338 }
 0xab9   :  { %5348 = vpow2.f32 %v4563_v51  ;;  %v5341_v16 = vpop.eup %5340 }
 0xaba   :  { %5350 = vrcp.f32 %v4168_v55  ;;  %v5343_v28 = vpop.eup %5342  ;;  %v4193_v12 = vadd.f32 1.0, %v5341_v16 }
 0xabb   :  { %5352 = vrcp.f32 %v4180_v58 }
 0xabc   :  { %5354 = vrcp.f32 %v4193_v12 }
 0xac1   :  { %v5345_v0 = vpop.eup %5344 }
 0xac2   :  { %v5347_v36 = vpop.eup %5346  ;;  %v4201_v13 = vmul.f32 %v5345_v0, %v5339_v61 }
 0xac3   :  { %v5349_v21 = vpop.eup %5348  ;;  %v4199_v46 = vmul.f32 %v5347_v36, %v7643_v15  ;;  %v4564_v15 = vld [vmem:[%s7709_s8] ss:$0 sm:$0xff] }
 0xac4   :  { %v5351_v53 = vpop.eup %5350  ;;  %v4194_v22 = vadd.f32 1.0, %v5349_v21 }
 0xac5   :  { %v4203_v9 = vadd.f32 %v4201_v13, %v4199_v46  ;;  %v4202_v23 = vmul.f32 %v5351_v53, %v5343_v28  ;;  %v5353_v17 = vpop.eup %5352 }
 0xac6   :  { %v4200_v34 = vmul.f32 %v5353_v17, %v7651_v43  ;;  %v5355_v47 = vpop.eup %5354 }
 0xac7   :  { %5356 = vtanh.f32 %v4203_v9 }
 0xac8   :  { %v4204_v32 = vadd.f32 %v4202_v23, %v4200_v34  ;;  %5358 = vrcp.f32 %v4194_v22 }
 0xaca   :  { %5360 = vtanh.f32 %v4204_v32 }
 0xad1   :  { %v5357_v48 = vpop.eup %5356 }
 0xad2   :  { %v4207_v54 = vmul.f32 %v5357_v48, %v5355_v47  ;;  %v5359_v49 = vpop.eup %5358 }
 0xad4   :  { %v5361_v18 = vpop.eup %5360 }
 0xad5   :  { %v4208_v45 = vmul.f32 %v5361_v18, %v5359_v49 }
 0xad7   :  { %v4209_v63 = vpack.c.bf16 %v4208_v45, %v4207_v54 }
 0xad9   :  { %4599 = vmatmul.mubr.bf16.vlgmr.msra.gmra.mrb[88].mxu0 %v4209_v63 }
 0xbac   :  { %v4315_v33 = vpop.f32.mrb[88].mxu0 }
 0xbad   :  { %v4316_v42 = vadd.f32 %v4564_v15, %v4315_v33  ;;  %v4600_v43 = vpop.f32.mrb[89].mxu0 }
 0xbae   :  { %v4318_v29 = vpop.f32.mrb[90].mxu0 }
 0xbaf   :  { %4322 = vst [vmem:[#allocation14] sm:$0xff] %v4316_v42  ;;  %v4319_v11 = vadd.f32 %v4564_v15, %v4318_v29  ;;  %v4601_v37 = vpop.f32.mrb[91].mxu0 }
 0xbb1   :  { %4323 = vst [vmem:[#allocation14 + $0x8] sm:$0xff] %v4319_v11 }
 0xbb2   :  { %5734 = shalt.err (!%p5731_p10)
}
 0xbb3   :  { %s5735_s25 = scalar_lea.hbm %s7710_s9, 256 }
 0xbb4   :  { %p5736_p11 = scmp.ne.s32.totalorder %s7710_s9, %s5735_s25  ;;  %p5739_p12 = scmp.lt.u32.totalorder %s5735_s25, %s7710_s9 }
 0xbb6   :  { %p5741_p13 = pnand %p5739_p12, %p5736_p11 }
 0xbb8   :  { %5744 = shalt.err (!%p5741_p13)
}
 0xbb9   :  { %s5769_s2 = smov 128   ;;  %s5770_s30 = smov 8  }
 0xbba   :  { %4335 = dma.vmem_to_hbm [thread:$0]  %s4330_s21, 256, %s7710_s9, [#allocation5], %s5769_s2, %s5769_s2, %s5770_s30  }
 0xbbb   :  { %5753 = dma.done.wait [#allocation5], 256  }
 0xbbc   :  { %5754 = vsyncadd [#allocation5], 4294967040 }
 0xbbd   :  { %4339 = vsyncpa [#allocation4], 1 }
 0xbbe   :  { %4340 = vsyncpa [#allocation7], 1 }
 0xbbf   :  { %4341 = vsyncpa [#allocation10], 1 }
 0xbc0   :  { %4342 = vsyncpa [#allocation13], 1 }
 0xbc1   :  { %4343 = vsyncpa [#allocation5], 1 }

</bundles_post_ra>
